<compile_context>
chip_gen: v7x
topology: tpu7x:2x2x1
jax: 0.10.0
libtpu: 0.0.40
codegen_flags: <defaults>
</compile_context>

<pallas_src>
import jax
import jax.numpy as jnp
from jax.experimental import pallas as pl
from jax.experimental.pallas import tpu as pltpu


def _patch_merging_kernel(x_ref, w1_ref, b1_ref, w2_ref, b2_ref,
                          wr_ref, br_ref, we_ref, be_ref,
                          w3_ref, b3_ref, o_ref, p2_ref):
    # x_ref : (bb, 4, Ho, Wo, dim) bf16, parity-packed: x[b, 2p+q, i, j, :]
    #         is the input pixel (2i+p, 2j+q) of image b (NHWC channels).
    # w1_ref: (dim, hid) bf16 folded conv1 weight, b1_ref (1, hid) f32
    # w2_ref: (9, hid) f32 folded depthwise conv2 weight (row=kh*3+kw), b2 (1,hid)
    # wr_ref: (hid, rd) bf16, br_ref (1, rd) f32     -- SE reduce
    # we_ref: (rd, hid) bf16, be_ref (1, hid) f32    -- SE expand
    # w3_ref: (hid, out_pad) bf16, b3_ref (1, out_pad) f32
    # o_ref : (bb*Ho*Wo, out_pad)
    # p2_ref: VMEM (bb, 4, Ho+1, Wo+1, hid) bf16 parity planes of the
    #         zero-padded conv1 activation:
    #         p2[b, 2*pp+qq, I, J, :] == pad(y1_b)[2*I+pp, 2*J+qq, :]
    bb = x_ref.shape[0]
    Ho = x_ref.shape[2]
    Wo = x_ref.shape[3]
    dim = x_ref.shape[4]
    hid = w2_ref.shape[1]

    # Zero only the 1-wide border strips: they are the only scratch cells that
    # stage 2 reads but stage 1 never writes (they act as conv2's zero pad).
    # Cheap (O((Ho+Wo)*hid)) so we do it every step, which also keeps the
    # kernel correct when a megacore splits the "parallel" batch axis.
    p2_ref[:, :, 0:1, :, :] = jnp.zeros((bb, 4, 1, Wo + 1, hid), p2_ref.dtype)
    p2_ref[:, :, :, 0:1, :] = jnp.zeros((bb, 4, Ho + 1, 1, hid), p2_ref.dtype)

    # ---- stage 1: 1x1 conv + BN + ReLU -- one MXU matmul over all pixels ---
    xp = x_ref[...].reshape(bb * 4 * Ho * Wo, dim)          # bf16
    y1 = jnp.dot(xp, w1_ref[...], preferred_element_type=jnp.float32)
    y1 = jnp.maximum(y1 + b1_ref[...], 0.0)
    y1 = y1.astype(p2_ref.dtype).reshape(bb, 4, Ho, Wo, hid)

    # parity scatter into the zero-padded scratch; the +1 pad flips parity.
    p2_ref[:, 3, 0:Ho, 0:Wo, :] = y1[:, 0]          # input parity (p=0,q=0)
    p2_ref[:, 2, 0:Ho, 1:Wo + 1, :] = y1[:, 1]      # (p=0,q=1)
    p2_ref[:, 1, 1:Ho + 1, 0:Wo, :] = y1[:, 2]      # (p=1,q=0)
    p2_ref[:, 0, 1:Ho + 1, 1:Wo + 1, :] = y1[:, 3]  # (p=1,q=1)

    # ---- stage 2: depthwise 3x3 stride-2 conv + BN + ReLU ------------------
    w2 = w2_ref[...]                                 # (9, hid) f32 (VPU path)
    # accumulator starts at the folded bias -> one less full-tensor add.
    acc = jnp.broadcast_to(b2_ref[...].reshape(1, 1, 1, hid),
                           (bb, Ho, Wo, hid))
    for kh in range(3):
        for kw in range(3):
            plane = 2 * (kh % 2) + (kw % 2)
            tap = p2_ref[:, plane, kh // 2:kh // 2 + Ho,
                         kw // 2:kw // 2 + Wo, :]
            wk = w2[kh * 3 + kw].reshape(1, 1, 1, hid)
            acc = acc + tap.astype(jnp.float32) * wk
    y2 = jnp.maximum(acc, 0.0).reshape(bb, Ho * Wo, hid)    # f32

    # ---- stage 3: SqueezeExcite (per image) --------------------------------
    pooled = jnp.mean(y2, axis=1)                            # (bb, hid)
    z = jnp.dot(pooled.astype(jnp.bfloat16), wr_ref[...],
                preferred_element_type=jnp.float32) + br_ref[...]
    z = jnp.maximum(z, 0.0)
    g = jnp.dot(z.astype(jnp.bfloat16), we_ref[...],
                preferred_element_type=jnp.float32) + be_ref[...]
    g = jax.nn.sigmoid(g)                                    # (bb, hid)
    y3 = y2 * g.reshape(bb, 1, hid)

    # ---- stage 4: 1x1 conv + BN (no activation) ----------------------------
    out = jnp.dot(y3.reshape(bb * Ho * Wo, hid).astype(jnp.bfloat16),
                  w3_ref[...], preferred_element_type=jnp.float32)
    o_ref[...] = (out + b3_ref[...]).astype(o_ref.dtype)


def _pick_batch_block(N, Ho, Wo, dim, hid, out_pad, budget_bytes=20 << 20):
    """Largest divisor of N whose per-step VMEM footprint fits the budget."""
    def est(d):
        return (d * 4 * Ho * Wo * dim * 2 * 2                # bf16 x, dbl-buf
                + d * 4 * (Ho + 1) * (Wo + 1) * hid * 2      # bf16 scratch
                + 4 * d * Ho * Wo * hid * 4                  # f32 temporaries
                + d * Ho * Wo * out_pad * 4 * 2)             # out, dbl-buf
    best = 1
    for d in range(1, N + 1):
        if N % d:
            continue
        if est(d) > budget_bytes:
            continue
        if d != N and (d * Ho * Wo) % 8:
            continue        # keep the output block sublane-aligned when gridded
        best = d
    return best


def patch_merging_forward(x_nchw, params, eps=1e-5):
    """PatchMerging forward. Input NCHW, output NCHW with spatial halved."""
    N, dim, H, W = x_nchw.shape
    if H % 2 or W % 2:
        raise ValueError("PatchMerging kernel requires even H and W")
    Ho, Wo = H // 2, W // 2
    hid = params["w2"].shape[-1]
    out_dim = params["w3"].shape[-1]
    rd = params["se_wr"].shape[-1]

    # Lane-dense output only when padding is cheap (misaligned and > 128);
    # for tiny out_dim the masked store is cheaper than 128/out_dim x bytes.
    if out_dim > 128 and out_dim % 128:
        out_pad = ((out_dim + 127) // 128) * 128
    else:
        out_pad = out_dim

    # NCHW -> parity-packed (N, 4, Ho, Wo, dim) in ONE relayout pass, bf16 to
    # halve the HBM->VMEM input DMA (MXU consumes bf16 with f32 accumulation).
    # TODO(synk): drop this transpose (and the output one) entirely if the
    # surrounding model keeps activations NHWC.
    x = jnp.transpose(x_nchw.reshape(N, dim, Ho, 2, Wo, 2),
                      (0, 3, 5, 2, 4, 1)).reshape(N, 4, Ho, Wo, dim)
    x = x.astype(jnp.bfloat16)

    # Fold inference BatchNorm into conv weights / biases.
    def fold(w, g, b, m, v):
        s = g * jax.lax.rsqrt(v + eps)
        return w * s, b - m * s

    w1f, b1 = fold(params["w1"], params["gamma1"], params["beta1"],
                   params["mean1"], params["var1"])              # (dim, hid)
    w2f, b2 = fold(params["w2"].reshape(9, hid), params["gamma2"],
                   params["beta2"], params["mean2"], params["var2"])
    w3f, b3 = fold(params["w3"], params["gamma3"], params["beta3"],
                   params["mean3"], params["var3"])              # (hid, out)

    if out_pad != out_dim:
        w3f = jnp.pad(w3f, ((0, 0), (0, out_pad - out_dim)))
        b3 = jnp.pad(b3, ((0, out_pad - out_dim),))

    # bf16 operands for every MXU matmul; biases / dwconv weights stay f32.
    w1b = w1f.astype(jnp.bfloat16)
    w3b = w3f.astype(jnp.bfloat16)
    wr = params["se_wr"].astype(jnp.bfloat16)
    we = params["se_we"].astype(jnp.bfloat16)
    w2f = w2f.astype(jnp.float32)
    b1 = b1.reshape(1, hid).astype(jnp.float32)
    b2 = b2.reshape(1, hid).astype(jnp.float32)
    b3 = b3.reshape(1, out_pad).astype(jnp.float32)
    br = params["se_br"].reshape(1, rd).astype(jnp.float32)
    be = params["se_be"].reshape(1, hid).astype(jnp.float32)

    bb = _pick_batch_block(N, Ho, Wo, dim, hid, out_pad)

    def whole(arr):
        nd = arr.ndim
        return pl.BlockSpec(arr.shape, lambda *_, _nd=nd: (0,) * _nd)
    # TODO(synk): single-buffer (pl.Buffered(1)) the constant weight specs to
    # reclaim VMEM on v7x, and add row tiling with a 1-row halo (plus a
    # two-pass SE pooling) for very large H*W*hid.

    out = pl.pallas_call(
        _patch_merging_kernel,
        out_shape=jax.ShapeDtypeStruct((N * Ho * Wo, out_pad), x_nchw.dtype),
        grid=(N // bb,),
        in_specs=[
            pl.BlockSpec((bb, 4, Ho, Wo, dim), lambda n: (n, 0, 0, 0, 0)),
            whole(w1b), whole(b1),
            whole(w2f), whole(b2),
            whole(wr), whole(br), whole(we), whole(be),
            whole(w3b), whole(b3),
        ],
        out_specs=pl.BlockSpec((bb * Ho * Wo, out_pad), lambda n: (n, 0)),
        scratch_shapes=[pltpu.VMEM((bb, 4, Ho + 1, Wo + 1, hid),
                                   jnp.bfloat16)],
        compiler_params=pltpu.CompilerParams(
            dimension_semantics=("parallel",),
            vmem_limit_bytes=48 * 1024 * 1024),
    )(x, w1b, b1, w2f, b2, wr, br, we, be, w3b, b3)

    if out_pad != out_dim:
        out = out[:, :out_dim]
    return jnp.transpose(out.reshape(N, Ho, Wo, out_dim), (0, 3, 1, 2))


# ----------------------------- parameters ----------------------------------
def _make_divisible(v, divisor=8, min_value=None):
    if min_value is None:
        min_value = divisor
    new_v = max(min_value, int(v + divisor / 2) // divisor * divisor)
    if new_v < 0.9 * v:
        new_v += divisor
    return new_v


def make_patch_merging_params(key, dim, out_dim):
    hid = dim * 4
    rd = _make_divisible(hid * 0.25, 8)
    ks = jax.random.split(key, 10)

    def bn(k, c):
        k1, k2, k3, k4 = jax.random.split(k, 4)
        return (1.0 + 0.1 * jax.random.normal(k1, (c,), jnp.float32),   # gamma
                0.1 * jax.random.normal(k2, (c,), jnp.float32),         # beta
                0.1 * jax.random.normal(k3, (c,), jnp.float32),         # mean
                0.5 + jax.random.uniform(k4, (c,), jnp.float32))        # var

    p = {}
    p["w1"] = 0.2 * jax.random.normal(ks[0], (dim, hid), jnp.float32)
    p["gamma1"], p["beta1"], p["mean1"], p["var1"] = bn(ks[1], hid)
    p["w2"] = 0.2 * jax.random.normal(ks[2], (3, 3, hid), jnp.float32)
    p["gamma2"], p["beta2"], p["mean2"], p["var2"] = bn(ks[3], hid)
    p["se_wr"] = 0.2 * jax.random.normal(ks[4], (hid, rd), jnp.float32)
    p["se_br"] = 0.1 * jax.random.normal(ks[5], (rd,), jnp.float32)
    p["se_we"] = 0.2 * jax.random.normal(ks[6], (rd, hid), jnp.float32)
    p["se_be"] = 0.1 * jax.random.normal(ks[7], (hid,), jnp.float32)
    p["w3"] = 0.2 * jax.random.normal(ks[8], (hid, out_dim), jnp.float32)
    p["gamma3"], p["beta3"], p["mean3"], p["var3"] = bn(ks[9], out_dim)
    return p


# ---------------------- pure-JAX reference (f32) ----------------------------
def patch_merging_reference(x_nchw, params, eps=1e-5):
    x = jnp.transpose(x_nchw, (0, 2, 3, 1))
    N, H, W, _ = x.shape
    hid = params["w2"].shape[-1]
    Ho, Wo = H // 2, W // 2

    def bn(y, g, b, m, v):
        s = g * jax.lax.rsqrt(v + eps)
        return y * s + (b - m * s)

    y1 = jax.nn.relu(bn(jnp.einsum("nhwc,cd->nhwd", x, params["w1"]),
                        params["gamma1"], params["beta1"],
                        params["mean1"], params["var1"]))
    y1p = jnp.pad(y1, ((0, 0), (1, 1), (1, 1), (0, 0)))
    acc = jnp.zeros((N, Ho, Wo, hid), jnp.float32)
    for kh in range(3):
        for kw in range(3):
            acc = acc + (y1p[:, kh:kh + 2 * Ho:2, kw:kw + 2 * Wo:2, :]
                         * params["w2"][kh, kw])
    y2 = jax.nn.relu(bn(acc, params["gamma2"], params["beta2"],
                        params["mean2"], params["var2"]))
    pooled = jnp.mean(y2, axis=(1, 2), keepdims=True)
    z = jax.nn.relu(jnp.einsum("nhwc,cr->nhwr", pooled, params["se_wr"])
                    + params["se_br"])
    gate = jax.nn.sigmoid(jnp.einsum("nhwr,rc->nhwc", z, params["se_we"])
                          + params["se_be"])
    y3 = y2 * gate
    out = bn(jnp.einsum("nhwc,cd->nhwd", y3, params["w3"]),
             params["gamma3"], params["beta3"],
             params["mean3"], params["var3"])
    return jnp.transpose(out, (0, 3, 1, 2))


if __name__ == "__main__":
    key = jax.random.PRNGKey(0)
    kx, kp = jax.random.split(key)

    N, dim, H, W = 2, 4, 16, 16          # hid_dim = 16, out_dim = 8
    out_dim = 8
    x = jax.random.normal(kx, (N, dim, H, W), jnp.float32)
    params = make_patch_merging_params(kp, dim=dim, out_dim=out_dim)

    out = jax.jit(patch_merging_forward)(x, params)
    jax.block_until_ready(out)
    assert out.shape == (N, out_dim, H // 2, W // 2)

    ref = patch_merging_reference(x, params)
    max_err = float(jnp.max(jnp.abs(out - ref)))
    assert max_err < 5e-2, f"max abs err {max_err}"
    print("KERNEL_OK")
</pallas_src>

<mosaic_0001>
module attributes {stable_mosaic.version = 11 : i64} {
  func.func @_patch_merging_kernel(%arg0: i32, %arg1: memref<2x4x8x8x4xbf16, #tpu.memory_space<vmem>>, %arg2: memref<4x16xbf16, #tpu.memory_space<vmem>>, %arg3: memref<1x16xf32, #tpu.memory_space<vmem>>, %arg4: memref<9x16xf32, #tpu.memory_space<vmem>>, %arg5: memref<1x16xf32, #tpu.memory_space<vmem>>, %arg6: memref<16x8xbf16, #tpu.memory_space<vmem>>, %arg7: memref<1x8xf32, #tpu.memory_space<vmem>>, %arg8: memref<8x16xbf16, #tpu.memory_space<vmem>>, %arg9: memref<1x16xf32, #tpu.memory_space<vmem>>, %arg10: memref<16x8xbf16, #tpu.memory_space<vmem>>, %arg11: memref<1x8xf32, #tpu.memory_space<vmem>>, %arg12: memref<128x8xf32, #tpu.memory_space<vmem>>, %arg13: memref<2x4x9x9x16xbf16, #tpu.memory_space<vmem>>) attributes {dimension_semantics = [#tpu.dimension_semantics<parallel>], iteration_bounds = array<i64: 1>, scalar_prefetch = 0 : i64, scratch_operands = 1 : i64, tpu.core_type = #tpu.core_type<tc>, window_params = [{transform_indices = @transform_0, window_bounds = array<i64: 2, 4, 8, 8, 4>}, {pipeline_mode = #tpu.pipeline_mode<synchronous>, transform_indices = @transform_1, window_bounds = array<i64: 4, 16>}, {pipeline_mode = #tpu.pipeline_mode<synchronous>, transform_indices = @transform_2, window_bounds = array<i64: 1, 16>}, {pipeline_mode = #tpu.pipeline_mode<synchronous>, transform_indices = @transform_3, window_bounds = array<i64: 9, 16>}, {pipeline_mode = #tpu.pipeline_mode<synchronous>, transform_indices = @transform_4, window_bounds = array<i64: 1, 16>}, {pipeline_mode = #tpu.pipeline_mode<synchronous>, transform_indices = @transform_5, window_bounds = array<i64: 16, 8>}, {pipeline_mode = #tpu.pipeline_mode<synchronous>, transform_indices = @transform_6, window_bounds = array<i64: 1, 8>}, {pipeline_mode = #tpu.pipeline_mode<synchronous>, transform_indices = @transform_7, window_bounds = array<i64: 8, 16>}, {pipeline_mode = #tpu.pipeline_mode<synchronous>, transform_indices = @transform_8, window_bounds = array<i64: 1, 16>}, {pipeline_mode = #tpu.pipeline_mode<synchronous>, transform_indices = @transform_9, window_bounds = array<i64: 16, 8>}, {pipeline_mode = #tpu.pipeline_mode<synchronous>, transform_indices = @transform_10, window_bounds = array<i64: 1, 8>}, {transform_indices = @transform_11, window_bounds = array<i64: 128, 8>}]} {
    %cst = arith.constant 0.000000e+00 : bf16
    %0 = vector.broadcast %cst : bf16 to vector<2x4x1x9x16xbf16>
    %c0 = arith.constant 0 : index
    %c0_0 = arith.constant 0 : index
    %c0_1 = arith.constant 0 : index
    %c0_2 = arith.constant 0 : index
    %c0_3 = arith.constant 0 : index
    %1 = vector.load %arg13[%c0, %c0_0, %c0_1, %c0_2, %c0_3] : memref<2x4x9x9x16xbf16, #tpu.memory_space<vmem>>, vector<2x4x1x9x16xbf16>
    tpu.vector_store %arg13[%c0, %c0_0, %c0_1, %c0_2, %c0_3], %0 {strides = array<i32>} : memref<2x4x9x9x16xbf16, #tpu.memory_space<vmem>>, vector<2x4x1x9x16xbf16>,
    %cst_4 = arith.constant 0.000000e+00 : bf16
    %2 = vector.broadcast %cst_4 : bf16 to vector<2x4x9x1x16xbf16>
    %c0_5 = arith.constant 0 : index
    %c0_6 = arith.constant 0 : index
    %c0_7 = arith.constant 0 : index
    %c0_8 = arith.constant 0 : index
    %c0_9 = arith.constant 0 : index
    %3 = vector.load %arg13[%c0_5, %c0_6, %c0_7, %c0_8, %c0_9] : memref<2x4x9x9x16xbf16, #tpu.memory_space<vmem>>, vector<2x4x9x1x16xbf16>
    tpu.vector_store %arg13[%c0_5, %c0_6, %c0_7, %c0_8, %c0_9], %2 {strides = array<i32>} : memref<2x4x9x9x16xbf16, #tpu.memory_space<vmem>>, vector<2x4x9x1x16xbf16>,
    %c0_10 = arith.constant 0 : index
    %c0_11 = arith.constant 0 : index
    %c0_12 = arith.constant 0 : index
    %c0_13 = arith.constant 0 : index
    %c0_14 = arith.constant 0 : index
    %4 = vector.load %arg1[%c0_10, %c0_11, %c0_12, %c0_13, %c0_14] : memref<2x4x8x8x4xbf16, #tpu.memory_space<vmem>>, vector<2x4x8x8x4xbf16>
    %5 = vector.shape_cast %4 : vector<2x4x8x8x4xbf16> to vector<512x4xbf16>
    %c0_15 = arith.constant 0 : index
    %c0_16 = arith.constant 0 : index
    %6 = vector.load %arg2[%c0_15, %c0_16] : memref<4x16xbf16, #tpu.memory_space<vmem>>, vector<4x16xbf16>
    %cst_17 = arith.constant dense<0.000000e+00> : vector<512x16xf32>
    %7 = tpu.matmul %5, %6, %cst_17 {dimension_numbers = #tpu.dot_dimension_numbers<[1], [0], [0], [1], [0, 0, 1, 1], [], []>} : vector<512x4xbf16>, vector<4x16xbf16>, vector<512x16xf32> -> vector<512x16xf32>
    %c0_18 = arith.constant 0 : index
    %c0_19 = arith.constant 0 : index
    %8 = vector.load %arg3[%c0_18, %c0_19] : memref<1x16xf32, #tpu.memory_space<vmem>>, vector<1x16xf32>
    %9 = vector.broadcast %8 : vector<1x16xf32> to vector<512x16xf32>
    %10 = arith.addf %7, %9 : vector<512x16xf32>
    %cst_20 = arith.constant 0.000000e+00 : f32
    %11 = vector.broadcast %cst_20 : f32 to vector<512x16xf32>
    %12 = arith.maximumf %10, %11 : vector<512x16xf32>
    %13 = arith.truncf %12 : vector<512x16xf32> to vector<512x16xbf16>
    %14 = vector.shape_cast %13 : vector<512x16xbf16> to vector<2x4x8x8x16xbf16>
    %15 = vector.extract_strided_slice %14 {offsets = [0, 0, 0, 0, 0], sizes = [2, 1, 8, 8, 16], strides = [1, 1, 1, 1, 1]} : vector<2x4x8x8x16xbf16> to vector<2x1x8x8x16xbf16>
    %16 = vector.shape_cast %15 : vector<2x1x8x8x16xbf16> to vector<2x8x8x16xbf16>
    %c0_21 = arith.constant 0 : index
    %c3 = arith.constant 3 : index
    %c0_22 = arith.constant 0 : index
    %c0_23 = arith.constant 0 : index
    %c0_24 = arith.constant 0 : index
    %17 = vector.load %arg13[%c0_21, %c3, %c0_22, %c0_23, %c0_24] : memref<2x4x9x9x16xbf16, #tpu.memory_space<vmem>>, vector<2x1x8x8x16xbf16>
    %18 = vector.shape_cast %17 : vector<2x1x8x8x16xbf16> to vector<2x8x8x16xbf16>
    %19 = vector.shape_cast %16 : vector<2x8x8x16xbf16> to vector<2x1x8x8x16xbf16>
    tpu.vector_store %arg13[%c0_21, %c3, %c0_22, %c0_23, %c0_24], %19 {strides = array<i32>} : memref<2x4x9x9x16xbf16, #tpu.memory_space<vmem>>, vector<2x1x8x8x16xbf16>,
    %20 = vector.extract_strided_slice %14 {offsets = [0, 1, 0, 0, 0], sizes = [2, 1, 8, 8, 16], strides = [1, 1, 1, 1, 1]} : vector<2x4x8x8x16xbf16> to vector<2x1x8x8x16xbf16>
    %21 = vector.shape_cast %20 : vector<2x1x8x8x16xbf16> to vector<2x8x8x16xbf16>
    %c0_25 = arith.constant 0 : index
    %c2 = arith.constant 2 : index
    %c0_26 = arith.constant 0 : index
    %c1 = arith.constant 1 : index
    %c0_27 = arith.constant 0 : index
    %22 = vector.load %arg13[%c0_25, %c2, %c0_26, %c1, %c0_27] : memref<2x4x9x9x16xbf16, #tpu.memory_space<vmem>>, vector<2x1x8x8x16xbf16>
    %23 = vector.shape_cast %22 : vector<2x1x8x8x16xbf16> to vector<2x8x8x16xbf16>
    %24 = vector.shape_cast %21 : vector<2x8x8x16xbf16> to vector<2x1x8x8x16xbf16>
    tpu.vector_store %arg13[%c0_25, %c2, %c0_26, %c1, %c0_27], %24 {strides = array<i32>} : memref<2x4x9x9x16xbf16, #tpu.memory_space<vmem>>, vector<2x1x8x8x16xbf16>,
    %25 = vector.extract_strided_slice %14 {offsets = [0, 2, 0, 0, 0], sizes = [2, 1, 8, 8, 16], strides = [1, 1, 1, 1, 1]} : vector<2x4x8x8x16xbf16> to vector<2x1x8x8x16xbf16>
    %26 = vector.shape_cast %25 : vector<2x1x8x8x16xbf16> to vector<2x8x8x16xbf16>
    %c0_28 = arith.constant 0 : index
    %c1_29 = arith.constant 1 : index
    %c1_30 = arith.constant 1 : index
    %c0_31 = arith.constant 0 : index
    %c0_32 = arith.constant 0 : index
    %27 = vector.load %arg13[%c0_28, %c1_29, %c1_30, %c0_31, %c0_32] : memref<2x4x9x9x16xbf16, #tpu.memory_space<vmem>>, vector<2x1x8x8x16xbf16>
    %28 = vector.shape_cast %27 : vector<2x1x8x8x16xbf16> to vector<2x8x8x16xbf16>
    %29 = vector.shape_cast %26 : vector<2x8x8x16xbf16> to vector<2x1x8x8x16xbf16>
    tpu.vector_store %arg13[%c0_28, %c1_29, %c1_30, %c0_31, %c0_32], %29 {strides = array<i32>} : memref<2x4x9x9x16xbf16, #tpu.memory_space<vmem>>, vector<2x1x8x8x16xbf16>,
    %30 = vector.extract_strided_slice %14 {offsets = [0, 3, 0, 0, 0], sizes = [2, 1, 8, 8, 16], strides = [1, 1, 1, 1, 1]} : vector<2x4x8x8x16xbf16> to vector<2x1x8x8x16xbf16>
    %31 = vector.shape_cast %30 : vector<2x1x8x8x16xbf16> to vector<2x8x8x16xbf16>
    %c0_33 = arith.constant 0 : index
    %c0_34 = arith.constant 0 : index
    %c1_35 = arith.constant 1 : index
    %c1_36 = arith.constant 1 : index
    %c0_37 = arith.constant 0 : index
    %32 = vector.load %arg13[%c0_33, %c0_34, %c1_35, %c1_36, %c0_37] : memref<2x4x9x9x16xbf16, #tpu.memory_space<vmem>>, vector<2x1x8x8x16xbf16>
    %33 = vector.shape_cast %32 : vector<2x1x8x8x16xbf16> to vector<2x8x8x16xbf16>
    %34 = vector.shape_cast %31 : vector<2x8x8x16xbf16> to vector<2x1x8x8x16xbf16>
    tpu.vector_store %arg13[%c0_33, %c0_34, %c1_35, %c1_36, %c0_37], %34 {strides = array<i32>} : memref<2x4x9x9x16xbf16, #tpu.memory_space<vmem>>, vector<2x1x8x8x16xbf16>,
    %c0_38 = arith.constant 0 : index
    %c0_39 = arith.constant 0 : index
    %35 = vector.load %arg4[%c0_38, %c0_39] : memref<9x16xf32, #tpu.memory_space<vmem>>, vector<9x16xf32>
    %c0_40 = arith.constant 0 : index
    %c0_41 = arith.constant 0 : index
    %36 = vector.load %arg5[%c0_40, %c0_41] : memref<1x16xf32, #tpu.memory_space<vmem>>, vector<1x16xf32>
    %37 = vector.shape_cast %36 : vector<1x16xf32> to vector<1x1x1x16xf32>
    %38 = vector.shape_cast %37 : vector<1x1x1x16xf32> to vector<1x1x1x16xf32>
    %39 = vector.broadcast %38 : vector<1x1x1x16xf32> to vector<2x8x8x16xf32>
    %c0_42 = arith.constant 0 : index
    %c0_43 = arith.constant 0 : index
    %c0_44 = arith.constant 0 : index
    %c0_45 = arith.constant 0 : index
    %c0_46 = arith.constant 0 : index
    %40 = vector.load %arg13[%c0_42, %c0_43, %c0_44, %c0_45, %c0_46] : memref<2x4x9x9x16xbf16, #tpu.memory_space<vmem>>, vector<2x1x8x8x16xbf16>
    %41 = vector.shape_cast %40 : vector<2x1x8x8x16xbf16> to vector<2x8x8x16xbf16>
    %42 = vector.extract_strided_slice %35 {offsets = [0, 0], sizes = [1, 16], strides = [1, 1]} : vector<9x16xf32> to vector<1x16xf32>
    %43 = vector.shape_cast %42 : vector<1x16xf32> to vector<16xf32>
    %44 = vector.shape_cast %43 : vector<16xf32> to vector<1x1x1x16xf32>
    %45 = arith.extf %41 : vector<2x8x8x16xbf16> to vector<2x8x8x16xf32>
    %46 = vector.broadcast %44 : vector<1x1x1x16xf32> to vector<2x8x8x16xf32>
    %47 = arith.mulf %45, %46 : vector<2x8x8x16xf32>
    %48 = arith.addf %39, %47 : vector<2x8x8x16xf32>
    %c0_47 = arith.constant 0 : index
    %c1_48 = arith.constant 1 : index
    %c0_49 = arith.constant 0 : index
    %c0_50 = arith.constant 0 : index
    %c0_51 = arith.constant 0 : index
    %49 = vector.load %arg13[%c0_47, %c1_48, %c0_49, %c0_50, %c0_51] : memref<2x4x9x9x16xbf16, #tpu.memory_space<vmem>>, vector<2x1x8x8x16xbf16>
    %50 = vector.shape_cast %49 : vector<2x1x8x8x16xbf16> to vector<2x8x8x16xbf16>
    %51 = vector.extract_strided_slice %35 {offsets = [1, 0], sizes = [1, 16], strides = [1, 1]} : vector<9x16xf32> to vector<1x16xf32>
    %52 = vector.shape_cast %51 : vector<1x16xf32> to vector<16xf32>
    %53 = vector.shape_cast %52 : vector<16xf32> to vector<1x1x1x16xf32>
    %54 = arith.extf %50 : vector<2x8x8x16xbf16> to vector<2x8x8x16xf32>
    %55 = vector.broadcast %53 : vector<1x1x1x16xf32> to vector<2x8x8x16xf32>
    %56 = arith.mulf %54, %55 : vector<2x8x8x16xf32>
    %57 = arith.addf %48, %56 : vector<2x8x8x16xf32>
    %c0_52 = arith.constant 0 : index
    %c0_53 = arith.constant 0 : index
    %c0_54 = arith.constant 0 : index
    %c1_55 = arith.constant 1 : index
    %c0_56 = arith.constant 0 : index
    %58 = vector.load %arg13[%c0_52, %c0_53, %c0_54, %c1_55, %c0_56] : memref<2x4x9x9x16xbf16, #tpu.memory_space<vmem>>, vector<2x1x8x8x16xbf16>
    %59 = vector.shape_cast %58 : vector<2x1x8x8x16xbf16> to vector<2x8x8x16xbf16>
    %60 = vector.extract_strided_slice %35 {offsets = [2, 0], sizes = [1, 16], strides = [1, 1]} : vector<9x16xf32> to vector<1x16xf32>
    %61 = vector.shape_cast %60 : vector<1x16xf32> to vector<16xf32>
    %62 = vector.shape_cast %61 : vector<16xf32> to vector<1x1x1x16xf32>
    %63 = arith.extf %59 : vector<2x8x8x16xbf16> to vector<2x8x8x16xf32>
    %64 = vector.broadcast %62 : vector<1x1x1x16xf32> to vector<2x8x8x16xf32>
    %65 = arith.mulf %63, %64 : vector<2x8x8x16xf32>
    %66 = arith.addf %57, %65 : vector<2x8x8x16xf32>
    %c0_57 = arith.constant 0 : index
    %c2_58 = arith.constant 2 : index
    %c0_59 = arith.constant 0 : index
    %c0_60 = arith.constant 0 : index
    %c0_61 = arith.constant 0 : index
    %67 = vector.load %arg13[%c0_57, %c2_58, %c0_59, %c0_60, %c0_61] : memref<2x4x9x9x16xbf16, #tpu.memory_space<vmem>>, vector<2x1x8x8x16xbf16>
    %68 = vector.shape_cast %67 : vector<2x1x8x8x16xbf16> to vector<2x8x8x16xbf16>
    %69 = vector.extract_strided_slice %35 {offsets = [3, 0], sizes = [1, 16], strides = [1, 1]} : vector<9x16xf32> to vector<1x16xf32>
    %70 = vector.shape_cast %69 : vector<1x16xf32> to vector<16xf32>
    %71 = vector.shape_cast %70 : vector<16xf32> to vector<1x1x1x16xf32>
    %72 = arith.extf %68 : vector<2x8x8x16xbf16> to vector<2x8x8x16xf32>
    %73 = vector.broadcast %71 : vector<1x1x1x16xf32> to vector<2x8x8x16xf32>
    %74 = arith.mulf %72, %73 : vector<2x8x8x16xf32>
    %75 = arith.addf %66, %74 : vector<2x8x8x16xf32>
    %c0_62 = arith.constant 0 : index
    %c3_63 = arith.constant 3 : index
    %c0_64 = arith.constant 0 : index
    %c0_65 = arith.constant 0 : index
    %c0_66 = arith.constant 0 : index
    %76 = vector.load %arg13[%c0_62, %c3_63, %c0_64, %c0_65, %c0_66] : memref<2x4x9x9x16xbf16, #tpu.memory_space<vmem>>, vector<2x1x8x8x16xbf16>
    %77 = vector.shape_cast %76 : vector<2x1x8x8x16xbf16> to vector<2x8x8x16xbf16>
    %78 = vector.extract_strided_slice %35 {offsets = [4, 0], sizes = [1, 16], strides = [1, 1]} : vector<9x16xf32> to vector<1x16xf32>
    %79 = vector.shape_cast %78 : vector<1x16xf32> to vector<16xf32>
    %80 = vector.shape_cast %79 : vector<16xf32> to vector<1x1x1x16xf32>
    %81 = arith.extf %77 : vector<2x8x8x16xbf16> to vector<2x8x8x16xf32>
    %82 = vector.broadcast %80 : vector<1x1x1x16xf32> to vector<2x8x8x16xf32>
    %83 = arith.mulf %81, %82 : vector<2x8x8x16xf32>
    %84 = arith.addf %75, %83 : vector<2x8x8x16xf32>
    %c0_67 = arith.constant 0 : index
    %c2_68 = arith.constant 2 : index
    %c0_69 = arith.constant 0 : index
    %c1_70 = arith.constant 1 : index
    %c0_71 = arith.constant 0 : index
    %85 = vector.load %arg13[%c0_67, %c2_68, %c0_69, %c1_70, %c0_71] : memref<2x4x9x9x16xbf16, #tpu.memory_space<vmem>>, vector<2x1x8x8x16xbf16>
    %86 = vector.shape_cast %85 : vector<2x1x8x8x16xbf16> to vector<2x8x8x16xbf16>
    %87 = vector.extract_strided_slice %35 {offsets = [5, 0], sizes = [1, 16], strides = [1, 1]} : vector<9x16xf32> to vector<1x16xf32>
    %88 = vector.shape_cast %87 : vector<1x16xf32> to vector<16xf32>
    %89 = vector.shape_cast %88 : vector<16xf32> to vector<1x1x1x16xf32>
    %90 = arith.extf %86 : vector<2x8x8x16xbf16> to vector<2x8x8x16xf32>
    %91 = vector.broadcast %89 : vector<1x1x1x16xf32> to vector<2x8x8x16xf32>
    %92 = arith.mulf %90, %91 : vector<2x8x8x16xf32>
    %93 = arith.addf %84, %92 : vector<2x8x8x16xf32>
    %c0_72 = arith.constant 0 : index
    %c0_73 = arith.constant 0 : index
    %c1_74 = arith.constant 1 : index
    %c0_75 = arith.constant 0 : index
    %c0_76 = arith.constant 0 : index
    %94 = vector.load %arg13[%c0_72, %c0_73, %c1_74, %c0_75, %c0_76] : memref<2x4x9x9x16xbf16, #tpu.memory_space<vmem>>, vector<2x1x8x8x16xbf16>
    %95 = vector.shape_cast %94 : vector<2x1x8x8x16xbf16> to vector<2x8x8x16xbf16>
    %96 = vector.extract_strided_slice %35 {offsets = [6, 0], sizes = [1, 16], strides = [1, 1]} : vector<9x16xf32> to vector<1x16xf32>
    %97 = vector.shape_cast %96 : vector<1x16xf32> to vector<16xf32>
    %98 = vector.shape_cast %97 : vector<16xf32> to vector<1x1x1x16xf32>
    %99 = arith.extf %95 : vector<2x8x8x16xbf16> to vector<2x8x8x16xf32>
    %100 = vector.broadcast %98 : vector<1x1x1x16xf32> to vector<2x8x8x16xf32>
    %101 = arith.mulf %99, %100 : vector<2x8x8x16xf32>
    %102 = arith.addf %93, %101 : vector<2x8x8x16xf32>
    %c0_77 = arith.constant 0 : index
    %c1_78 = arith.constant 1 : index
    %c1_79 = arith.constant 1 : index
    %c0_80 = arith.constant 0 : index
    %c0_81 = arith.constant 0 : index
    %103 = vector.load %arg13[%c0_77, %c1_78, %c1_79, %c0_80, %c0_81] : memref<2x4x9x9x16xbf16, #tpu.memory_space<vmem>>, vector<2x1x8x8x16xbf16>
    %104 = vector.shape_cast %103 : vector<2x1x8x8x16xbf16> to vector<2x8x8x16xbf16>
    %105 = vector.extract_strided_slice %35 {offsets = [7, 0], sizes = [1, 16], strides = [1, 1]} : vector<9x16xf32> to vector<1x16xf32>
    %106 = vector.shape_cast %105 : vector<1x16xf32> to vector<16xf32>
    %107 = vector.shape_cast %106 : vector<16xf32> to vector<1x1x1x16xf32>
    %108 = arith.extf %104 : vector<2x8x8x16xbf16> to vector<2x8x8x16xf32>
    %109 = vector.broadcast %107 : vector<1x1x1x16xf32> to vector<2x8x8x16xf32>
    %110 = arith.mulf %108, %109 : vector<2x8x8x16xf32>
    %111 = arith.addf %102, %110 : vector<2x8x8x16xf32>
    %c0_82 = arith.constant 0 : index
    %c0_83 = arith.constant 0 : index
    %c1_84 = arith.constant 1 : index
    %c1_85 = arith.constant 1 : index
    %c0_86 = arith.constant 0 : index
    %112 = vector.load %arg13[%c0_82, %c0_83, %c1_84, %c1_85, %c0_86] : memref<2x4x9x9x16xbf16, #tpu.memory_space<vmem>>, vector<2x1x8x8x16xbf16>
    %113 = vector.shape_cast %112 : vector<2x1x8x8x16xbf16> to vector<2x8x8x16xbf16>
    %114 = vector.extract_strided_slice %35 {offsets = [8, 0], sizes = [1, 16], strides = [1, 1]} : vector<9x16xf32> to vector<1x16xf32>
    %115 = vector.shape_cast %114 : vector<1x16xf32> to vector<16xf32>
    %116 = vector.shape_cast %115 : vector<16xf32> to vector<1x1x1x16xf32>
    %117 = arith.extf %113 : vector<2x8x8x16xbf16> to vector<2x8x8x16xf32>
    %118 = vector.broadcast %116 : vector<1x1x1x16xf32> to vector<2x8x8x16xf32>
    %119 = arith.mulf %117, %118 : vector<2x8x8x16xf32>
    %120 = arith.addf %111, %119 : vector<2x8x8x16xf32>
    %cst_87 = arith.constant 0.000000e+00 : f32
    %121 = vector.broadcast %cst_87 : f32 to vector<2x8x8x16xf32>
    %122 = arith.maximumf %120, %121 : vector<2x8x8x16xf32>
    %123 = vector.shape_cast %122 : vector<2x8x8x16xf32> to vector<2x64x16xf32>
    %cst_88 = arith.constant dense<0.000000e+00> : vector<2x16xf32>
    %124 = vector.multi_reduction <add>, %123, %cst_88 [1] : vector<2x64x16xf32> to vector<2x16xf32>
    %cst_89 = arith.constant 6.400000e+01 : f32
    %125 = vector.broadcast %cst_89 : f32 to vector<2x16xf32>
    %126 = arith.divf %124, %125 : vector<2x16xf32>
    %127 = arith.truncf %126 : vector<2x16xf32> to vector<2x16xbf16>
    %c0_90 = arith.constant 0 : index
    %c0_91 = arith.constant 0 : index
    %128 = vector.load %arg6[%c0_90, %c0_91] : memref<16x8xbf16, #tpu.memory_space<vmem>>, vector<16x8xbf16>
    %cst_92 = arith.constant dense<0.000000e+00> : vector<2x8xf32>
    %129 = tpu.matmul %127, %128, %cst_92 {dimension_numbers = #tpu.dot_dimension_numbers<[1], [0], [0], [1], [0, 0, 1, 1], [], []>} : vector<2x16xbf16>, vector<16x8xbf16>, vector<2x8xf32> -> vector<2x8xf32>
    %c0_93 = arith.constant 0 : index
    %c0_94 = arith.constant 0 : index
    %130 = vector.load %arg7[%c0_93, %c0_94] : memref<1x8xf32, #tpu.memory_space<vmem>>, vector<1x8xf32>
    %131 = vector.broadcast %130 : vector<1x8xf32> to vector<2x8xf32>
    %132 = arith.addf %129, %131 : vector<2x8xf32>
    %cst_95 = arith.constant 0.000000e+00 : f32
    %133 = vector.broadcast %cst_95 : f32 to vector<2x8xf32>
    %134 = arith.maximumf %132, %133 : vector<2x8xf32>
    %135 = arith.truncf %134 : vector<2x8xf32> to vector<2x8xbf16>
    %c0_96 = arith.constant 0 : index
    %c0_97 = arith.constant 0 : index
    %136 = vector.load %arg8[%c0_96, %c0_97] : memref<8x16xbf16, #tpu.memory_space<vmem>>, vector<8x16xbf16>
    %cst_98 = arith.constant dense<0.000000e+00> : vector<2x16xf32>
    %137 = tpu.matmul %135, %136, %cst_98 {dimension_numbers = #tpu.dot_dimension_numbers<[1], [0], [0], [1], [0, 0, 1, 1], [], []>} : vector<2x8xbf16>, vector<8x16xbf16>, vector<2x16xf32> -> vector<2x16xf32>
    %c0_99 = arith.constant 0 : index
    %c0_100 = arith.constant 0 : index
    %138 = vector.load %arg9[%c0_99, %c0_100] : memref<1x16xf32, #tpu.memory_space<vmem>>, vector<1x16xf32>
    %139 = vector.broadcast %138 : vector<1x16xf32> to vector<2x16xf32>
    %140 = arith.addf %137, %139 : vector<2x16xf32>
    %141 = arith.negf %140 : vector<2x16xf32>
    %142 = math.exp %141 : vector<2x16xf32>
    %cst_101 = arith.constant 1.000000e+00 : f32
    %143 = vector.broadcast %cst_101 : f32 to vector<2x16xf32>
    %144 = arith.addf %143, %142 : vector<2x16xf32>
    %145 = arith.divf %143, %144 : vector<2x16xf32>
    %146 = vector.shape_cast %145 : vector<2x16xf32> to vector<2x1x16xf32>
    %147 = vector.broadcast %146 : vector<2x1x16xf32> to vector<2x64x16xf32>
    %148 = arith.mulf %123, %147 : vector<2x64x16xf32>
    %149 = vector.shape_cast %148 : vector<2x64x16xf32> to vector<128x16xf32>
    %150 = arith.truncf %149 : vector<128x16xf32> to vector<128x16xbf16>
    %c0_102 = arith.constant 0 : index
    %c0_103 = arith.constant 0 : index
    %151 = vector.load %arg10[%c0_102, %c0_103] : memref<16x8xbf16, #tpu.memory_space<vmem>>, vector<16x8xbf16>
    %cst_104 = arith.constant dense<0.000000e+00> : vector<128x8xf32>
    %152 = tpu.matmul %150, %151, %cst_104 {dimension_numbers = #tpu.dot_dimension_numbers<[1], [0], [0], [1], [0, 0, 1, 1], [], []>} : vector<128x16xbf16>, vector<16x8xbf16>, vector<128x8xf32> -> vector<128x8xf32>
    %c0_105 = arith.constant 0 : index
    %c0_106 = arith.constant 0 : index
    %153 = vector.load %arg11[%c0_105, %c0_106] : memref<1x8xf32, #tpu.memory_space<vmem>>, vector<1x8xf32>
    %154 = vector.broadcast %153 : vector<1x8xf32> to vector<128x8xf32>
    %155 = arith.addf %152, %154 : vector<128x8xf32>
    %c0_107 = arith.constant 0 : index
    %c0_108 = arith.constant 0 : index
    %156 = vector.load %arg12[%c0_107, %c0_108] : memref<128x8xf32, #tpu.memory_space<vmem>>, vector<128x8xf32>
    tpu.vector_store %arg12[%c0_107, %c0_108], %155 {strides = array<i32>} : memref<128x8xf32, #tpu.memory_space<vmem>>, vector<128x8xf32>,
    return
  }
  func.func @transform_0(%arg0: i32) -> (i32, i32, i32, i32, i32) {
    %c0_i32 = arith.constant 0 : i32
    %c0_i32_0 = arith.constant 0 : i32
    %c0_i32_1 = arith.constant 0 : i32
    %c0_i32_2 = arith.constant 0 : i32
    %c0_i32_3 = arith.constant 0 : i32
    return %arg0, %c0_i32, %c0_i32_0, %c0_i32_1, %c0_i32_2 : i32, i32, i32, i32, i32
  }
  func.func @transform_1(%arg0: i32) -> (i32, i32) {
    %c0_i32 = arith.constant 0 : i32
    %c0_i32_0 = arith.constant 0 : i32
    %c0_i32_1 = arith.constant 0 : i32
    return %c0_i32, %c0_i32_0 : i32, i32
  }
  func.func @transform_2(%arg0: i32) -> (i32, i32) {
    %c0_i32 = arith.constant 0 : i32
    %c0_i32_0 = arith.constant 0 : i32
    %c0_i32_1 = arith.constant 0 : i32
    return %c0_i32, %c0_i32_0 : i32, i32
  }
  func.func @transform_3(%arg0: i32) -> (i32, i32) {
    %c0_i32 = arith.constant 0 : i32
    %c0_i32_0 = arith.constant 0 : i32
    %c0_i32_1 = arith.constant 0 : i32
    return %c0_i32, %c0_i32_0 : i32, i32
  }
  func.func @transform_4(%arg0: i32) -> (i32, i32) {
    %c0_i32 = arith.constant 0 : i32
    %c0_i32_0 = arith.constant 0 : i32
    %c0_i32_1 = arith.constant 0 : i32
    return %c0_i32, %c0_i32_0 : i32, i32
  }
  func.func @transform_5(%arg0: i32) -> (i32, i32) {
    %c0_i32 = arith.constant 0 : i32
    %c0_i32_0 = arith.constant 0 : i32
    %c0_i32_1 = arith.constant 0 : i32
    return %c0_i32, %c0_i32_0 : i32, i32
  }
  func.func @transform_6(%arg0: i32) -> (i32, i32) {
    %c0_i32 = arith.constant 0 : i32
    %c0_i32_0 = arith.constant 0 : i32
    %c0_i32_1 = arith.constant 0 : i32
    return %c0_i32, %c0_i32_0 : i32, i32
  }
  func.func @transform_7(%arg0: i32) -> (i32, i32) {
    %c0_i32 = arith.constant 0 : i32
    %c0_i32_0 = arith.constant 0 : i32
    %c0_i32_1 = arith.constant 0 : i32
    return %c0_i32, %c0_i32_0 : i32, i32
  }
  func.func @transform_8(%arg0: i32) -> (i32, i32) {
    %c0_i32 = arith.constant 0 : i32
    %c0_i32_0 = arith.constant 0 : i32
    %c0_i32_1 = arith.constant 0 : i32
    return %c0_i32, %c0_i32_0 : i32, i32
  }
  func.func @transform_9(%arg0: i32) -> (i32, i32) {
    %c0_i32 = arith.constant 0 : i32
    %c0_i32_0 = arith.constant 0 : i32
    %c0_i32_1 = arith.constant 0 : i32
    return %c0_i32, %c0_i32_0 : i32, i32
  }
  func.func @transform_10(%arg0: i32) -> (i32, i32) {
    %c0_i32 = arith.constant 0 : i32
    %c0_i32_0 = arith.constant 0 : i32
    %c0_i32_1 = arith.constant 0 : i32
    return %c0_i32, %c0_i32_0 : i32, i32
  }
  func.func @transform_11(%arg0: i32) -> (i32, i32) {
    %c0_i32 = arith.constant 0 : i32
    %c0_i32_0 = arith.constant 0 : i32
    return %arg0, %c0_i32 : i32, i32
  }
}

</mosaic_0001>

<bundles_post_ra>
// kernel: patch_merging_forward.1
= control target key start
LH: loop header
LB: loop body
LE: loop exit
PB: predicated region body
PF: predicated region fallthrough
CT: control target
= control target key end

     0   :  { %vm620_vm0 = vcmask 1041408   ;;  %vm523_vm1 = vcmask 31744   ;;  %v48_v19 = vld [vmem:[#allocation2 + $0x4c] sm:$0x1]  ;;  %v56_v20 = vld [vmem:[#allocation2 + $0xdc] sm:$0x1]  ;;  %s5642_s1 = inlined_call_operand.vmem [shape: bf16[4,16], index: 1, kind: input, shape index: {}]   ;;  %s5643_s0 = inlined_call_operand.vmem [shape: bf16[2,4,8,8,4], index: 0, kind: input, shape index: {}]   ;;  %s5644_s2 = inlined_call_operand.vmem [shape: f32[1,16], index: 2, kind: input, shape index: {}]   ;;  %s5645_s3 = inlined_call_operand.vmem [shape: f32[9,16], index: 3, kind: input, shape index: {}]   ;;  %s5646_s4 = inlined_call_operand.vmem [shape: f32[1,16], index: 4, kind: input, shape index: {}]   ;;  %s5647_s5 = inlined_call_operand.vmem [shape: bf16[16,8], index: 5, kind: input, shape index: {}]   ;;  %s5648_s7 = inlined_call_operand.vmem [shape: bf16[8,16], index: 7, kind: input, shape index: {}]   ;;  %s5649_s6 = inlined_call_operand.vmem [shape: f32[1,8], index: 6, kind: input, shape index: {}]   ;;  %s5650_s9 = inlined_call_operand.vmem [shape: bf16[16,8], index: 9, kind: input, shape index: {}]   ;;  %s5651_s8 = inlined_call_operand.vmem [shape: f32[1,16], index: 8, kind: input, shape index: {}]   ;;  %s5652_s10 = inlined_call_operand.vmem [shape: f32[1,8], index: 10, kind: input, shape index: {}]   ;;  %s5653_s11 = inlined_call_operand.vmem [shape: f32[128,8], index: 11, kind: output, shape index: {}]  }
   0x1   :  { %v355_v0 = vld [vmem:[%s5642_s1] sm:$0x3]  ;;  %v3479_v3 = vld [vmem:[%s5643_s0 + $0x8] sm:$0xff]   ;;  %v3480_v4 = vld [vmem:[%s5643_s0 + $0x10] sm:$0xff]   ;;  %vm41_vm2 = vcmask 122880   ;;  %vm39_vm5 = vcmask 125952  }
   0x2   :  { %v3478_v1 = vld [vmem:[%s5643_s0] sm:$0xff]   ;;  %3472 = vmatprep.subr.msk.bf16.mxu0 %vm620_vm0, %v355_v0  ;;  %v622_v2 = vsel %vm620_vm0, %v355_v0, 0  ;;  %3473 = vmatprep.subr.msk.bf16.mxu1 %vm620_vm0, %v355_v0  ;;  %v3482_v5 = vld [vmem:[%s5643_s0 + $0xb0] sm:$0xff]   ;;  %v3483_v6 = vld [vmem:[%s5643_s0 + $0xb8] sm:$0xff]   ;;  %vm42_vm3 = vsmask.f32 256 }
   0x3   :  { %3375 = vmatpush3.bf16.msra.mxu0 %v622_v2  ;;  %3376 = vmatprep.mubr.msk.bf16.mxu0 %vm523_vm1, %v3478_v1  ;;  %v3481_v7 = vld [vmem:[%s5643_s0 + $0x18] sm:$0xff]   ;;  %v3486_v8 = vld [vmem:[%s5643_s0 + $0xc0] sm:$0xff]   ;;  %v3487_v10 = vld [vmem:[%s5643_s0 + $0xc8] sm:$0xff]   ;;  %v3521_v53 = vmov 0   ;;  %vm1380_vm6 = vsmask.f32 7938 }
   0x4   :  { %3471 = vmatpush3.bf16.msra.mxu1 %v622_v2  ;;  %3420 = vmatprep.mubr.msk.bf16.mxu1 %vm523_vm1, %v3482_v5  ;;  %v3484_v9 = vld [vmem:[%s5643_s0 + $0x20] sm:$0xff]   ;;  %v3490_v11 = vld [vmem:[%s5643_s0 + $0xd0] sm:$0xff]   ;;  %v3485_v12 = vld [vmem:[%s5643_s0 + $0x28] sm:$0xff]   ;;  %40 = vst.msk [vmem:[#allocation2] sm:$0xf] %vm39_vm5, %v3521_v53  ;;  %vm1998_vm8 = vcmask 1046528  }
   0x5   :  { %v3488_v13 = vld [vmem:[%s5643_s0 + $0x30] sm:$0xff]   ;;  %v3491_v14 = vld [vmem:[%s5643_s0 + $0xd8] sm:$0xff]   ;;  %v3494_v15 = vld [vmem:[%s5643_s0 + $0xe0] sm:$0xff]   ;;  %47 = vst.msk [vmem:[#allocation2 + $0x48] sm:$0xf] %vm39_vm5, %v3521_v53  ;;  %vm3523_vm9 = vmmov 0  }
   0x6   :  { %3377 = vmatmul.mubr.msk.bf16.vlgmr.msra.gmra.mrb[0].mxu0 %vm523_vm1, %v3479_v3  ;;  %v3489_v16 = vld [vmem:[%s5643_s0 + $0x38] sm:$0xff]   ;;  %v3492_v17 = vld [vmem:[%s5643_s0 + $0x40] sm:$0xff]   ;;  %v3495_v18 = vld [vmem:[%s5643_s0 + $0xe8] sm:$0xff]   ;;  %55 = vst.msk [vmem:[#allocation2 + $0xd8] sm:$0xf] %vm39_vm5, %v3521_v53  ;;  %vm2727_vm10 = vcmask 130048  }
   0x7   :  { %3380 = vmatprep.mubr.msk.bf16.mxu0 %vm523_vm1, %v3480_v4  ;;  %3421 = vmatmul.mubr.msk.bf16.vlgmr.msra.gmra.mrb[0].mxu1 %vm523_vm1, %v3483_v6  ;;  %v64_v21 = vld [vmem:[#allocation2 + $0x16c] sm:$0x1]  ;;  %v72_v22 = vld [vmem:[#allocation2 + $0x1fc] sm:$0x1]  ;;  %v3498_v23 = vld [vmem:[%s5643_s0 + $0xf0] sm:$0xff]   ;;  %vm2788_vm11 = vcmask 1041409  }
   0x8   :  { %3424 = vmatprep.mubr.msk.bf16.mxu1 %vm523_vm1, %v3486_v8  ;;  %v153_v24 = vld [vmem:[#allocation2 + $0xd0] sm:$0x1]  ;;  %v180_v25 = vld [vmem:[#allocation2 + $0x118] sm:$0x1]  ;;  %v162_v27 = vld [vmem:[#allocation2 + $0xe8] sm:$0x1] }
   0x9   :  { %v261_v26 = vld [vmem:[#allocation2 + $0x1f0] sm:$0x1]  ;;  %v288_v28 = vld [vmem:[#allocation2 + $0x238] sm:$0x1]  ;;  %v3493_v29 = vld [vmem:[%s5643_s0 + $0x48] sm:$0xff]   ;;  %vm2854_vm12 = vcmask 1043456  }
   0xa   :  { %vm3663_vm4 = vmand %vm41_vm2, %vm42_vm3  ;;  %v3496_v31 = vld [vmem:[%s5643_s0 + $0x50] sm:$0xff]   ;;  %v3499_v40 = vld [vmem:[%s5643_s0 + $0xf8] sm:$0xff]   ;;  %59 = vst.msk [vmem:[#allocation2 + $0x120] sm:$0xf] %vm39_vm5, %v3521_v53  ;;  %vm2850_vm13 = vcmask 64512  }
   0xb   :  { %v49_v32 = vsel %vm3663_vm4, 0, %v48_v19  ;;  %v57_v33 = vsel %vm3663_vm4, 0, %v56_v20  ;;  %v65_v34 = vsel %vm3663_vm4, 0, %v64_v21  ;;  %v73_v35 = vsel %vm3663_vm4, 0, %v72_v22  ;;  %v3497_v42 = vld [vmem:[%s5643_s0 + $0x58] sm:$0xff]   ;;  %v3500_v43 = vld [vmem:[%s5643_s0 + $0x60] sm:$0xff]   ;;  %vm3926_vm7 = vmand %vm39_vm5, %vm1380_vm6 }
   0xc   :  { %50 = vst [vmem:[#allocation2 + $0x4c] sm:$0x1] %v49_v32  ;;  %58 = vst [vmem:[#allocation2 + $0xdc] sm:$0x1] %v57_v33  ;;  %v154_v36 = vsel %vm3663_vm4, 0, %v153_v24  ;;  %v163_v37 = vsel %vm3663_vm4, 0, %v162_v27 }
   0xd   :  { %66 = vst [vmem:[#allocation2 + $0x16c] sm:$0x1] %v65_v34  ;;  %74 = vst [vmem:[#allocation2 + $0x1fc] sm:$0x1] %v73_v35  ;;  %v181_v38 = vsel %vm3663_vm4, 0, %v180_v25  ;;  %v262_v39 = vsel %vm3663_vm4, 0, %v261_v26 }
   0xe   :  { %3381 = vmatmul.mubr.msk.bf16.gmra.mrb[4].mxu0 %vm523_vm1, %v3481_v7  ;;  %155 = vst [vmem:[#allocation2 + $0xd0] sm:$0x1] %v154_v36  ;;  %164 = vst [vmem:[#allocation2 + $0xe8] sm:$0x1] %v163_v37  ;;  %v289_v41 = vsel %vm3663_vm4, 0, %v288_v28  ;;  %v3501_v44 = vld [vmem:[%s5643_s0 + $0x68] sm:$0xff]  }
   0xf   :  { %3384 = vmatprep.mubr.msk.bf16.mxu0 %vm523_vm1, %v3484_v9  ;;  %3425 = vmatmul.mubr.msk.bf16.gmra.mrb[4].mxu1 %vm523_vm1, %v3487_v10  ;;  %182 = vst [vmem:[#allocation2 + $0x118] sm:$0x1] %v181_v38  ;;  %263 = vst [vmem:[#allocation2 + $0x1f0] sm:$0x1] %v262_v39  ;;  %v3502_v45 = vld [vmem:[%s5643_s0 + $0x70] sm:$0xff]   ;;  %v3503_v46 = vld [vmem:[%s5643_s0 + $0x78] sm:$0xff]  }
  0x10   :  { %3428 = vmatprep.mubr.msk.bf16.mxu1 %vm523_vm1, %v3490_v11  ;;  %290 = vst [vmem:[#allocation2 + $0x238] sm:$0x1] %v289_v41  ;;  %v3504_v47 = vld [vmem:[%s5643_s0 + $0x80] sm:$0xff]   ;;  %v3505_v48 = vld [vmem:[%s5643_s0 + $0x88] sm:$0xff]   ;;  %v3506_v49 = vld [vmem:[%s5643_s0 + $0x90] sm:$0xff]  }
  0x11   :  { %v3507_v50 = vld [vmem:[%s5643_s0 + $0x98] sm:$0xff]   ;;  %v3508_v51 = vld [vmem:[%s5643_s0 + $0xa0] sm:$0xff]   ;;  %v3509_v52 = vld [vmem:[%s5643_s0 + $0xa8] sm:$0xff]   ;;  %63 = vst.msk [vmem:[#allocation2 + $0x168] sm:$0xf] %vm39_vm5, %v3521_v53 }
  0x12   :  { %51 = vst.msk [vmem:[#allocation2 + $0x90] sm:$0xf] %vm39_vm5, %v3521_v53  ;;  %67 = vst.msk [vmem:[#allocation2 + $0x1b0] sm:$0xf] %vm39_vm5, %v3521_v53  ;;  %v156_v54 = vld [vmem:[#allocation2 + $0xd8] sm:$0x1] }
  0x13   :  { %71 = vst.msk [vmem:[#allocation2 + $0x1f8] sm:$0xf] %vm39_vm5, %v3521_v53  ;;  %v157_v55 = vsel %vm3663_vm4, 0, %v156_v54  ;;  %v165_v56 = vld [vmem:[#allocation2 + $0xf0] sm:$0x1] }
  0x14   :  { %158 = vst [vmem:[#allocation2 + $0xd8] sm:$0x1] %v157_v55  ;;  %v166_v57 = vsel %vm3663_vm4, 0, %v165_v56  ;;  %v159_v58 = vld [vmem:[#allocation2 + $0xe0] sm:$0x1] }
  0x15   :  { %167 = vst [vmem:[#allocation2 + $0xf0] sm:$0x1] %v166_v57  ;;  %v160_v59 = vsel %vm3663_vm4, 0, %v159_v58  ;;  %v174_v60 = vld [vmem:[#allocation2 + $0x108] sm:$0x1] }
  0x16   :  { %3385 = vmatmul.mubr.msk.bf16.gmra.mrb[8].mxu0 %vm523_vm1, %v3485_v12  ;;  %161 = vst [vmem:[#allocation2 + $0xe0] sm:$0x1] %v160_v59  ;;  %v175_v61 = vsel %vm3663_vm4, 0, %v174_v60  ;;  %v168_v62 = vld [vmem:[#allocation2 + $0xf8] sm:$0x1] }
  0x17   :  { %3388 = vmatprep.mubr.msk.bf16.mxu0 %vm523_vm1, %v3488_v13  ;;  %3429 = vmatmul.mubr.msk.bf16.gmra.mrb[8].mxu1 %vm523_vm1, %v3491_v14  ;;  %176 = vst [vmem:[#allocation2 + $0x108] sm:$0x1] %v175_v61  ;;  %v169_v63 = vsel %vm3663_vm4, 0, %v168_v62  ;;  %v177_v0 = vld [vmem:[#allocation2 + $0x110] sm:$0x1] }
  0x18   :  { %3432 = vmatprep.mubr.msk.bf16.mxu1 %vm523_vm1, %v3494_v15  ;;  %170 = vst [vmem:[#allocation2 + $0xf8] sm:$0x1] %v169_v63  ;;  %v178_v1 = vsel %vm3663_vm4, 0, %v177_v0  ;;  %v171_v2 = vld [vmem:[#allocation2 + $0x100] sm:$0x1] }
  0x19   :  { %179 = vst [vmem:[#allocation2 + $0x110] sm:$0x1] %v178_v1  ;;  %v172_v3 = vsel %vm3663_vm4, 0, %v171_v2  ;;  %v75_v4 = vld [vmem:[#allocation2] sm:$0x1] }
  0x1a   :  { %v102_v5 = vld [vmem:[#allocation2 + $0x48] sm:$0x1]  ;;  %v183_v6 = vld [vmem:[#allocation2 + $0x120] sm:$0x1]  ;;  %173 = vst [vmem:[#allocation2 + $0x100] sm:$0x1] %v172_v3 }
  0x1b   :  { %v76_v7 = vsel %vm3663_vm4, 0, %v75_v4  ;;  %v103_v8 = vsel %vm3663_vm4, 0, %v102_v5  ;;  %v184_v9 = vsel %vm3663_vm4, 0, %v183_v6  ;;  %v210_v10 = vld [vmem:[#allocation2 + $0x168] sm:$0x1] }
  0x1c   :  { %77 = vst [vmem:[#allocation2] sm:$0x1] %v76_v7  ;;  %104 = vst [vmem:[#allocation2 + $0x48] sm:$0x1] %v103_v8  ;;  %v211_v11 = vsel %vm3663_vm4, 0, %v210_v10 }
  0x1d   :  { %185 = vst [vmem:[#allocation2 + $0x120] sm:$0x1] %v184_v9  ;;  %v135_v12 = vld [vmem:[#allocation2 + $0xa0] sm:$0x1]  ;;  %212 = vst [vmem:[#allocation2 + $0x168] sm:$0x1] %v211_v11 }
  0x1e   :  { %3389 = vmatmul.mubr.msk.bf16.gmra.mrb[12].mxu0 %vm523_vm1, %v3489_v16  ;;  %v136_v13 = vsel %vm3663_vm4, 0, %v135_v12  ;;  %v52_v14 = vld [vmem:[#allocation2 + $0x94] sm:$0x1]  ;;  %v129_v15 = vld [vmem:[#allocation2 + $0x90] sm:$0x1] }
  0x1f   :  { %3392 = vmatprep.mubr.msk.bf16.mxu0 %vm523_vm1, %v3492_v17  ;;  %3433 = vmatmul.mubr.msk.bf16.gmra.mrb[12].mxu1 %vm523_vm1, %v3495_v18  ;;  %137 = vst [vmem:[#allocation2 + $0xa0] sm:$0x1] %v136_v13  ;;  %v53_v16 = vsel %vm3663_vm4, 0, %v52_v14  ;;  %v130_v17 = vsel %vm3663_vm4, 0, %v129_v15  ;;  %v138_v18 = vld [vmem:[#allocation2 + $0xa8] sm:$0x1] }
  0x20   :  { %3436 = vmatprep.mubr.msk.bf16.mxu1 %vm523_vm1, %v3498_v23  ;;  %54 = vst [vmem:[#allocation2 + $0x94] sm:$0x1] %v53_v16  ;;  %131 = vst [vmem:[#allocation2 + $0x90] sm:$0x1] %v130_v17  ;;  %v139_v19 = vsel %vm3663_vm4, 0, %v138_v18 }
  0x21   :  { %140 = vst [vmem:[#allocation2 + $0xa8] sm:$0x1] %v139_v19  ;;  %v132_v20 = vld [vmem:[#allocation2 + $0x98] sm:$0x1]  ;;  %v44_v21 = vld [vmem:[#allocation2 + $0x4] sm:$0x1] }
  0x22   :  { %v133_v22 = vsel %vm3663_vm4, 0, %v132_v20  ;;  %v45_v23 = vsel %vm3663_vm4, 0, %v44_v21  ;;  %v147_v24 = vld [vmem:[#allocation2 + $0xc0] sm:$0x1]  ;;  %v141_v26 = vld [vmem:[#allocation2 + $0xb0] sm:$0x1] }
  0x23   :  { %134 = vst [vmem:[#allocation2 + $0x98] sm:$0x1] %v133_v22  ;;  %46 = vst [vmem:[#allocation2 + $0x4] sm:$0x1] %v45_v23  ;;  %v148_v25 = vsel %vm3663_vm4, 0, %v147_v24  ;;  %v142_v27 = vsel %vm3663_vm4, 0, %v141_v26  ;;  %v1793_v23 = vlaneseq }
  0x24   :  { %149 = vst [vmem:[#allocation2 + $0xc0] sm:$0x1] %v148_v25  ;;  %v150_v28 = vld [vmem:[#allocation2 + $0xc8] sm:$0x1]  ;;  %143 = vst [vmem:[#allocation2 + $0xb0] sm:$0x1] %v142_v27 }
  0x25   :  { %v111_v33 = vld [vmem:[#allocation2 + $0x60] sm:$0x1]  ;;  %v249_v37 = vld [vmem:[#allocation2 + $0x1d0] sm:$0x1]  ;;  %v114_v41 = vld [vmem:[#allocation2 + $0x68] sm:$0x1] }
  0x26   :  { %3393 = vmatmul.mubr.msk.bf16.gmra.mrb[16].mxu0 %vm523_vm1, %v3493_v29  ;;  %v151_v29 = vsel %vm3663_vm4, 0, %v150_v28  ;;  %v112_v34 = vsel %vm3663_vm4, 0, %v111_v33  ;;  %v255_v35 = vld [vmem:[#allocation2 + $0x1e0] sm:$0x1]  ;;  %v250_v38 = vsel %vm3663_vm4, 0, %v249_v37  ;;  %v3844_v26 = vshrl.u32 %v1793_v23, 7 }
  0x27   :  { %3396 = vmatprep.mubr.msk.bf16.mxu0 %vm523_vm1, %v3496_v31  ;;  %3437 = vmatmul.mubr.msk.bf16.gmra.mrb[16].mxu1 %vm523_vm1, %v3499_v40  ;;  %152 = vst [vmem:[#allocation2 + $0xc8] sm:$0x1] %v151_v29  ;;  %v144_v31 = vld [vmem:[#allocation2 + $0xb8] sm:$0x1]  ;;  %113 = vst [vmem:[#allocation2 + $0x60] sm:$0x1] %v112_v34 }
  0x28   :  { %v145_v32 = vsel %vm3663_vm4, 0, %v144_v31  ;;  %v256_v36 = vsel %vm3663_vm4, 0, %v255_v35  ;;  %v105_v39 = vld [vmem:[#allocation2 + $0x50] sm:$0x1]  ;;  %251 = vst [vmem:[#allocation2 + $0x1d0] sm:$0x1] %v250_v38 }
  0x29   :  { %146 = vst [vmem:[#allocation2 + $0xb8] sm:$0x1] %v145_v32  ;;  %257 = vst [vmem:[#allocation2 + $0x1e0] sm:$0x1] %v256_v36  ;;  %v106_v40 = vsel %vm3663_vm4, 0, %v105_v39  ;;  %v3847_v27 = vsub.s32 0, %v3844_v26 }
  0x2a   :  { %107 = vst [vmem:[#allocation2 + $0x50] sm:$0x1] %v106_v40  ;;  %v216_v55 = vld [vmem:[#allocation2 + $0x178] sm:$0x1]  ;;  %v231_v56 = vld [vmem:[#allocation2 + $0x1a0] sm:$0x1] }
  0x2b   :  { %v217_v57 = vsel %vm3663_vm4, 0, %v216_v55  ;;  %v232_v58 = vsel %vm3663_vm4, 0, %v231_v56  ;;  %v123_v59 = vld [vmem:[#allocation2 + $0x80] sm:$0x1]  ;;  %v225_v61 = vld [vmem:[#allocation2 + $0x190] sm:$0x1] }
  0x2c   :  { %218 = vst [vmem:[#allocation2 + $0x178] sm:$0x1] %v217_v57  ;;  %233 = vst [vmem:[#allocation2 + $0x1a0] sm:$0x1] %v232_v58  ;;  %v124_v60 = vsel %vm3663_vm4, 0, %v123_v59  ;;  %v226_v62 = vsel %vm3663_vm4, 0, %v225_v61 }
  0x2d   :  { %125 = vst [vmem:[#allocation2 + $0x80] sm:$0x1] %v124_v60  ;;  %v195_v63 = vld [vmem:[#allocation2 + $0x140] sm:$0x1]  ;;  %227 = vst [vmem:[#allocation2 + $0x190] sm:$0x1] %v226_v62 }
  0x2e   :  { %3397 = vmatmul.mubr.msk.bf16.gmra.mrb[20].mxu0 %vm523_vm1, %v3497_v42  ;;  %v115_v42 = vsel %vm3663_vm4, 0, %v114_v41  ;;  %v234_v0 = vld [vmem:[#allocation2 + $0x1a8] sm:$0x1]  ;;  %v228_v2 = vld [vmem:[#allocation2 + $0x198] sm:$0x1]  ;;  %v196_v3 = vsel %vm3663_vm4, 0, %v195_v63 }
  0x2f   :  { %3400 = vmatprep.mubr.msk.bf16.mxu0 %vm523_vm1, %v3500_v43  ;;  %116 = vst [vmem:[#allocation2 + $0x68] sm:$0x1] %v115_v42  ;;  %v108_v43 = vld [vmem:[#allocation2 + $0x58] sm:$0x1]  ;;  %v235_v1 = vsel %vm3663_vm4, 0, %v234_v0  ;;  %v229_v4 = vsel %vm3663_vm4, 0, %v228_v2 }
  0x30   :  { %236 = vst [vmem:[#allocation2 + $0x1a8] sm:$0x1] %v235_v1  ;;  %197 = vst [vmem:[#allocation2 + $0x140] sm:$0x1] %v196_v3  ;;  %v192_v5 = vld [vmem:[#allocation2 + $0x138] sm:$0x1] }
  0x31   :  { %230 = vst [vmem:[#allocation2 + $0x198] sm:$0x1] %v229_v4  ;;  %v193_v6 = vsel %vm3663_vm4, 0, %v192_v5  ;;  %v186_v7 = vld [vmem:[#allocation2 + $0x128] sm:$0x1]  ;;  %5722 = vst [vmem:[#allocation3_spill] sm:$0xff] %v3844_v26 }
  0x32   :  { %194 = vst [vmem:[#allocation2 + $0x138] sm:$0x1] %v193_v6  ;;  %v187_v8 = vsel %vm3663_vm4, 0, %v186_v7  ;;  %v117_v9 = vld [vmem:[#allocation2 + $0x70] sm:$0x1]  ;;  %5723 = vst [vmem:[#allocation4_spill] sm:$0xff] %v3847_v27 }
  0x33   :  { %188 = vst [vmem:[#allocation2 + $0x128] sm:$0x1] %v187_v8  ;;  %v118_v10 = vsel %vm3663_vm4, 0, %v117_v9  ;;  %v126_v11 = vld [vmem:[#allocation2 + $0x88] sm:$0x1]  ;;  %v3861_v34 = vld [vmem:[%s5645_s3] sm:$0xff] }
  0x34   :  { %119 = vst [vmem:[#allocation2 + $0x70] sm:$0x1] %v118_v10  ;;  %v127_v12 = vsel %vm3663_vm4, 0, %v126_v11  ;;  %v120_v13 = vld [vmem:[#allocation2 + $0x78] sm:$0x1]  ;;  %v1932_v35 = vsub.s32 2, %v3844_v26  ;;  %v3869_v38 = vrot.slane %v3861_v34, %v3847_v27 }
  0x35   :  { %128 = vst [vmem:[#allocation2 + $0x88] sm:$0x1] %v127_v12  ;;  %v121_v14 = vsel %vm3663_vm4, 0, %v120_v13  ;;  %v204_v15 = vld [vmem:[#allocation2 + $0x158] sm:$0x1] }
  0x36   :  { %3401 = vmatmul.mubr.msk.bf16.gmra.mrb[24].mxu0 %vm523_vm1, %v3501_v44  ;;  %v109_v44 = vsel %vm3663_vm4, 0, %v108_v43  ;;  %122 = vst [vmem:[#allocation2 + $0x78] sm:$0x1] %v121_v14  ;;  %v198_v16 = vld [vmem:[#allocation2 + $0x148] sm:$0x1]  ;;  %v205_v18 = vsel %vm3663_vm4, 0, %v204_v15 }
  0x37   :  { %3404 = vmatprep.mubr.msk.bf16.mxu0 %vm523_vm1, %v3502_v45  ;;  %110 = vst [vmem:[#allocation2 + $0x58] sm:$0x1] %v109_v44  ;;  %v258_v45 = vld [vmem:[#allocation2 + $0x1e8] sm:$0x1]  ;;  %v201_v17 = vld [vmem:[#allocation2 + $0x150] sm:$0x1] }
  0x38   :  { %v199_v19 = vsel %vm3663_vm4, 0, %v198_v16  ;;  %v202_v20 = vsel %vm3663_vm4, 0, %v201_v17  ;;  %206 = vst [vmem:[#allocation2 + $0x158] sm:$0x1] %v205_v18  ;;  %v189_v21 = vld [vmem:[#allocation2 + $0x130] sm:$0x1] }
  0x39   :  { %200 = vst [vmem:[#allocation2 + $0x148] sm:$0x1] %v199_v19  ;;  %203 = vst [vmem:[#allocation2 + $0x150] sm:$0x1] %v202_v20  ;;  %v190_v22 = vsel %vm3663_vm4, 0, %v189_v21  ;;  %v1864_v43 = vsub.s32 1, %v3844_v26 }
  0x3a   :  { %191 = vst [vmem:[#allocation2 + $0x130] sm:$0x1] %v190_v22  ;;  %v84_v24 = vld [vmem:[#allocation2 + $0x18] sm:$0x1]  ;;  %v3849_v28 = vld [vmem:[#allocation2] ss:$72 sps:$4 sm:$0xff]  }
  0x3b   :  { %v85_v25 = vsel %vm3663_vm4, 0, %v84_v24  ;;  %v78_v29 = vld [vmem:[#allocation2 + $0x8] sm:$0x1]  ;;  %v207_v31 = vld [vmem:[#allocation2 + $0x160] sm:$0x1]  ;;  %v1777_v37 = vunpack.c.l.bf16 %v3849_v28  ;;  %v1846_v58 = vunpack.c.h.bf16 %v3849_v28  ;;  %v3886_v63 = vrot.slane %v3861_v34, %v1864_v43 }
  0x3c   :  { %86 = vst [vmem:[#allocation2 + $0x18] sm:$0x1] %v85_v25  ;;  %v79_v32 = vsel %vm3663_vm4, 0, %v78_v29  ;;  %v3856_v33 = vld [vmem:[%s5644_s2] ss:$0 sm:$0xff]  ;;  %v208_v36 = vsel %vm3663_vm4, 0, %v207_v31 }
  0x3d   :  { %80 = vst [vmem:[#allocation2 + $0x8] sm:$0x1] %v79_v32  ;;  %209 = vst [vmem:[#allocation2 + $0x160] sm:$0x1] %v208_v36  ;;  %v1898_v40 = vld [vmem:[#allocation2 + $0x4] sm:$0x1]  ;;  %v1866_v20 = vmul.f32 %v3886_v63, %v1846_v58 }
  0x3e   :  { %3405 = vmatmul.mubr.msk.bf16.gmra.mrb[28].mxu0 %vm523_vm1, %v3503_v46  ;;  %v252_v46 = vld [vmem:[#allocation2 + $0x1d8] sm:$0x1]  ;;  %v87_v44 = vld [vmem:[#allocation2 + $0x20] sm:$0x1]  ;;  %5724 = vst [vmem:[#allocation5_spill] sm:$0xff] %v3886_v63  ;;  %v2113_v14 = vsub.s32 3, %v3844_v26 }
  0x3f   :  { %3408 = vmatprep.mubr.msk.bf16.mxu0 %vm523_vm1, %v3504_v47  ;;  %v259_v47 = vsel %vm3663_vm4, 0, %v258_v45  ;;  %v2181_v45 = vsub.s32 4, %v3844_v26  ;;  %v81_v2 = vld [vmem:[#allocation2 + $0x10] sm:$0x1]  ;;  %v3246_v5 = vld [vmem:[%s5646_s4] ss:$0 sm:$0xff] }
  0x40   :  { %260 = vst [vmem:[#allocation2 + $0x1e8] sm:$0x1] %v259_v47  ;;  %v82_v11 = vsel %vm3663_vm4, 0, %v81_v2 }
  0x41   :  { %83 = vst [vmem:[#allocation2 + $0x10] sm:$0x1] %v82_v11 }
  0x46   :  { %3409 = vmatmul.mubr.msk.bf16.gmra.mrb[32].mxu0 %vm523_vm1, %v3505_v48  ;;  %v253_v48 = vsel %vm3663_vm4, 0, %v252_v46 }
  0x47   :  { %3412 = vmatprep.mubr.msk.bf16.mxu0 %vm523_vm1, %v3506_v49  ;;  %v219_v49 = vld [vmem:[#allocation2 + $0x180] sm:$0x1]  ;;  %254 = vst [vmem:[#allocation2 + $0x1d8] sm:$0x1] %v253_v48  ;;  %v3876_v48 = vrot.slane %v3861_v34, %v1932_v35 }
  0x49   :  { %v3893_v6 = vmul.f32 %v3876_v48, %v1777_v37 }
  0x4b   :  { %v1999_v24 = vrot.slane %v3893_v6, 1 }
  0x4e   :  { %3413 = vmatmul.mubr.msk.bf16.gmra.mrb[36].mxu0 %vm523_vm1, %v3507_v50  ;;  %v220_v50 = vsel %vm3663_vm4, 0, %v219_v49  ;;  %v88_v49 = vsel %vm3663_vm4, 0, %v87_v44 }
  0x4f   :  { %3416 = vmatprep.mubr.msk.bf16.mxu0 %vm523_vm1, %v3508_v51  ;;  %v213_v51 = vld [vmem:[#allocation2 + $0x170] sm:$0x1]  ;;  %221 = vst [vmem:[#allocation2 + $0x180] sm:$0x1] %v220_v50  ;;  %89 = vst [vmem:[#allocation2 + $0x20] sm:$0x1] %v88_v49 }
  0x50   :  { %v214_v53 = vsel %vm3663_vm4, 0, %v213_v51 }
  0x51   :  { %215 = vst [vmem:[#allocation2 + $0x170] sm:$0x1] %v214_v53  ;;  %v1797_v53 = vmul.f32 %v3869_v38, %v1777_v37 }
  0x53   :  { %v1813_v19 = vadd.f32 %v3246_v5, %v1797_v53 }
  0x56   :  { %3417 = vmatmul.mubr.msk.bf16.gmra.mrb[40].mxu0 %vm523_vm1, %v3509_v52  ;;  %v222_v52 = vld [vmem:[#allocation2 + $0x188] sm:$0x1] }
  0x57   :  { %v223_v54 = vsel %vm3663_vm4, 0, %v222_v52 }
  0x58   :  { %224 = vst [vmem:[#allocation2 + $0x188] sm:$0x1] %v223_v54  ;;  %v1914_v54 = vunpack.c.l.bf16 %v1898_v40 }
  0x5a   :  { %v3903_v15 = vmul.f32 %v3876_v48, %v1914_v54 }
  0x5c   :  { %v2000_v49 = vrot.slane %v3903_v15, 1 }
  0xd9   :  { %v3378_v39 = vpop.f32.mrb[0].mxu0 }
  0xda   :  { %v667_v41 = vadd.f32 %v3378_v39, %v3856_v33  ;;  %v658_v42 = vpop.f32.mrb[1].mxu0  ;;  %v3422_v55 = vpop.f32.mrb[0].mxu1 }
  0xdb   :  { %v659_v46 = vadd.f32 %v3856_v33, %v658_v42  ;;  %v3379_v47 = vpop.f32.mrb[2].mxu0  ;;  %v843_v59 = vadd.f32 %v3422_v55, %v3856_v33  ;;  %v834_v60 = vpop.f32.mrb[1].mxu1  ;;  %v1469_v42 = vld [vmem:[#allocation2 + $0x1e4] sm:$0x1] }
  0xdc   :  { %v915_v50 = vmax.f32 %v667_v41, 0.0  ;;  %v670_v51 = vadd.f32 %v3379_v47, %v3856_v33  ;;  %v661_v52 = vpop.f32.mrb[3].mxu0  ;;  %v835_v0 = vadd.f32 %v3856_v33, %v834_v60  ;;  %v3423_v1 = vpop.f32.mrb[2].mxu1 }
  0xdd   :  { %v913_v56 = vmax.f32 %v659_v46, 0.0  ;;  %v662_v57 = vadd.f32 %v3856_v33, %v661_v52  ;;  %v959_v7 = vmax.f32 %v843_v59, 0.0  ;;  %v3895_v8 = vpop.f32.mrb[3].mxu1  ;;  %v846_v43 = vadd.f32 %v3423_v1, %v3856_v33 }
  0xde   :  { %v3266_v61 = vpack.c.bf16 %v915_v50, %v915_v50  ;;  %v916_v62 = vmax.f32 %v670_v51, 0.0  ;;  %v957_v10 = vmax.f32 %v835_v0, 0.0  ;;  %v1466_v50 = vld [vmem:[#allocation2 + $0x1e0] sm:$0xf]  ;;  %v1457_v0 = vld [vmem:[#allocation2 + $0x1d4] sm:$0x1] }
  0xdf   :  { %v3264_v3 = vpack.c.bf16 %v913_v56, %v913_v56  ;;  %v914_v4 = vmax.f32 %v662_v57, 0.0  ;;  %v3310_v16 = vpack.c.bf16 %v959_v7, %v959_v7  ;;  %v1454_v57 = vld [vmem:[#allocation2 + $0x1d0] sm:$0xf]  ;;  %v960_v5 = vmax.f32 %v846_v43, 0.0 }
  0xe0   :  { %1204 = vst.msk [vmem:[#allocation2 + $0xe8] sm:$0xf] %vm39_vm5, %v3266_v61  ;;  %v3267_v9 = vpack.c.bf16 %v916_v62, %v916_v62  ;;  %v3308_v21 = vpack.c.bf16 %v957_v10, %v957_v10  ;;  %v2249_v7 = vsub.s32 5, %v3844_v26  ;;  %v1882_v10 = vadd.f32 %v1866_v20, %v1813_v19 }
  0xe1   :  { %1202 = vst.msk [vmem:[#allocation2 + $0xd8] sm:$0xf] %vm39_vm5, %v3264_v3  ;;  %v3265_v12 = vpack.c.bf16 %v914_v4, %v914_v4  ;;  %v3382_v13 = vpop.f32.mrb[4].mxu0  ;;  %v1331_v25 = vshrl.u32 %v3310_v16, 16  ;;  %v1334_v28 = vshll.u32 %v3310_v16, 16 }
  0xe2   :  { %1205 = vst.msk [vmem:[#allocation2 + $0xf0] sm:$0xf] %vm39_vm5, %v3267_v9  ;;  %v683_v17 = vadd.f32 %v3382_v13, %v3856_v33  ;;  %v674_v18 = vpop.f32.mrb[5].mxu0  ;;  %v1315_v35 = vshrl.u32 %v3308_v21, 16  ;;  %v1318_v36 = vshll.u32 %v3308_v21, 16  ;;  %v3912_v37 = vpop.f32.mrb[4].mxu1  ;;  %v2001_v13 = vsel %vm1998_vm8, %v1999_v24, %v2000_v49 }
  0xe3   :  { %1203 = vst.msk [vmem:[#allocation2 + $0xe0] sm:$0xf] %vm39_vm5, %v3265_v12  ;;  %v675_v22 = vadd.f32 %v3856_v33, %v674_v18  ;;  %v3383_v23 = vpop.f32.mrb[6].mxu0  ;;  %v1333_v41 = vrot.slane %v1331_v25, 7  ;;  %v3916_v44 = vpop.f32.mrb[5].mxu1  ;;  %v3949_v21 = vadd.f32 %v3856_v33, %v3895_v8  ;;  %v3957_v24 = vrot.slane %v3861_v34, %v2181_v45 }
  0xe4   :  { %v919_v29 = vmax.f32 %v683_v17, 0.0  ;;  %v686_v31 = vadd.f32 %v3383_v23, %v3856_v33  ;;  %v677_v32 = vpop.f32.mrb[7].mxu0  ;;  %v1317_v51 = vrot.slane %v1315_v35, 7  ;;  %v3919_v52 = vpop.f32.mrb[6].mxu1  ;;  %v2497_v17 = vsub.s32 7, %v3844_v26 }
  0xe5   :  { %v917_v39 = vmax.f32 %v675_v22, 0.0  ;;  %v678_v40 = vadd.f32 %v3856_v33, %v677_v32  ;;  %v1336_v55 = vor.u32 %v1334_v28, %v1333_v41  ;;  %v1337_v56 = vrot.slane %v1333_v41, 4  ;;  %v3921_v58 = vpop.f32.mrb[7].mxu1  ;;  %5727 = vst [vmem:[#allocation6_spill] sm:$0xff] %v3957_v24 }
  0xe6   :  { %v3270_v46 = vpack.c.bf16 %v919_v29, %v919_v29  ;;  %v920_v47 = vmax.f32 %v686_v31, 0.0  ;;  %v1320_v61 = vor.u32 %v1318_v36, %v1317_v51  ;;  %v1321_v62 = vrot.slane %v1317_v51, 4 }
  0xe7   :  { %v3268_v53 = vpack.c.bf16 %v917_v39, %v917_v39  ;;  %v918_v54 = vmax.f32 %v678_v40, 0.0  ;;  %v1467_v3 = vsel %vm3926_vm7, %v1336_v55, %v1466_v50  ;;  %v1470_v4 = vsel %vm3663_vm4, %v1337_v56, %v1469_v42  ;;  %v2149_v32 = vld [vmem:[#allocation2 + $0xe8] sm:$0xf]  ;;  %v1397_v55 = vld [vmem:[#allocation2 + $0xa4] sm:$0x1] }
  0xe8   :  { %1208 = vst.msk [vmem:[#allocation2 + $0x108] sm:$0xf] %vm39_vm5, %v3270_v46  ;;  %v3271_v59 = vpack.c.bf16 %v920_v47, %v920_v47  ;;  %1468 = vst [vmem:[#allocation2 + $0x1e0] sm:$0xf] %v1467_v3  ;;  %v1455_v11 = vsel %vm3926_vm7, %v1320_v61, %v1454_v57  ;;  %v1458_v16 = vsel %vm3663_vm4, %v1321_v62, %v1457_v0  ;;  %v2429_v23 = vsub.s32 6, %v3844_v26 }
  0xe9   :  { %1206 = vst.msk [vmem:[#allocation2 + $0xf8] sm:$0xf] %vm39_vm5, %v3268_v53  ;;  %v3269_v1 = vpack.c.bf16 %v918_v54, %v918_v54  ;;  %v3386_v2 = vpop.f32.mrb[8].mxu0  ;;  %1471 = vst [vmem:[#allocation2 + $0x1e4] sm:$0x1] %v1470_v4  ;;  %v3960_v29 = vpack.c.bf16 %v960_v5, %v960_v5  ;;  %v3967_v8 = vrot.slane %v3861_v34, %v2113_v14  ;;  %v958_v50 = vmax.f32 %v3949_v21, 0.0 }
  0xea   :  { %1209 = vst.msk [vmem:[#allocation2 + $0x110] sm:$0xf] %vm39_vm5, %v3271_v59  ;;  %v699_v6 = vadd.f32 %v3386_v2, %v3856_v33  ;;  %v690_v9 = vpop.f32.mrb[9].mxu0  ;;  %1456 = vst [vmem:[#allocation2 + $0x1d0] sm:$0xf] %v1455_v11  ;;  %v3951_v22 = vpop.f32.mrb[8].mxu1  ;;  %v3970_v36 = vrot.slane %v3861_v34, %v2249_v7  ;;  %v3974_v41 = vadd.f32 %v2001_v13, %v1882_v10  ;;  %v2165_v53 = vunpack.c.l.bf16 %v2149_v32 }
  0xeb   :  { %1207 = vst.msk [vmem:[#allocation2 + $0x100] sm:$0xf] %vm39_vm5, %v3269_v1  ;;  %v691_v12 = vadd.f32 %v3856_v33, %v690_v9  ;;  %v3387_v15 = vpop.f32.mrb[10].mxu0  ;;  %1459 = vst [vmem:[#allocation2 + $0x1d4] sm:$0x1] %v1458_v16  ;;  %v3962_v31 = vpop.f32.mrb[9].mxu1  ;;  %v3977_v43 = vrot.slane %v3861_v34, %v2497_v17  ;;  %v3985_v51 = vrot.slane %v3861_v34, %v2429_v23 }
  0xec   :  { %v923_v18 = vmax.f32 %v699_v6, 0.0  ;;  %v702_v19 = vadd.f32 %v3387_v15, %v3856_v33  ;;  %v693_v20 = vpop.f32.mrb[11].mxu0  ;;  %5728 = vst [vmem:[#allocation7_spill] sm:$0xff] %v3967_v8  ;;  %5729 = vst [vmem:[#allocation8_spill] sm:$0xff] %v3970_v36  ;;  %v3972_v45 = vpop.f32.mrb[10].mxu1  ;;  %v1339_v61 = vshrl.u32 %v3960_v29, 16 }
  0xed   :  { %v921_v25 = vmax.f32 %v691_v12, 0.0  ;;  %v694_v28 = vadd.f32 %v3856_v33, %v693_v20  ;;  %5730 = vst [vmem:[#allocation9_spill] sm:$0xff] %v3977_v43  ;;  %v3979_v46 = vpop.f32.mrb[11].mxu1  ;;  %v3981_v47 = vld [vmem:[#allocation2 + $0xd8] sm:$0xf]  ;;  %5731 = vst [vmem:[#allocation10_spill] sm:$0xff] %v3985_v51 }
  0xee   :  { %v3274_v35 = vpack.c.bf16 %v923_v18, %v923_v18  ;;  %v924_v39 = vmax.f32 %v702_v19, 0.0  ;;  %v1394_v54 = vld [vmem:[#allocation2 + $0xa0] sm:$0xf]  ;;  %v1382_v1 = vld [vmem:[#allocation2 + $0x90] sm:$0xf]  ;;  %v1342_v5 = vshll.u32 %v3960_v29, 16  ;;  %v2163_v6 = vunpack.c.l.bf16 %v3981_v47 }
  0xef   :  { %v3272_v40 = vpack.c.bf16 %v921_v25, %v921_v25  ;;  %v922_v42 = vmax.f32 %v694_v28, 0.0  ;;  %v1385_v2 = vld [vmem:[#allocation2 + $0x94] sm:$0x1]  ;;  %v1400_v10 = vld [vmem:[#allocation2 + $0xa8] sm:$0xf]  ;;  %v3991_v18 = vmul.f32 %v3957_v24, %v2165_v53 }
  0xf0   :  { %v1235_v49 = vshrl.u32 %v3274_v35, 16  ;;  %v3275_v14 = vpack.c.bf16 %v924_v39, %v924_v39  ;;  %v1238_v0 = vshll.u32 %v3274_v35, 16  ;;  %v1403_v15 = vld [vmem:[#allocation2 + $0xac] sm:$0x1]  ;;  %v2150_v19 = vld [vmem:[#allocation2 + $0xf0] sm:$0xf] }
  0xf1   :  { %v1219_v56 = vshrl.u32 %v3272_v40, 16  ;;  %v3273_v57 = vpack.c.bf16 %v922_v42, %v922_v42  ;;  %v3390_v59 = vpop.f32.mrb[12].mxu0  ;;  %v1222_v7 = vshll.u32 %v3272_v40, 16  ;;  %5732 = vst [vmem:[#allocation11_spill] sm:$0xff] %v3991_v18  ;;  %v1418_v18 = vld [vmem:[#allocation2 + $0xc0] sm:$0xf] }
  0xf2   :  { %v1237_v62 = vrot.slane %v1235_v49, 7  ;;  %v1243_v3 = vshrl.u32 %v3275_v14, 16  ;;  %v706_v4 = vpop.f32.mrb[13].mxu0  ;;  %v1246_v9 = vshll.u32 %v3275_v14, 16  ;;  %v3995_v32 = vpop.f32.mrb[12].mxu1 }
  0xf3   :  { %v1221_v34 = vrot.slane %v1219_v56, 7  ;;  %v1227_v16 = vshrl.u32 %v3273_v57, 16  ;;  %v3391_v17 = vpop.f32.mrb[14].mxu0  ;;  %v1230_v25 = vshll.u32 %v3273_v57, 16  ;;  %v4001_v47 = vpop.f32.mrb[13].mxu1 }
  0xf4   :  { %v1240_v11 = vor.u32 %v1238_v0, %v1237_v62  ;;  %v1241_v12 = vrot.slane %v1237_v62, 4  ;;  %v1245_v13 = vrot.slane %v1243_v3, 7  ;;  %v3993_v28 = vpop.f32.mrb[15].mxu0  ;;  %v2148_v49 = vld [vmem:[#allocation2 + $0xe0] sm:$0xf]  ;;  %v4008_v62 = vpop.f32.mrb[14].mxu1 }
  0xf5   :  { %v1224_v20 = vor.u32 %v1222_v7, %v1221_v34  ;;  %v1225_v23 = vrot.slane %v1221_v34, 4  ;;  %v1229_v56 = vrot.slane %v1227_v16, 7  ;;  %v1388_v57 = vld [vmem:[#allocation2 + $0x98] sm:$0xf]  ;;  %v1391_v34 = vld [vmem:[#allocation2 + $0x9c] sm:$0x1] }
  0xf6   :  { %v1395_v35 = vsel %vm3926_vm7, %v1240_v11, %v1394_v54  ;;  %v1398_v39 = vsel %vm3663_vm4, %v1241_v12, %v1397_v55  ;;  %v1248_v40 = vor.u32 %v1246_v9, %v1245_v13  ;;  %v1249_v42 = vrot.slane %v1245_v13, 4  ;;  %v2229_v7 = vld [vmem:[#allocation2 + $0x1e4] sm:$0x1]  ;;  %v2153_v9 = vld [vmem:[#allocation2 + $0x108] sm:$0xf] }
  0xf7   :  { %1396 = vst [vmem:[#allocation2 + $0xa0] sm:$0xf] %v1395_v35  ;;  %1399 = vst [vmem:[#allocation2 + $0xa4] sm:$0x1] %v1398_v39  ;;  %v1383_v14 = vsel %vm3926_vm7, %v1224_v20, %v1382_v1  ;;  %v1386_v53 = vsel %vm3663_vm4, %v1225_v23, %v1385_v2  ;;  %v715_v54 = vadd.f32 %v3390_v59, %v3856_v33  ;;  %v2166_v55 = vunpack.c.l.bf16 %v2150_v19  ;;  %v4015_v2 = vpop.f32.mrb[15].mxu1 }
  0xf8   :  { %1384 = vst [vmem:[#allocation2 + $0x90] sm:$0xf] %v1383_v14  ;;  %1387 = vst [vmem:[#allocation2 + $0x94] sm:$0x1] %v1386_v53  ;;  %v1401_v0 = vsel %vm3926_vm7, %v1248_v40, %v1400_v10  ;;  %v1404_v3 = vsel %vm3663_vm4, %v1249_v42, %v1403_v15  ;;  %v707_v1 = vadd.f32 %v3856_v33, %v706_v4  ;;  %v1233_v11 = vrot.slane %v1229_v56, 4 }
  0xf9   :  { %1402 = vst [vmem:[#allocation2 + $0xa8] sm:$0xf] %v1401_v0  ;;  %1405 = vst [vmem:[#allocation2 + $0xac] sm:$0x1] %v1404_v3  ;;  %v1232_v59 = vor.u32 %v1230_v25, %v1229_v56  ;;  %v927_v12 = vmax.f32 %v715_v54, 0.0  ;;  %v4017_v13 = vrot.slane %v1339_v61, 7  ;;  %v2164_v10 = vunpack.c.l.bf16 %v2148_v49 }
  0xfa   :  { %v4019_v16 = vpop.f32.mrb[16].mxu0  ;;  %v2151_v19 = vld [vmem:[#allocation2 + $0xf8] sm:$0xf]  ;;  %v925_v20 = vmax.f32 %v707_v1, 0.0  ;;  %v718_v15 = vadd.f32 %v3391_v17, %v3856_v33  ;;  %v2091_v23 = vld [vmem:[#allocation2 + $0x1d0] sm:$0xf]  ;;  %v4025_v4 = vpack.c.bf16 %v958_v50, %v958_v50  ;;  %v1392_v39 = vsel %vm3663_vm4, %v1233_v11, %v1391_v34 }
  0xfb   :  { %v4027_v35 = vpop.f32.mrb[17].mxu0  ;;  %v2152_v25 = vld [vmem:[#allocation2 + $0x100] sm:$0xf]  ;;  %v1389_v61 = vsel %vm3926_vm7, %v1232_v59, %v1388_v57  ;;  %v3278_v40 = vpack.c.bf16 %v927_v12, %v927_v12  ;;  %v2245_v42 = vunpack.c.l.bf16 %v2229_v7  ;;  %v4036_v17 = vmul.f32 %v3957_v24, %v2163_v6  ;;  %1393 = vst [vmem:[#allocation2 + $0x9c] sm:$0x1] %v1392_v39  ;;  %v4040_v56 = vpop.f32.mrb[16].mxu1 }
  0xfc   :  { %v4033_v49 = vpop.f32.mrb[18].mxu0  ;;  %v2169_v21 = vunpack.c.l.bf16 %v2153_v9  ;;  %1390 = vst [vmem:[#allocation2 + $0x98] sm:$0xf] %v1389_v61  ;;  %v3276_v50 = vpack.c.bf16 %v925_v20, %v925_v20  ;;  %v928_v14 = vmax.f32 %v718_v15, 0.0  ;;  %v4043_v57 = vmul.f32 %v3957_v24, %v2166_v55  ;;  %v4045_v0 = vld [vmem:[#allocation2 + $0x110] sm:$0xf] }
  0xfd   :  { %5733 = vst [vmem:[#allocation12_spill] sm:$0xff] %v4036_v17  ;;  %v4038_v53 = vpop.f32.mrb[19].mxu0  ;;  %v2167_v54 = vunpack.c.l.bf16 %v2151_v19  ;;  %5735 = vst [vmem:[#allocation14_spill] sm:$0xff] %v4045_v0  ;;  %v1267_v3 = vshrl.u32 %v3278_v40, 16  ;;  %v2107_v34 = vunpack.c.l.bf16 %v2091_v23  ;;  %v2227_v1 = vld [vmem:[#allocation2 + $0x1d4] sm:$0x1]  ;;  %v4050_v7 = vmul.f32 %v3957_v24, %v2164_v10 }
  0xfe   :  { %5734 = vst [vmem:[#allocation13_spill] sm:$0xff] %v4043_v57  ;;  %v4047_v6 = vpop.f32.mrb[17].mxu1  ;;  %v2168_v9 = vunpack.c.l.bf16 %v2152_v25  ;;  %v2081_v59 = vld [vmem:[#allocation2 + $0xa0] sm:$0xf]  ;;  %v1251_v11 = vshrl.u32 %v3276_v50, 16  ;;  %v4055_v12 = vor.u32 %v1342_v5, %v4017_v13  ;;  %v4060_v19 = vmul.f32 %v3970_v36, %v2245_v42 }
  0xff   :  { %5736 = vst [vmem:[#allocation15_spill] sm:$0xff] %v4050_v7  ;;  %v4057_v55 = vld [vmem:[#allocation2 + $0x1e0] sm:$0xf]  ;;  %v4066_v23 = vmul.f32 %v3957_v24, %v2169_v21  ;;  %v2217_v61 = vld [vmem:[#allocation2 + $0xa4] sm:$0x1]  ;;  %v4069_v5 = vpack.c.bf16 %v928_v14, %v928_v14  ;;  %v2243_v39 = vunpack.c.l.bf16 %v2227_v1  ;;  %v4072_v27 = vmul.f32 %v3957_v24, %v2167_v54  ;;  %v4079_v10 = vpop.f32.mrb[18].mxu1 }
 0x100   :  { %5737 = vst [vmem:[#allocation16_spill] sm:$0xff] %v4057_v55  ;;  %5738 = vst [vmem:[#allocation17_spill] sm:$0xff] %v4060_v19  ;;  %v2079_v29 = vld [vmem:[#allocation2 + $0x90] sm:$0xf]  ;;  %v2097_v42 = vunpack.c.l.bf16 %v2081_v59  ;;  %v1269_v26 = vrot.slane %v1267_v3, 7  ;;  %v4075_v20 = vmul.f32 %v3970_v36, %v2107_v34  ;;  %v4082_v21 = vmul.f32 %v3957_v24, %v2168_v9  ;;  %v4090_v3 = vpop.f32.mrb[19].mxu1 }
 0x101   :  { %5739 = vst [vmem:[#allocation18_spill] sm:$0xff] %v4066_v23  ;;  %5740 = vst [vmem:[#allocation19_spill] sm:$0xff] %v4072_v27  ;;  %v4077_v15 = vpop.f32.mrb[20].mxu0  ;;  %v2215_v25 = vld [vmem:[#allocation2 + $0x94] sm:$0x1]  ;;  %v1253_v23 = vrot.slane %v1251_v11, 7  ;;  %v4086_v1 = vmul.f32 %v3967_v8, %v2107_v34  ;;  %v2233_v59 = vunpack.c.l.bf16 %v2217_v61  ;;  %v2095_v27 = vunpack.c.l.bf16 %v2079_v29 }
 0x102   :  { %5741 = vst [vmem:[#allocation20_spill] sm:$0xff] %v4075_v20  ;;  %5742 = vst [vmem:[#allocation21_spill] sm:$0xff] %v4079_v10  ;;  %v4088_v54 = vpop.f32.mrb[21].mxu0  ;;  %v1270_v57 = vshll.u32 %v3278_v40, 16  ;;  %v1421_v7 = vld [vmem:[#allocation2 + $0xc4] sm:$0x1]  ;;  %v4097_v14 = vmul.f32 %v3970_v36, %v2243_v39  ;;  %v710_v34 = vadd.f32 %v3856_v33, %v3993_v28  ;;  %v4104_v61 = vmul.f32 %v3970_v36, %v2097_v42 }
 0x103   :  { %5743 = vst [vmem:[#allocation22_spill] sm:$0xff] %v4082_v21  ;;  %5744 = vst [vmem:[#allocation23_spill] sm:$0xff] %v4086_v1  ;;  %v4093_v9 = vld [vmem:[#allocation2 + $0xa8] sm:$0xf]  ;;  %v1254_v21 = vshll.u32 %v3276_v50, 16  ;;  %v1275_v11 = vshrl.u32 %v4069_v5, 16  ;;  %v2231_v40 = vunpack.c.l.bf16 %v2215_v25  ;;  %v4110_v1 = vmul.f32 %v3967_v8, %v2097_v42 }
 0x104   :  { %5745 = vst [vmem:[#allocation24_spill] sm:$0xff] %v4090_v3  ;;  %5746 = vst [vmem:[#allocation25_spill] sm:$0xff] %v4097_v14  ;;  %v4101_v0 = vpop.f32.mrb[22].mxu0  ;;  %v1272_v29 = vor.u32 %v1270_v57, %v1269_v26  ;;  %v1406_v55 = vld [vmem:[#allocation2 + $0xb0] sm:$0xf]  ;;  %v1273_v39 = vrot.slane %v1269_v26, 4  ;;  %v4113_v28 = vmul.f32 %v3970_v36, %v2233_v59  ;;  %v4116_v3 = vmul.f32 %v3967_v8, %v2095_v27 }
 0x105   :  { %5747 = vst [vmem:[#allocation26_spill] sm:$0xff] %v4104_v61  ;;  %v1409_v17 = vld [vmem:[#allocation2 + $0xb4] sm:$0x1]  ;;  %v4107_v50 = vpop.f32.mrb[23].mxu0  ;;  %5748 = vst [vmem:[#allocation27_spill] sm:$0xff] %v4110_v1  ;;  %v1256_v24 = vor.u32 %v1254_v21, %v1253_v23  ;;  %v1257_v51 = vrot.slane %v1253_v23, 4  ;;  %v4131_v57 = vmul.f32 %v3970_v36, %v2095_v27  ;;  %v851_v59 = vadd.f32 %v3856_v33, %v3916_v44 }
 0x106   :  { %5749 = vst [vmem:[#allocation28_spill] sm:$0xff] %v4113_v28  ;;  %v1419_v25 = vsel %vm3926_vm7, %v1272_v29, %v1418_v18  ;;  %v1472_v19 = vld [vmem:[#allocation2 + $0x1e8] sm:$0xf]  ;;  %v1475_v20 = vld [vmem:[#allocation2 + $0x1ec] sm:$0x1]  ;;  %v1422_v26 = vsel %vm3663_vm4, %v1273_v39, %v1421_v7  ;;  %v1277_v21 = vrot.slane %v1275_v11, 7  ;;  %v4134_v18 = vmul.f32 %v3970_v36, %v2231_v40 }
 0x107   :  { %v4121_v10 = vld [vmem:[#allocation2 + $0x98] sm:$0xf]  ;;  %1420 = vst [vmem:[#allocation2 + $0xc0] sm:$0xf] %v1419_v25  ;;  %v1407_v23 = vsel %vm3926_vm7, %v1256_v24, %v1406_v55  ;;  %v1410_v42 = vsel %vm3663_vm4, %v1257_v51, %v1409_v17  ;;  %5750 = vst [vmem:[#allocation29_spill] sm:$0xff] %v4131_v57  ;;  %v1278_v7 = vshll.u32 %v4069_v5, 16  ;;  %v1473_v17 = vsel %vm3926_vm7, %v4055_v12, %v1472_v19 }
 0x108   :  { %5751 = vst [vmem:[#allocation30_spill] sm:$0xff] %v4134_v18  ;;  %1423 = vst [vmem:[#allocation2 + $0xc4] sm:$0x1] %v1422_v26  ;;  %v1427_v29 = vld [vmem:[#allocation2 + $0xcc] sm:$0x1]  ;;  %v1281_v24 = vrot.slane %v1277_v21, 4 }
 0x109   :  { %1408 = vst [vmem:[#allocation2 + $0xb0] sm:$0xf] %v1407_v23  ;;  %1411 = vst [vmem:[#allocation2 + $0xb4] sm:$0x1] %v1410_v42  ;;  %v4137_v39 = vpop.f32.mrb[24].mxu0  ;;  %v926_v51 = vmax.f32 %v710_v34, 0.0  ;;  %v1280_v26 = vor.u32 %v1278_v7, %v1277_v21  ;;  %v859_v42 = vadd.f32 %v3912_v37, %v3856_v33  ;;  %v862_v21 = vadd.f32 %v3919_v52, %v3856_v33 }
 0x10a   :  { %v1424_v55 = vld [vmem:[#allocation2 + $0xc8] sm:$0xf]  ;;  %v5752_v27 = vrot.slane %v4017_v13, 4  ;;  %v4146_v40 = vpop.f32.mrb[25].mxu0  ;;  %v2216_v5 = vld [vmem:[#allocation2 + $0x9c] sm:$0x1]  ;;  %v1428_v13 = vsel %vm3663_vm4, %v1281_v24, %v1427_v29 }
 0x10b   :  { %1474 = vst [vmem:[#allocation2 + $0x1e8] sm:$0xf] %v1473_v17  ;;  %v5753_v23 = vshrl.u32 %v4025_v4, 16  ;;  %v4153_v12 = vpop.f32.mrb[26].mxu0  ;;  %v3277_v19 = vpack.c.bf16 %v926_v51, %v926_v51  ;;  %v1425_v17 = vsel %vm3926_vm7, %v1280_v26, %v1424_v55  ;;  %1429 = vst [vmem:[#allocation2 + $0xcc] sm:$0x1] %v1428_v13  ;;  %v2232_v51 = vunpack.c.l.bf16 %v2216_v5 }
 0x10c   :  { %v1476_v11 = vsel %vm3663_vm4, %v5752_v27, %v1475_v20  ;;  %v1460_v20 = vld [vmem:[#allocation2 + $0x1d8] sm:$0xf]  ;;  %v1463_v27 = vld [vmem:[#allocation2 + $0x1dc] sm:$0x1]  ;;  %v4161_v7 = vpop.f32.mrb[27].mxu0  ;;  %v5755_v37 = vshll.u32 %v4025_v4, 16  ;;  %v731_v55 = vadd.f32 %v4019_v16, %v3856_v33 }
 0x10d   :  { %1477 = vst [vmem:[#allocation2 + $0x1ec] sm:$0x1] %v1476_v11  ;;  %v1325_v34 = vrot.slane %v5753_v23, 7  ;;  %5754 = vst [vmem:[#allocation31_spill] sm:$0xff] %v4161_v7  ;;  %v963_v29 = vmax.f32 %v859_v42, 0.0  ;;  %v1259_v25 = vshrl.u32 %v3277_v19, 16  ;;  %v5756_v42 = vunpack.c.l.bf16 %v4093_v9 }
 0x10e   :  { %v2218_v24 = vld [vmem:[#allocation2 + $0xac] sm:$0x1]  ;;  %1426 = vst [vmem:[#allocation2 + $0xc8] sm:$0xf] %v1425_v17  ;;  %v961_v61 = vmax.f32 %v851_v59, 0.0  ;;  %v964_v44 = vmax.f32 %v862_v21, 0.0  ;;  %v854_v59 = vadd.f32 %v3856_v33, %v3921_v58  ;;  %v5760_v58 = vunpack.c.l.bf16 %v4121_v10 }
 0x10f   :  { %v1328_v11 = vor.u32 %v5755_v37, %v1325_v34  ;;  %v1329_v23 = vrot.slane %v1325_v34, 4  ;;  %v3314_v7 = vpack.c.bf16 %v963_v29, %v963_v29  ;;  %v2221_v26 = vld [vmem:[#allocation2 + $0xc4] sm:$0x1]  ;;  %v4179_v13 = vmul.f32 %v3967_v8, %v5756_v42 }
 0x110   :  { %v3312_v5 = vpack.c.bf16 %v961_v61, %v961_v61  ;;  %v3315_v34 = vpack.c.bf16 %v964_v44, %v964_v44  ;;  %v2083_v21 = vld [vmem:[#allocation2 + $0xb0] sm:$0xf]  ;;  %v2219_v17 = vld [vmem:[#allocation2 + $0xb4] sm:$0x1]  ;;  %v1261_v37 = vrot.slane %v1259_v25, 7  ;;  %v2253_v61 = vmul.f32 %v3970_v36, %v5760_v58 }
 0x111   :  { %v1461_v52 = vsel %vm3926_vm7, %v1328_v11, %v1460_v20  ;;  %v1464_v1 = vsel %vm3663_vm4, %v1329_v23, %v1463_v27  ;;  %5757 = vst [vmem:[#allocation32_spill] sm:$0xff] %v4179_v13  ;;  %v2234_v20 = vunpack.c.l.bf16 %v2218_v24  ;;  %v5758_v27 = vmov %v5756_v42  ;;  %1489 = vst.msk [vmem:[#allocation2 + $0x180] sm:$0xf] %vm39_vm5, %v3314_v7  ;;  %v1412_v24 = vld [vmem:[#allocation2 + $0xb8] sm:$0xf] }
 0x112   :  { %1462 = vst [vmem:[#allocation2 + $0x1d8] sm:$0xf] %v1461_v52  ;;  %1465 = vst [vmem:[#allocation2 + $0x1dc] sm:$0x1] %v1464_v1  ;;  %v4184_v16 = vmul.f32 %v3970_v36, %v5758_v27  ;;  %v4187_v1 = vpop.f32.mrb[28].mxu0  ;;  %v2254_v11 = vmul.f32 %v3970_v36, %v2232_v51  ;;  %v1262_v23 = vshll.u32 %v3277_v19, 16  ;;  %v2237_v29 = vunpack.c.l.bf16 %v2221_v26 }
 0x113   :  { %1487 = vst.msk [vmem:[#allocation2 + $0x170] sm:$0xf] %vm39_vm5, %v3312_v5  ;;  %1490 = vst.msk [vmem:[#allocation2 + $0x188] sm:$0xf] %vm39_vm5, %v3315_v34  ;;  %v931_v9 = vmax.f32 %v731_v55, 0.0  ;;  %v962_v25 = vmax.f32 %v854_v59, 0.0  ;;  %v723_v7 = vadd.f32 %v3856_v33, %v4027_v35  ;;  %v875_v52 = vadd.f32 %v3951_v22, %v3856_v33 }
 0x114   :  { %5759 = vst [vmem:[#allocation33_spill] sm:$0xff] %v4184_v16  ;;  %v1415_v44 = vld [vmem:[#allocation2 + $0xbc] sm:$0x1]  ;;  %v4199_v42 = vpop.f32.mrb[29].mxu0  ;;  %v2099_v27 = vunpack.c.l.bf16 %v2083_v21  ;;  %v2235_v51 = vunpack.c.l.bf16 %v2219_v17  ;;  %v1264_v19 = vor.u32 %v1262_v23, %v1261_v37  ;;  %v1265_v58 = vrot.slane %v1261_v37, 4 }
 0x115   :  { %v4201_v5 = vpop.f32.mrb[30].mxu0  ;;  %v4205_v55 = vadd.f32 %v4116_v3, %v3974_v41  ;;  %v4210_v35 = vmul.f32 %v3970_v36, %v2234_v20  ;;  %v2318_v59 = vrot.slane %v2253_v61, 1  ;;  %v3282_v37 = vpack.c.bf16 %v931_v9, %v931_v9  ;;  %v4218_v26 = vld [vmem:[#allocation2 + $0xc0] sm:$0xf]  ;;  %v4232_v9 = vld [vmem:[#allocation2 + $0x1e8] sm:$0xf] }
 0x116   :  { %v4212_v22 = vpop.f32.mrb[31].mxu0  ;;  %v1413_v21 = vsel %vm3926_vm7, %v1264_v19, %v1412_v24  ;;  %v1416_v17 = vsel %vm3663_vm4, %v1265_v58, %v1415_v44  ;;  %v2319_v23 = vrot.slane %v2254_v11, 1  ;;  %v3313_v41 = vpack.c.bf16 %v962_v25, %v962_v25  ;;  %5763 = vst [vmem:[#allocation36_spill] sm:$0xff] %v4218_v26  ;;  %5767 = vst [vmem:[#allocation40_spill] sm:$0xff] %v4232_v9  ;;  %v4272_v16 = vld [vmem:[#allocation2 + $0xcc] sm:$0x1] }
 0x117   :  { %5761 = vst [vmem:[#allocation34_spill] sm:$0xff] %v4205_v55  ;;  %5762 = vst [vmem:[#allocation35_spill] sm:$0xff] %v4210_v35  ;;  %v929_v3 = vmax.f32 %v723_v7, 0.0  ;;  %v967_v4 = vmax.f32 %v875_v52, 0.0  ;;  %v4221_v20 = vmul.f32 %v3970_v36, %v2237_v29  ;;  %v4224_v61 = vmul.f32 %v3970_v36, %v2099_v27 }
 0x118   :  { %1414 = vst [vmem:[#allocation2 + $0xb8] sm:$0xf] %v1413_v21  ;;  %1417 = vst [vmem:[#allocation2 + $0xbc] sm:$0x1] %v1416_v17  ;;  %v4227_v24 = vmul.f32 %v3970_v36, %v2235_v51  ;;  %v734_v11 = vadd.f32 %v4033_v49, %v3856_v33  ;;  %v867_v29 = vadd.f32 %v3856_v33, %v3962_v31  ;;  %v5768_v58 = vunpack.c.l.bf16 %v4121_v10  ;;  %v1841_v10 = vld [vmem:[#allocation2 + $0x180] sm:$0xf] }
 0x119   :  { %5764 = vst [vmem:[#allocation37_spill] sm:$0xff] %v4221_v20  ;;  %5765 = vst [vmem:[#allocation38_spill] sm:$0xff] %v4224_v61  ;;  %v2228_v19 = vld [vmem:[#allocation2 + $0x1dc] sm:$0x1]  ;;  %v3280_v44 = vpack.c.bf16 %v929_v3, %v929_v3  ;;  %v3318_v25 = vpack.c.bf16 %v967_v4, %v967_v4  ;;  %v726_v7 = vadd.f32 %v3856_v33, %v4038_v53  ;;  %v2092_v17 = vld [vmem:[#allocation2 + $0x1d8] sm:$0xf]  ;;  %v1857_v21 = vunpack.c.l.bf16 %v1841_v10 }
 0x11a   :  { %5766 = vst [vmem:[#allocation39_spill] sm:$0xff] %v4227_v24  ;;  %1481 = vst.msk [vmem:[#allocation2 + $0x60] sm:$0xf] %vm39_vm5, %v3282_v37  ;;  %v4244_v49 = vmul.f32 %v3967_v8, %v5768_v58  ;;  %v4247_v37 = vpop.f32.mrb[32].mxu0  ;;  %v4250_v4 = vsel %vm1998_vm8, %v2318_v59, %v2319_v23  ;;  %v4254_v53 = vmul.f32 %v3967_v8, %v2099_v27  ;;  %v2244_v3 = vunpack.c.l.bf16 %v2228_v19  ;;  %v2473_v52 = vld [vmem:[#allocation2 + $0x180] sm:$0xf] }
 0x11b   :  { %1488 = vst.msk [vmem:[#allocation2 + $0x178] sm:$0xf] %vm39_vm5, %v3313_v41  ;;  %5769 = vst [vmem:[#allocation41_spill] sm:$0xff] %v4250_v4  ;;  %v4256_v41 = vld [vmem:[#allocation2 + $0x1ec] sm:$0x1]  ;;  %v4260_v58 = vpop.f32.mrb[33].mxu0  ;;  %v2108_v19 = vunpack.c.l.bf16 %v2092_v17  ;;  %v878_v23 = vadd.f32 %v3972_v45, %v3856_v33 }
 0x11c   :  { %5770 = vst [vmem:[#allocation42_spill] sm:$0xff] %v4254_v53  ;;  %5771 = vst [vmem:[#allocation43_spill] sm:$0xff] %v4256_v41  ;;  %v932_v51 = vmax.f32 %v734_v11, 0.0  ;;  %v4265_v27 = vpop.f32.mrb[34].mxu0  ;;  %v1839_v31 = vld [vmem:[#allocation2 + $0x170] sm:$0xf]  ;;  %v870_v11 = vadd.f32 %v3856_v33, %v3979_v46  ;;  %v4279_v17 = vmul.f32 %v3970_v36, %v2244_v3 }
 0x11d   :  { %1479 = vst.msk [vmem:[#allocation2 + $0x50] sm:$0xf] %vm39_vm5, %v3280_v44  ;;  %1493 = vst.msk [vmem:[#allocation2 + $0x1a0] sm:$0xf] %vm39_vm5, %v3318_v25  ;;  %v965_v4 = vmax.f32 %v867_v29, 0.0  ;;  %v930_v44 = vmax.f32 %v726_v7, 0.0  ;;  %v2489_v29 = vunpack.c.l.bf16 %v2473_v52  ;;  %v1855_v35 = vunpack.c.l.bf16 %v1839_v31 }
 0x11e   :  { %v4268_v14 = vpop.f32.mrb[35].mxu0  ;;  %v4270_v25 = vld [vmem:[#allocation2 + $0xc8] sm:$0xf]  ;;  %5773 = vst [vmem:[#allocation45_spill] sm:$0xff] %v4272_v16  ;;  %v3283_v59 = vpack.c.bf16 %v932_v51, %v932_v51  ;;  %5774 = vst [vmem:[#allocation46_spill] sm:$0xff] %v4279_v17  ;;  %v968_v51 = vmax.f32 %v878_v23, 0.0  ;;  %v4286_v3 = vmul.f32 %v3967_v8, %v2108_v19  ;;  %v4289_v52 = vmul.f32 %v3970_v36, %v2108_v19 }
 0x11f   :  { %5772 = vst [vmem:[#allocation44_spill] sm:$0xff] %v4270_v25  ;;  %v2220_v20 = vld [vmem:[#allocation2 + $0xbc] sm:$0x1]  ;;  %v2471_v7 = vld [vmem:[#allocation2 + $0x170] sm:$0xf]  ;;  %v3316_v34 = vpack.c.bf16 %v965_v4, %v965_v4  ;;  %v3281_v61 = vpack.c.bf16 %v930_v44, %v930_v44  ;;  %v966_v45 = vmax.f32 %v870_v11, 0.0  ;;  %v4300_v57 = vmul.f32 %v3977_v43, %v2489_v29 }
 0x120   :  { %v1842_v28 = vld [vmem:[#allocation2 + $0x188] sm:$0xf]  ;;  %1482 = vst.msk [vmem:[#allocation2 + $0x68] sm:$0xf] %vm39_vm5, %v3283_v59  ;;  %v2084_v18 = vld [vmem:[#allocation2 + $0xb8] sm:$0xf]  ;;  %v2236_v31 = vunpack.c.l.bf16 %v2220_v20  ;;  %v4296_v59 = vmul.f32 %v3886_v63, %v1857_v21  ;;  %v2487_v23 = vunpack.c.l.bf16 %v2471_v7  ;;  %v3319_v24 = vpack.c.bf16 %v968_v51, %v968_v51 }
 0x121   :  { %v2474_v10 = vld [vmem:[#allocation2 + $0x188] sm:$0xf]  ;;  %5775 = vst [vmem:[#allocation47_spill] sm:$0xff] %v4286_v3  ;;  %5776 = vst [vmem:[#allocation48_spill] sm:$0xff] %v4289_v52  ;;  %v4293_v4 = vpop.f32.mrb[36].mxu0  ;;  %v1858_v19 = vunpack.c.l.bf16 %v1842_v28  ;;  %v4305_v20 = vmul.f32 %v3886_v63, %v1855_v35  ;;  %v3317_v7 = vpack.c.bf16 %v966_v45, %v966_v45  ;;  %v891_v51 = vadd.f32 %v3995_v32, %v3856_v33 }
 0x122   :  { %1491 = vst.msk [vmem:[#allocation2 + $0x190] sm:$0xf] %vm39_vm5, %v3316_v34  ;;  %1480 = vst.msk [vmem:[#allocation2 + $0x58] sm:$0xf] %vm39_vm5, %v3281_v61  ;;  %v1833_v44 = vld [vmem:[#allocation2 + $0x60] sm:$0xf]  ;;  %v2490_v52 = vunpack.c.l.bf16 %v2474_v10  ;;  %v2100_v61 = vunpack.c.l.bf16 %v2084_v18  ;;  %v883_v28 = vadd.f32 %v3856_v33, %v4001_v47  ;;  %v894_v18 = vadd.f32 %v4008_v62, %v3856_v33 }
 0x123   :  { %v2465_v11 = vld [vmem:[#allocation2 + $0x60] sm:$0xf]  ;;  %5777 = vst [vmem:[#allocation49_spill] sm:$0xff] %v4300_v57  ;;  %v1840_v34 = vld [vmem:[#allocation2 + $0x178] sm:$0xf]  ;;  %v4302_v41 = vpop.f32.mrb[37].mxu0  ;;  %v1849_v29 = vunpack.c.l.bf16 %v1833_v44  ;;  %v4319_v35 = vmul.f32 %v3970_v36, %v2236_v31  ;;  %v4326_v44 = vmul.f32 %v3886_v63, %v1858_v19 }
 0x124   :  { %v2472_v21 = vld [vmem:[#allocation2 + $0x178] sm:$0xf]  ;;  %1494 = vst.msk [vmem:[#allocation2 + $0x1a8] sm:$0xf] %vm39_vm5, %v3319_v24  ;;  %v4310_v46 = vpop.f32.mrb[38].mxu0  ;;  %v2481_v57 = vunpack.c.l.bf16 %v2465_v11  ;;  %v4322_v24 = vmul.f32 %v3977_v43, %v2487_v23  ;;  %v1856_v45 = vunpack.c.l.bf16 %v1840_v34  ;;  %v971_v32 = vmax.f32 %v891_v51, 0.0 }
 0x125   :  { %v4316_v10 = vpop.f32.mrb[39].mxu0  ;;  %5778 = vst [vmem:[#allocation50_spill] sm:$0xff] %v4319_v35  ;;  %1492 = vst.msk [vmem:[#allocation2 + $0x198] sm:$0xf] %vm39_vm5, %v3317_v7  ;;  %v4329_v47 = vmul.f32 %v3977_v43, %v2490_v52  ;;  %v2488_v11 = vunpack.c.l.bf16 %v2472_v21  ;;  %v4331_v62 = vld [vmem:[#allocation2 + $0x50] sm:$0xf]  ;;  %v4334_v31 = vmul.f32 %v3967_v8, %v2100_v61  ;;  %v4337_v23 = vmul.f32 %v3970_v36, %v2100_v61 }
 0x126   :  { %5779 = vst [vmem:[#allocation51_spill] sm:$0xff] %v4322_v24  ;;  %v969_v17 = vmax.f32 %v883_v28, 0.0  ;;  %v4339_v34 = vld [vmem:[#allocation2 + $0x50] sm:$0xf]  ;;  %v3322_v7 = vpack.c.bf16 %v971_v32, %v971_v32  ;;  %v972_v51 = vmax.f32 %v894_v18, 0.0  ;;  %v4342_v19 = vmul.f32 %v3886_v63, %v1849_v29 }
 0x127   :  { %5780 = vst [vmem:[#allocation52_spill] sm:$0xff] %v4329_v47  ;;  %5781 = vst [vmem:[#allocation53_spill] sm:$0xff] %v4334_v31  ;;  %v4345_v52 = vmul.f32 %v3977_v43, %v2481_v57  ;;  %v747_v28 = vadd.f32 %v4077_v15, %v3856_v33  ;;  %v4353_v61 = vmul.f32 %v3886_v63, %v1856_v45  ;;  %v1719_v16 = vld [vmem:[#allocation2 + $0x13c] sm:$0x1]  ;;  %v4367_v45 = vld [vmem:[%s5644_s2] ss:$0 sm:$0xff] }
 0x128   :  { %5782 = vst [vmem:[#allocation54_spill] sm:$0xff] %v4337_v23  ;;  %v3320_v21 = vpack.c.bf16 %v969_v17, %v969_v17  ;;  %v1576_v18 = vshrl.u32 %v3322_v7, 16  ;;  %v4359_v29 = vmul.f32 %v3977_v43, %v2488_v11  ;;  %v1579_v17 = vshll.u32 %v3322_v7, 16  ;;  %v1704_v7 = vld [vmem:[#allocation2 + $0x128] sm:$0xf] }
 0x129   :  { %5783 = vst [vmem:[#allocation55_spill] sm:$0xff] %v4345_v52  ;;  %v4349_v47 = vpop.f32.mrb[40].mxu0  ;;  %v3323_v35 = vpack.c.bf16 %v972_v51, %v972_v51  ;;  %v886_v32 = vadd.f32 %v4367_v45, %v4015_v2  ;;  %v935_v55 = vmax.f32 %v747_v28, 0.0  ;;  %v4377_v51 = vadd.f32 %v4367_v45, %v4040_v56  ;;  %v1707_v53 = vld [vmem:[#allocation2 + $0x12c] sm:$0x1] }
 0x12a   :  { %5784 = vst [vmem:[#allocation56_spill] sm:$0xff] %v4349_v47  ;;  %v4356_v23 = vpop.f32.mrb[41].mxu0  ;;  %5786 = vst [vmem:[#allocation58_spill] sm:$0xff] %v4359_v29  ;;  %v1560_v52 = vshrl.u32 %v3320_v21, 16  ;;  %v1578_v15 = vrot.slane %v1576_v18, 7  ;;  %v1563_v24 = vshll.u32 %v3320_v21, 16  ;;  %v739_v18 = vadd.f32 %v4367_v45, %v4088_v54 }
 0x12b   :  { %5785 = vst [vmem:[#allocation57_spill] sm:$0xff] %v4356_v23  ;;  %v4362_v33 = vpop.f32.mrb[42].mxu0  ;;  %v1716_v29 = vld [vmem:[#allocation2 + $0x138] sm:$0xf]  ;;  %v1845_v21 = vld [vmem:[#allocation2 + $0x1a0] sm:$0xf]  ;;  %v750_v2 = vadd.f32 %v4367_v45, %v4101_v0  ;;  %v742_v13 = vadd.f32 %v4367_v45, %v4107_v50  ;;  %v3286_v36 = vpack.c.bf16 %v935_v55, %v935_v55  ;;  %v899_v0 = vadd.f32 %v4367_v45, %v4047_v6 }
 0x12c   :  { %5787 = vst [vmem:[#allocation59_spill] sm:$0xff] %v4362_v33  ;;  %v4371_v11 = vpop.f32.mrb[43].mxu0  ;;  %v1562_v57 = vrot.slane %v1560_v52, 7  ;;  %v1581_v3 = vor.u32 %v1579_v17, %v1578_v15  ;;  %v1582_v31 = vrot.slane %v1578_v15, 4  ;;  %v1834_v52 = vld [vmem:[#allocation2 + $0x68] sm:$0xf] }
 0x12d   :  { %5788 = vst [vmem:[#allocation60_spill] sm:$0xff] %v4371_v11  ;;  %v1584_v25 = vshrl.u32 %v3323_v35, 16  ;;  %v1587_v26 = vshll.u32 %v3323_v35, 16  ;;  %v2466_v54 = vld [vmem:[#allocation2 + $0x68] sm:$0xf]  ;;  %v1850_v11 = vunpack.c.l.bf16 %v1834_v52  ;;  %v933_v6 = vmax.f32 %v739_v18, 0.0 }
 0x12e   :  { %v1565_v9 = vor.u32 %v1563_v24, %v1562_v57  ;;  %v1566_v28 = vrot.slane %v1562_v57, 4  ;;  %v1717_v56 = vsel %vm3926_vm7, %v1581_v3, %v1716_v29  ;;  %v1720_v17 = vsel %vm3663_vm4, %v1582_v31, %v1719_v16  ;;  %v1722_v15 = vld [vmem:[#allocation2 + $0x140] sm:$0xf]  ;;  %v1843_v8 = vld [vmem:[#allocation2 + $0x190] sm:$0xf] }
 0x12f   :  { %1718 = vst [vmem:[#allocation2 + $0x138] sm:$0xf] %v1717_v56  ;;  %1721 = vst [vmem:[#allocation2 + $0x13c] sm:$0x1] %v1720_v17  ;;  %v1586_v24 = vrot.slane %v1584_v25, 7  ;;  %v970_v3 = vmax.f32 %v886_v32, 0.0  ;;  %v1861_v29 = vunpack.c.l.bf16 %v1845_v21  ;;  %v2482_v56 = vunpack.c.l.bf16 %v2466_v54 }
 0x130   :  { %v1705_v50 = vsel %vm3926_vm7, %v1565_v9, %v1704_v7  ;;  %v1708_v35 = vsel %vm3663_vm4, %v1566_v28, %v1707_v53  ;;  %v1725_v57 = vld [vmem:[#allocation2 + $0x144] sm:$0x1]  ;;  %v1832_v16 = vld [vmem:[#allocation2 + $0x58] sm:$0xf]  ;;  %1485 = vst.msk [vmem:[#allocation2 + $0x80] sm:$0xf] %vm39_vm5, %v3286_v36  ;;  %v1859_v7 = vunpack.c.l.bf16 %v1843_v8  ;;  %v3284_v53 = vpack.c.bf16 %v933_v6, %v933_v6 }
 0x131   :  { %v2464_v31 = vld [vmem:[#allocation2 + $0x58] sm:$0xf]  ;;  %1706 = vst [vmem:[#allocation2 + $0x128] sm:$0xf] %v1705_v50  ;;  %1709 = vst [vmem:[#allocation2 + $0x12c] sm:$0x1] %v1708_v35  ;;  %v1589_v17 = vor.u32 %v1587_v26, %v1586_v24  ;;  %v4401_v18 = vpack.c.bf16 %v970_v3, %v970_v3  ;;  %v5790_v26 = vunpack.c.l.bf16 %v4331_v62  ;;  %v1848_v28 = vunpack.c.l.bf16 %v1832_v16 }
 0x132   :  { %v936_v55 = vmax.f32 %v750_v2, 0.0  ;;  %v1590_v33 = vrot.slane %v1586_v24, 4  ;;  %v934_v9 = vmax.f32 %v742_v13, 0.0  ;;  %v4394_v23 = vld [vmem:[#allocation2 + $0x190] sm:$0xf]  ;;  %v975_v25 = vmax.f32 %v4377_v51, 0.0 }
 0x133   :  { %5789 = vst [vmem:[#allocation61_spill] sm:$0xff] %v4394_v23  ;;  %v1844_v21 = vld [vmem:[#allocation2 + $0x198] sm:$0xf]  ;;  %v1723_v52 = vsel %vm3926_vm7, %v1589_v17, %v1722_v15  ;;  %v973_v2 = vmax.f32 %v899_v0, 0.0  ;;  %v4406_v8 = vmul.f32 %v3886_v63, %v5790_v26  ;;  %v5791_v13 = vunpack.c.l.bf16 %v4339_v34  ;;  %1483 = vst.msk [vmem:[#allocation2 + $0x70] sm:$0xf] %vm39_vm5, %v3284_v53 }
 0x134   :  { %v3287_v32 = vpack.c.bf16 %v936_v55, %v936_v55  ;;  %v1726_v36 = vsel %vm3663_vm4, %v1590_v33, %v1725_v57  ;;  %v2480_v54 = vunpack.c.l.bf16 %v2464_v31  ;;  %1724 = vst [vmem:[#allocation2 + $0x140] sm:$0xf] %v1723_v52  ;;  %v4416_v33 = vmul.f32 %v3886_v63, %v1861_v29  ;;  %v4428_v24 = vld [vmem:[#allocation2 + $0x198] sm:$0xf] }
 0x135   :  { %v4411_v51 = vmul.f32 %v3977_v43, %v5791_v13  ;;  %1727 = vst [vmem:[#allocation2 + $0x144] sm:$0x1] %v1726_v36  ;;  %v4419_v62 = vmul.f32 %v3886_v63, %v1850_v11  ;;  %v3285_v34 = vpack.c.bf16 %v934_v9, %v934_v9  ;;  %v4423_v0 = vmul.f32 %v3977_v43, %v2482_v56 }
 0x136   :  { %1486 = vst.msk [vmem:[#allocation2 + $0x88] sm:$0xf] %vm39_vm5, %v3287_v32  ;;  %5793 = vst [vmem:[#allocation63_spill] sm:$0xff] %v4416_v33  ;;  %v4426_v50 = vmul.f32 %v3886_v63, %v1859_v7  ;;  %v1860_v35 = vunpack.c.l.bf16 %v1844_v21  ;;  %v1772_v57 = vld [vmem:[#allocation2 + $0x138] sm:$0xf]  ;;  %v4430_v16 = vpack.c.bf16 %v975_v25, %v975_v25  ;;  %v1568_v55 = vshrl.u32 %v4401_v18, 16 }
 0x137   :  { %5792 = vst [vmem:[#allocation62_spill] sm:$0xff] %v4411_v51  ;;  %5794 = vst [vmem:[#allocation64_spill] sm:$0xff] %v4423_v0  ;;  %v1909_v3 = vld [vmem:[#allocation2 + $0x13c] sm:$0x1]  ;;  %v1788_v29 = vunpack.c.l.bf16 %v1772_v57  ;;  %v4433_v17 = vpack.c.bf16 %v973_v2, %v973_v2  ;;  %v4437_v56 = vmul.f32 %v3886_v63, %v1848_v28  ;;  %v4440_v9 = vmul.f32 %v3977_v43, %v2480_v54  ;;  %v5799_v0 = vld [vmem:[#allocation21_spill] sm:$0xff] }
 0x138   :  { %5795 = vst [vmem:[#allocation65_spill] sm:$0xff] %v4426_v50  ;;  %5796 = vst [vmem:[#allocation66_spill] sm:$0xff] %v4428_v24  ;;  %v1925_v31 = vunpack.c.l.bf16 %v1909_v3  ;;  %v1770_v11 = vld [vmem:[#allocation2 + $0x128] sm:$0xf]  ;;  %v1907_v6 = vld [vmem:[#allocation2 + $0x12c] sm:$0x1]  ;;  %v4447_v2 = vmul.f32 %v3886_v63, %v1860_v35 }
 0x139   :  { %1484 = vst.msk [vmem:[#allocation2 + $0x78] sm:$0xf] %vm39_vm5, %v3285_v34  ;;  %5797 = vst [vmem:[#allocation67_spill] sm:$0xff] %v4440_v9  ;;  %v2541_v7 = vld [vmem:[#allocation2 + $0x13c] sm:$0x1]  ;;  %v1786_v53 = vunpack.c.l.bf16 %v1770_v11  ;;  %v1923_v25 = vunpack.c.l.bf16 %v1907_v6  ;;  %v1808_v21 = vmul.f32 %v3869_v38, %v1788_v29  ;;  %v1956_v52 = vmul.f32 %v3876_v48, %v1788_v29  ;;  %v5802_v33 = vld [vmem:[#allocation31_spill] sm:$0xff] }
 0x13a   :  { %v1957_v36 = vmul.f32 %v3876_v48, %v1925_v31  ;;  %5798 = vst [vmem:[#allocation68_spill] sm:$0xff] %v4447_v2  ;;  %v2403_v26 = vld [vmem:[#allocation2 + $0x128] sm:$0xf]  ;;  %v1571_v13 = vshll.u32 %v4401_v18, 16  ;;  %v1608_v28 = vshrl.u32 %v4430_v16, 16  ;;  %v1611_v54 = vshll.u32 %v4430_v16, 16 }
 0x13b   :  { %v2405_v34 = vld [vmem:[#allocation2 + $0x138] sm:$0xf]  ;;  %v2557_v57 = vunpack.c.l.bf16 %v2541_v7  ;;  %v1806_v3 = vmul.f32 %v3869_v38, %v1786_v53  ;;  %v1570_v11 = vrot.slane %v1568_v55, 7  ;;  %v1592_v6 = vshrl.u32 %v4433_v17, 16  ;;  %v4457_v29 = vld [vmem:[%s5646_s4] ss:$0 sm:$0xff] }
 0x13c   :  { %v1824_v35 = vadd.f32 %v4457_v29, %v1808_v21  ;;  %v1952_v18 = vmul.f32 %v3876_v48, %v1786_v53  ;;  %v1953_v31 = vmul.f32 %v3876_v48, %v1923_v25  ;;  %v1595_v16 = vshll.u32 %v4433_v17, 16  ;;  %v4468_v9 = vld [vmem:[%s5645_s3 + $0x8] ss:$0 sm:$0xff]  ;;  %v2539_v24 = vld [vmem:[#allocation2 + $0x12c] sm:$0x1]  ;;  %v5804_v50 = vld [vmem:[#allocation10_spill] sm:$0xff] }
 0x13d   :  { %v2032_v32 = vrot.slane %v1956_v52, 1  ;;  %v2033_v7 = vrot.slane %v1957_v36, 1  ;;  %v2419_v15 = vunpack.c.l.bf16 %v2403_v26  ;;  %v910_v55 = vadd.f32 %v4367_v45, %v5799_v0  ;;  %v5800_v21 = vld [vmem:[#allocation24_spill] sm:$0xff]  ;;  %v1773_v36 = vld [vmem:[#allocation2 + $0x140] sm:$0xf] }
 0x13e   :  { %v2421_v51 = vunpack.c.l.bf16 %v2405_v34  ;;  %v4472_v53 = vadd.f32 %v4367_v45, %v5800_v21  ;;  %v4476_v17 = vadd.f32 %v4367_v45, %v4137_v39  ;;  %v4480_v25 = vadd.f32 %v4367_v45, %v4146_v40  ;;  %v1710_v43 = vld [vmem:[#allocation2 + $0x130] sm:$0xf] }
 0x13f   :  { %v4483_v0 = vmul.f32 %v4468_v9, %v2557_v57  ;;  %v1822_v52 = vadd.f32 %v4457_v29, %v1806_v3  ;;  %v1573_v26 = vor.u32 %v1571_v13, %v1570_v11  ;;  %v4488_v34 = vadd.f32 %v4367_v45, %v4153_v12  ;;  %v1713_v13 = vld [vmem:[#allocation2 + $0x134] sm:$0x1] }
 0x140   :  { %v1893_v21 = vadd.f32 %v4296_v59, %v1824_v35  ;;  %v2026_v23 = vrot.slane %v1952_v18, 1  ;;  %v2027_v39 = vrot.slane %v1953_v31, 1  ;;  %v4493_v40 = vadd.f32 %v4367_v45, %v5802_v33  ;;  %v1910_v33 = vld [vmem:[#allocation2 + $0x144] sm:$0x1] }
 0x141   :  { %5801 = vst [vmem:[#allocation21_spill] sm:$0xff] %v4483_v0  ;;  %v2034_v57 = vsel %vm1998_vm8, %v2032_v32, %v2033_v7  ;;  %v2555_v2 = vunpack.c.l.bf16 %v2539_v24  ;;  %v4497_v3 = vmul.f32 %v4468_v9, %v2419_v15  ;;  %v4501_v12 = vadd.f32 %v4367_v45, %v4187_v1  ;;  %v1743_v0 = vld [vmem:[#allocation2 + $0x15c] sm:$0x1] }
 0x142   :  { %v4504_v59 = vmul.f32 %v5804_v50, %v2421_v51  ;;  %v4507_v35 = vmul.f32 %v4468_v9, %v2421_v51  ;;  %v1789_v18 = vunpack.c.l.bf16 %v1773_v36  ;;  %v1574_v31 = vrot.slane %v1570_v11, 4  ;;  %v1740_v11 = vld [vmem:[#allocation2 + $0x158] sm:$0xf] }
 0x143   :  { %5803 = vst [vmem:[#allocation24_spill] sm:$0xff] %v4497_v3  ;;  %v1891_v24 = vadd.f32 %v4305_v20, %v1822_v52  ;;  %v4512_v7 = vmul.f32 %v5804_v50, %v2419_v15  ;;  %v1711_v1 = vsel %vm3926_vm7, %v1573_v26, %v1710_v43  ;;  %v4516_v47 = vadd.f32 %v2034_v57, %v1893_v21  ;;  %v2542_v52 = vld [vmem:[#allocation2 + $0x144] sm:$0x1]  ;;  %v1731_v57 = vld [vmem:[#allocation2 + $0x14c] sm:$0x1] }
 0x144   :  { %5805 = vst [vmem:[#allocation31_spill] sm:$0xff] %v4504_v59  ;;  %5806 = vst [vmem:[#allocation10_spill] sm:$0xff] %v4507_v35  ;;  %v2028_v59 = vsel %vm1998_vm8, %v2026_v23, %v2027_v39  ;;  %v1714_v51 = vsel %vm3663_vm4, %v1574_v31, %v1713_v13  ;;  %v1610_v36 = vrot.slane %v1608_v28, 7  ;;  %v4522_v32 = vmul.f32 %v4468_v9, %v2555_v2  ;;  %v1728_v39 = vld [vmem:[#allocation2 + $0x148] sm:$0xf] }
 0x145   :  { %5807 = vst [vmem:[#allocation69_spill] sm:$0xff] %v4512_v7  ;;  %5808 = vst [vmem:[#allocation70_spill] sm:$0xff] %v4516_v47  ;;  %v1926_v15 = vunpack.c.l.bf16 %v1910_v33  ;;  %v1594_v43 = vrot.slane %v1592_v6, 7  ;;  %v1809_v26 = vmul.f32 %v3869_v38, %v1789_v18  ;;  %v4527_v28 = vmul.f32 %v3876_v48, %v1789_v18  ;;  %v1837_v13 = vld [vmem:[#allocation2 + $0x80] sm:$0xf] }
 0x146   :  { %1712 = vst [vmem:[#allocation2 + $0x130] sm:$0xf] %v1711_v1  ;;  %5809 = vst [vmem:[#allocation71_spill] sm:$0xff] %v4522_v32  ;;  %v1613_v21 = vor.u32 %v1611_v54, %v1610_v36  ;;  %v1614_v23 = vrot.slane %v1610_v36, 4  ;;  %v976_v1 = vmax.f32 %v910_v55, 0.0  ;;  %v974_v20 = vmax.f32 %v4472_v53, 0.0 }
 0x147   :  { %1715 = vst [vmem:[#allocation2 + $0x134] sm:$0x1] %v1714_v51  ;;  %v1597_v2 = vor.u32 %v1595_v16, %v1594_v43  ;;  %v1598_v31 = vrot.slane %v1594_v43, 4  ;;  %v4530_v33 = vld [vmem:[#allocation2 + $0x140] sm:$0xf]  ;;  %v2558_v51 = vunpack.c.l.bf16 %v2542_v52  ;;  %v4542_v52 = vmul.f32 %v3876_v48, %v1926_v15 }
 0x148   :  { %5810 = vst [vmem:[#allocation72_spill] sm:$0xff] %v4530_v33  ;;  %v1741_v6 = vsel %vm3926_vm7, %v1613_v21, %v1740_v11  ;;  %v1744_v54 = vsel %vm3663_vm4, %v1614_v23, %v1743_v0  ;;  %v3327_v36 = vpack.c.bf16 %v976_v1, %v976_v1  ;;  %v1835_v3 = vld [vmem:[#allocation2 + $0x70] sm:$0xf]  ;;  %v3325_v18 = vpack.c.bf16 %v974_v20, %v974_v20  ;;  %v1836_v0 = vld [vmem:[#allocation2 + $0x78] sm:$0xf] }
 0x149   :  { %1742 = vst [vmem:[#allocation2 + $0x158] sm:$0xf] %v1741_v6  ;;  %1745 = vst [vmem:[#allocation2 + $0x15c] sm:$0x1] %v1744_v54  ;;  %v1729_v16 = vsel %vm3926_vm7, %v1597_v2, %v1728_v39  ;;  %v1732_v53 = vsel %vm3663_vm4, %v1598_v31, %v1731_v57  ;;  %v1853_v11 = vunpack.c.l.bf16 %v1837_v13  ;;  %v939_v21 = vmax.f32 %v4476_v17, 0.0 }
 0x14a   :  { %1730 = vst [vmem:[#allocation2 + $0x148] sm:$0xf] %v1729_v16  ;;  %1733 = vst [vmem:[#allocation2 + $0x14c] sm:$0x1] %v1732_v53  ;;  %v1616_v43 = vshrl.u32 %v3327_v36, 16  ;;  %v4545_v23 = vadd.f32 %v2028_v59, %v1891_v24  ;;  %v1619_v2 = vshll.u32 %v3327_v36, 16  ;;  %v4549_v20 = vadd.f32 %v4457_v29, %v1809_v26 }
 0x14b   :  { %v1600_v54 = vshrl.u32 %v3325_v18, 16  ;;  %v4552_v15 = vmul.f32 %v4468_v9, %v2558_v51  ;;  %v1851_v13 = vunpack.c.l.bf16 %v1835_v3  ;;  %v4555_v55 = vld [vmem:[#allocation2 + $0x70] sm:$0xf]  ;;  %v4559_v1 = vmul.f32 %v3886_v63, %v1853_v11  ;;  %v1746_v35 = vld [vmem:[#allocation2 + $0x160] sm:$0xf] }
 0x14c   :  { %5811 = vst [vmem:[#allocation73_spill] sm:$0xff] %v4545_v23  ;;  %v1618_v31 = vrot.slane %v1616_v43, 7  ;;  %5813 = vst [vmem:[#allocation75_spill] sm:$0xff] %v4555_v55  ;;  %v1852_v26 = vunpack.c.l.bf16 %v1836_v0  ;;  %v3290_v32 = vpack.c.bf16 %v939_v21, %v939_v21  ;;  %v1603_v3 = vshll.u32 %v3325_v18, 16  ;;  %v4567_v36 = vld [vmem:[#allocation2 + $0x78] sm:$0xf] }
 0x14d   :  { %v1771_v6 = vld [vmem:[#allocation2 + $0x130] sm:$0xf]  ;;  %5812 = vst [vmem:[#allocation74_spill] sm:$0xff] %v4552_v15  ;;  %5814 = vst [vmem:[#allocation76_spill] sm:$0xff] %v4559_v1  ;;  %v1602_v7 = vrot.slane %v1600_v54, 7  ;;  %v937_v43 = vmax.f32 %v4480_v25, 0.0  ;;  %v4600_v47 = vadd.f32 %v4367_v45, %v4199_v42 }
 0x14e   :  { %v2404_v39 = vld [vmem:[#allocation2 + $0x130] sm:$0xf]  ;;  %v1908_v57 = vld [vmem:[#allocation2 + $0x134] sm:$0x1]  ;;  %v1787_v17 = vunpack.c.l.bf16 %v1771_v6  ;;  %v1621_v51 = vor.u32 %v1619_v2, %v1618_v31  ;;  %5815 = vst [vmem:[#allocation77_spill] sm:$0xff] %v4567_v36  ;;  %v1622_v18 = vrot.slane %v1618_v31, 4 }
 0x14f   :  { %v1924_v59 = vunpack.c.l.bf16 %v1908_v57  ;;  %v2420_v24 = vunpack.c.l.bf16 %v2404_v39  ;;  %v2540_v53 = vld [vmem:[#allocation2 + $0x134] sm:$0x1]  ;;  %v4564_v39 = vmul.f32 %v3886_v63, %v1851_v13  ;;  %v1749_v54 = vld [vmem:[#allocation2 + $0x164] sm:$0x1]  ;;  %v1512_v13 = vshrl.u32 %v3290_v32, 16 }
 0x150   :  { %v2556_v57 = vunpack.c.l.bf16 %v2540_v53  ;;  %v1807_v11 = vmul.f32 %v3869_v38, %v1787_v17  ;;  %v4571_v0 = vmul.f32 %v3876_v48, %v1787_v17  ;;  %v1747_v2 = vsel %vm3926_vm7, %v1621_v51, %v1746_v35  ;;  %v4582_v6 = vld [vmem:[#allocation2 + $0x158] sm:$0xf]  ;;  %v4584_v16 = vld [vmem:[#allocation2 + $0x15c] sm:$0x1]  ;;  %v1737_v42 = vld [vmem:[#allocation2 + $0x154] sm:$0x1] }
 0x151   :  { %v4574_v21 = vmul.f32 %v3876_v48, %v1924_v59  ;;  %v4577_v25 = vmul.f32 %v4468_v9, %v2420_v24  ;;  %v940_v53 = vmax.f32 %v4488_v34, 0.0  ;;  %v4586_v17 = vld [vmem:[#allocation2 + $0x148] sm:$0xf]  ;;  %v4589_v59 = vmul.f32 %v3886_v63, %v1852_v26  ;;  %1748 = vst [vmem:[#allocation2 + $0x160] sm:$0xf] %v1747_v2 }
 0x152   :  { %v1605_v31 = vor.u32 %v1603_v3, %v1602_v7  ;;  %v3288_v55 = vpack.c.bf16 %v937_v43, %v937_v43  ;;  %v4593_v35 = vmul.f32 %v5804_v50, %v2420_v24  ;;  %v4596_v51 = vmul.f32 %v4468_v9, %v2556_v57  ;;  %v1734_v34 = vld [vmem:[#allocation2 + $0x150] sm:$0xf]  ;;  %v96_v43 = vld [vmem:[#allocation2 + $0x38] sm:$0x1]  ;;  %v1671_v24 = vld [vmem:[#allocation2 + $0x1c] sm:$0x1] }
 0x153   :  { %5816 = vst [vmem:[#allocation78_spill] sm:$0xff] %v4577_v25  ;;  %v1515_v33 = vshll.u32 %v3290_v32, 16  ;;  %v1823_v26 = vadd.f32 %v4457_v29, %v1807_v11  ;;  %v1929_v57 = vunpack.c.l.bf16 %v4584_v16  ;;  %v1750_v32 = vsel %vm3663_vm4, %v1622_v18, %v1749_v54  ;;  %v1668_v36 = vld [vmem:[#allocation2 + $0x18] sm:$0xf]  ;;  %v1656_v1 = vld [vmem:[#allocation2 + $0x8] sm:$0xf] }
 0x154   :  { %5817 = vst [vmem:[#allocation79_spill] sm:$0xff] %v4593_v35  ;;  %5818 = vst [vmem:[#allocation80_spill] sm:$0xff] %v4596_v51  ;;  %v4611_v35 = vld [vmem:[#allocation2 + $0x14c] sm:$0x1]  ;;  %v1606_v11 = vrot.slane %v1602_v7, 4  ;;  %v1735_v23 = vsel %vm3926_vm7, %v1605_v31, %v1734_v34  ;;  %v1514_v3 = vrot.slane %v1512_v13, 7  ;;  %v3291_v16 = vpack.c.bf16 %v940_v53, %v940_v53 }
 0x155   :  { %1751 = vst [vmem:[#allocation2 + $0x164] sm:$0x1] %v1750_v32  ;;  %v1496_v2 = vshrl.u32 %v3288_v55, 16  ;;  %1736 = vst [vmem:[#allocation2 + $0x150] sm:$0xf] %v1735_v23  ;;  %v1499_v25 = vshll.u32 %v3288_v55, 16  ;;  %v1927_v13 = vunpack.c.l.bf16 %v4611_v35 }
 0x156   :  { %v938_v15 = vmax.f32 %v4493_v40, 0.0  ;;  %v97_v18 = vsel %vm3663_vm4, 0, %v96_v43  ;;  %v1738_v54 = vsel %vm3663_vm4, %v1606_v11, %v1737_v42  ;;  %v1517_v63 = vor.u32 %v1515_v33, %v1514_v3  ;;  %v1659_v23 = vld [vmem:[#allocation2 + $0xc] sm:$0x1]  ;;  %v90_v40 = vld [vmem:[#allocation2 + $0x28] sm:$0x1] }
 0x157   :  { %v1518_v32 = vrot.slane %v1514_v3, 4  ;;  %v1498_v7 = vrot.slane %v1496_v2, 7  ;;  %98 = vst [vmem:[#allocation2 + $0x38] sm:$0x1] %v97_v18  ;;  %1739 = vst [vmem:[#allocation2 + $0x154] sm:$0x1] %v1738_v54 }
 0x158   :  { %v1520_v31 = vshrl.u32 %v3291_v16, 16  ;;  %v3289_v55 = vpack.c.bf16 %v938_v15, %v938_v15  ;;  %v943_v53 = vmax.f32 %v4501_v12, 0.0  ;;  %v1669_v34 = vsel %vm3926_vm7, %v1517_v63, %v1668_v36  ;;  %v99_v18 = vld [vmem:[#allocation2 + $0x40] sm:$0x1]  ;;  %v1677_v63 = vld [vmem:[#allocation2 + $0x24] sm:$0x1] }
 0x159   :  { %v1672_v43 = vsel %vm3663_vm4, %v1518_v32, %v1671_v24  ;;  %v1501_v33 = vor.u32 %v1499_v25, %v1498_v7  ;;  %v1502_v3 = vrot.slane %v1498_v7, 4  ;;  %1670 = vst [vmem:[#allocation2 + $0x18] sm:$0xf] %v1669_v34  ;;  %v1523_v42 = vshll.u32 %v3291_v16, 16  ;;  %v1674_v54 = vld [vmem:[#allocation2 + $0x20] sm:$0xf] }
 0x15a   :  { %1673 = vst [vmem:[#allocation2 + $0x1c] sm:$0x1] %v1672_v43  ;;  %v1522_v2 = vrot.slane %v1520_v31, 7  ;;  %v1504_v35 = vshrl.u32 %v3289_v55, 16  ;;  %v3294_v11 = vpack.c.bf16 %v943_v53, %v943_v53  ;;  %v1507_v36 = vshll.u32 %v3289_v55, 16 }
 0x15b   :  { %v1657_v15 = vsel %vm3926_vm7, %v1501_v33, %v1656_v1  ;;  %v1660_v12 = vsel %vm3663_vm4, %v1502_v3, %v1659_v23  ;;  %v91_v25 = vsel %vm3663_vm4, 0, %v90_v40  ;;  %v1892_v31 = vadd.f32 %v4353_v61, %v1823_v26  ;;  %v1662_v26 = vld [vmem:[#allocation2 + $0x10] sm:$0xf]  ;;  %v1665_v33 = vld [vmem:[#allocation2 + $0x14] sm:$0x1] }
 0x15c   :  { %1658 = vst [vmem:[#allocation2 + $0x8] sm:$0xf] %v1657_v15  ;;  %1661 = vst [vmem:[#allocation2 + $0xc] sm:$0x1] %v1660_v12  ;;  %v1525_v24 = vor.u32 %v1523_v42, %v1522_v2  ;;  %v1526_v32 = vrot.slane %v1522_v2, 4  ;;  %v1506_v16 = vrot.slane %v1504_v35, 7  ;;  %v5819_v53 = vunpack.c.l.bf16 %v4582_v6 }
 0x15d   :  { %v1544_v7 = vshrl.u32 %v3294_v11, 16  ;;  %92 = vst [vmem:[#allocation2 + $0x28] sm:$0x1] %v91_v25  ;;  %v100_v55 = vsel %vm3663_vm4, 0, %v99_v18  ;;  %v4642_v40 = vmul.f32 %v3876_v48, %v1929_v57  ;;  %v5822_v3 = vrot.slane %v4574_v21, 1 }
 0x15e   :  { %v4637_v23 = vmul.f32 %v3876_v48, %v5819_v53  ;;  %v1675_v34 = vsel %vm3926_vm7, %v1525_v24, %v1674_v54  ;;  %v1678_v43 = vsel %vm3663_vm4, %v1526_v32, %v1677_v63  ;;  %v1509_v61 = vor.u32 %v1507_v36, %v1506_v16  ;;  %101 = vst [vmem:[#allocation2 + $0x40] sm:$0x1] %v100_v55  ;;  %v4653_v35 = vld [vmem:[#allocation2 + $0x148] sm:$0xf]  ;;  %v4673_v24 = vld [vmem:[#allocation2 + $0x14c] sm:$0x1] }
 0x15f   :  { %5821 = vst [vmem:[#allocation82_spill] sm:$0xff] %v4642_v40  ;;  %v5823_v2 = vrot.slane %v4571_v0, 1  ;;  %5824 = vst [vmem:[#allocation83_spill] sm:$0xff] %v4653_v35  ;;  %v1510_v57 = vrot.slane %v1506_v16, 4  ;;  %v4655_v18 = vrot.slane %v1544_v7, 7  ;;  %v1547_v15 = vshll.u32 %v3294_v11, 16 }
 0x160   :  { %5820 = vst [vmem:[#allocation81_spill] sm:$0xff] %v4637_v23  ;;  %1676 = vst [vmem:[#allocation2 + $0x20] sm:$0xf] %v1675_v34  ;;  %v5825_v12 = vmov %v5819_v53  ;;  %v5826_v63 = vunpack.c.l.bf16 %v4586_v17  ;;  %v4671_v25 = vmul.f32 %v3876_v48, %v1927_v13  ;;  %v1775_v11 = vld [vmem:[#allocation2 + $0x150] sm:$0xf]  ;;  %v1663_v7 = vsel %vm3926_vm7, %v1509_v61, %v1662_v26 }
 0x161   :  { %v2031_v42 = vsel %vm1998_vm8, %v5823_v2, %v5822_v3  ;;  %1679 = vst [vmem:[#allocation2 + $0x24] sm:$0x1] %v1678_v43  ;;  %v4660_v54 = vmul.f32 %v3869_v38, %v5825_v12  ;;  %5828 = vst [vmem:[#allocation84_spill] sm:$0xff] %v4673_v24  ;;  %v1692_v32 = vld [vmem:[#allocation2 + $0x38] sm:$0xf]  ;;  %v1666_v53 = vsel %vm3663_vm4, %v1510_v57, %v1665_v33  ;;  %v941_v55 = vmax.f32 %v4600_v47, 0.0 }
 0x162   :  { %v1810_v21 = vmul.f32 %v3869_v38, %v5826_v63  ;;  %v5827_v0 = vmov %v5826_v63  ;;  %v1764_v6 = vld [vmem:[#allocation2 + $0x18] sm:$0xf]  ;;  %v1901_v16 = vld [vmem:[#allocation2 + $0x1c] sm:$0x1]  ;;  %v1549_v17 = vor.u32 %v1547_v15, %v4655_v18  ;;  %v4681_v34 = vadd.f32 %v2031_v42, %v1892_v31  ;;  %v1912_v3 = vld [vmem:[#allocation2 + $0x154] sm:$0x1] }
 0x163   :  { %v4668_v36 = vmul.f32 %v3876_v48, %v5827_v0  ;;  %v1780_v2 = vunpack.c.l.bf16 %v1764_v6  ;;  %1664 = vst [vmem:[#allocation2 + $0x10] sm:$0xf] %v1663_v7  ;;  %1667 = vst [vmem:[#allocation2 + $0x14] sm:$0x1] %v1666_v53  ;;  %v1791_v61 = vunpack.c.l.bf16 %v1775_v11  ;;  %v1917_v26 = vunpack.c.l.bf16 %v1901_v16  ;;  %v1762_v63 = vld [vmem:[#allocation2 + $0x8] sm:$0xf] }
 0x164   :  { %5829 = vst [vmem:[#allocation85_spill] sm:$0xff] %v4681_v34  ;;  %v1899_v33 = vld [vmem:[#allocation2 + $0xc] sm:$0x1]  ;;  %v1693_v57 = vsel %vm3926_vm7, %v1549_v17, %v1692_v32  ;;  %v4689_v47 = vadd.f32 %v4457_v29, %v1810_v21  ;;  %v2533_v15 = vld [vmem:[#allocation2 + $0x1c] sm:$0x1]  ;;  %v1778_v0 = vunpack.c.l.bf16 %v1762_v63  ;;  %v1928_v7 = vunpack.c.l.bf16 %v1912_v3 }
 0x165   :  { %1694 = vst [vmem:[#allocation2 + $0x38] sm:$0xf] %v1693_v57  ;;  %v1800_v11 = vmul.f32 %v3869_v38, %v1780_v2  ;;  %v4695_v16 = vpack.c.bf16 %v941_v55, %v941_v55  ;;  %v4697_v53 = vld [vmem:[#allocation2 + $0x154] sm:$0x1]  ;;  %v1940_v32 = vmul.f32 %v3876_v48, %v1780_v2  ;;  %v1941_v21 = vmul.f32 %v3876_v48, %v1917_v26  ;;  %v2397_v17 = vld [vmem:[#allocation2 + $0x18] sm:$0xf] }
 0x166   :  { %5830 = vst [vmem:[#allocation86_spill] sm:$0xff] %v4697_v53  ;;  %v1915_v1 = vunpack.c.l.bf16 %v1899_v33  ;;  %v4703_v42 = vadd.f32 %v4367_v45, %v4201_v5  ;;  %v1811_v63 = vmul.f32 %v3869_v38, %v1791_v61  ;;  %v2549_v57 = vunpack.c.l.bf16 %v2533_v15  ;;  %v2395_v12 = vld [vmem:[#allocation2 + $0x8] sm:$0xf]  ;;  %v2531_v53 = vld [vmem:[#allocation2 + $0xc] sm:$0x1] }
 0x167   :  { %v1798_v3 = vmul.f32 %v3869_v38, %v1778_v0  ;;  %v4709_v55 = vadd.f32 %v4367_v45, %v4212_v22  ;;  %v4712_v2 = vmul.f32 %v3876_v48, %v1791_v61  ;;  %v1936_v26 = vmul.f32 %v3876_v48, %v1778_v0  ;;  %v1765_v13 = vld [vmem:[#allocation2 + $0x20] sm:$0xf] }
 0x168   :  { %v1937_v33 = vmul.f32 %v3876_v48, %v1915_v1  ;;  %v4718_v5 = vadd.f32 %v4367_v45, %v4247_v37  ;;  %v4721_v15 = vmul.f32 %v3876_v48, %v1928_v7  ;;  %v1816_v22 = vadd.f32 %v4457_v29, %v1800_v11  ;;  %v1902_v6 = vld [vmem:[#allocation2 + $0x24] sm:$0x1] }
 0x169   :  { %5831 = vst [vmem:[#allocation87_spill] sm:$0xff] %v4712_v2  ;;  %v2413_v31 = vunpack.c.l.bf16 %v2397_v17  ;;  %v2008_v51 = vrot.slane %v1940_v32, 1  ;;  %v2009_v24 = vrot.slane %v1941_v21, 1  ;;  %v2411_v0 = vunpack.c.l.bf16 %v2395_v12  ;;  %v2534_v32 = vld [vmem:[#allocation2 + $0x24] sm:$0x1] }
 0x16a   :  { %v1763_v61 = vld [vmem:[#allocation2 + $0x10] sm:$0xf]  ;;  %v4727_v1 = vadd.f32 %v4367_v45, %v4260_v58  ;;  %v4730_v37 = vadd.f32 %v4457_v29, %v1811_v63  ;;  %v4733_v7 = vmul.f32 %v4468_v9, %v2549_v57  ;;  %v1814_v43 = vadd.f32 %v4457_v29, %v1798_v3 }
 0x16b   :  { %v1781_v11 = vunpack.c.l.bf16 %v1765_v13  ;;  %v2002_v17 = vrot.slane %v1936_v26, 1  ;;  %v2003_v35 = vrot.slane %v1937_v33, 1  ;;  %v1918_v34 = vunpack.c.l.bf16 %v1902_v6  ;;  %v1900_v6 = vld [vmem:[#allocation2 + $0x14] sm:$0x1] }
 0x16c   :  { %5832 = vst [vmem:[#allocation88_spill] sm:$0xff] %v4733_v7  ;;  %v1779_v21 = vunpack.c.l.bf16 %v1763_v61  ;;  %v1885_v23 = vadd.f32 %v4342_v19, %v1816_v22  ;;  %v4740_v63 = vmul.f32 %v5804_v50, %v2413_v31  ;;  %v2010_v57 = vsel %vm1998_vm8, %v2008_v51, %v2009_v24  ;;  %v4752_v19 = vld [vmem:[#allocation2 + $0x20] sm:$0xf]  ;;  %v93_v7 = vld [vmem:[#allocation2 + $0x30] sm:$0x1] }
 0x16d   :  { %v4744_v3 = vmul.f32 %v4468_v9, %v2413_v31  ;;  %v2547_v13 = vunpack.c.l.bf16 %v2531_v53  ;;  %v4747_v26 = vmul.f32 %v4468_v9, %v2411_v0  ;;  %v1883_v61 = vadd.f32 %v4406_v8, %v1814_v43  ;;  %5836 = vst [vmem:[#allocation92_spill] sm:$0xff] %v4752_v19  ;;  %v1680_v19 = vld [vmem:[#allocation2 + $0x28] sm:$0xf] }
 0x16e   :  { %5833 = vst [vmem:[#allocation89_spill] sm:$0xff] %v4740_v63  ;;  %v1801_v12 = vmul.f32 %v3869_v38, %v1781_v11  ;;  %v2550_v22 = vunpack.c.l.bf16 %v2534_v32  ;;  %v2004_v58 = vsel %vm1998_vm8, %v2002_v17, %v2003_v35  ;;  %v4756_v51 = vmul.f32 %v3876_v48, %v1781_v11  ;;  %v1695_v32 = vld [vmem:[#allocation2 + $0x3c] sm:$0x1]  ;;  %v4775_v17 = vld [vmem:[#allocation2 + $0x10] sm:$0xf] }
 0x16f   :  { %5834 = vst [vmem:[#allocation90_spill] sm:$0xff] %v4744_v3  ;;  %5835 = vst [vmem:[#allocation91_spill] sm:$0xff] %v4747_v26  ;;  %v4759_v24 = vmul.f32 %v3876_v48, %v1918_v34  ;;  %v1799_v31 = vmul.f32 %v3869_v38, %v1779_v21  ;;  %v4762_v53 = vadd.f32 %v2010_v57, %v1885_v23  ;;  %v1916_v8 = vunpack.c.l.bf16 %v1900_v6  ;;  %v4786_v6 = vld [vmem:[#allocation2 + $0x14] sm:$0x1]  ;;  %v1683_v63 = vld [vmem:[#allocation2 + $0x2c] sm:$0x1] }
 0x170   :  { %v4765_v33 = vmul.f32 %v5804_v50, %v2411_v0  ;;  %v4768_v43 = vmul.f32 %v3876_v48, %v1779_v21  ;;  %v4771_v35 = vmul.f32 %v4468_v9, %v2547_v13  ;;  %v1550_v23 = vrot.slane %v4655_v18, 4  ;;  %v264_v11 = vld [vmem:[#allocation2 + $0x1f8] sm:$0x1] }
 0x171   :  { %5837 = vst [vmem:[#allocation93_spill] sm:$0xff] %v4762_v53  ;;  %v4778_v57 = vadd.f32 %v2004_v58, %v1883_v61  ;;  %v4781_v0 = vadd.f32 %v4457_v29, %v1801_v12  ;;  %v4784_v21 = vmul.f32 %v4468_v9, %v2550_v22  ;;  %v1528_v13 = vshrl.u32 %v4695_v16, 16  ;;  %v270_v12 = vld [vmem:[#allocation2 + $0x208] sm:$0x1] }
 0x172   :  { %5838 = vst [vmem:[#allocation94_spill] sm:$0xff] %v4765_v33  ;;  %v4792_v26 = vadd.f32 %v4457_v29, %v1799_v31  ;;  %v1696_v18 = vsel %vm3663_vm4, %v1550_v23, %v1695_v32  ;;  %v4797_v58 = vmul.f32 %v3876_v48, %v1916_v8  ;;  %v1531_v31 = vshll.u32 %v4695_v16, 16  ;;  %v273_v23 = vld [vmem:[#allocation2 + $0x210] sm:$0x1] }
 0x173   :  { %5839 = vst [vmem:[#allocation95_spill] sm:$0xff] %v4784_v21  ;;  %1697 = vst [vmem:[#allocation2 + $0x3c] sm:$0x1] %v1696_v18  ;;  %v1530_v3 = vrot.slane %v1528_v13, 7  ;;  %v944_v33 = vmax.f32 %v4703_v42, 0.0  ;;  %v94_v32 = vsel %vm3663_vm4, 0, %v93_v7 }
 0x174   :  { %95 = vst [vmem:[#allocation2 + $0x30] sm:$0x1] %v94_v32  ;;  %v942_v61 = vmax.f32 %v4709_v55, 0.0  ;;  %v271_v13 = vsel %vm3663_vm4, 0, %v270_v12  ;;  %v947_v18 = vmax.f32 %v4718_v5, 0.0  ;;  %v265_v42 = vsel %vm3663_vm4, 0, %v264_v11 }
 0x175   :  { %v1534_v8 = vrot.slane %v1530_v3, 4  ;;  %v1533_v22 = vor.u32 %v1531_v31, %v1530_v3  ;;  %v3295_v34 = vpack.c.bf16 %v944_v33, %v944_v33  ;;  %272 = vst [vmem:[#allocation2 + $0x208] sm:$0x1] %v271_v13  ;;  %v945_v16 = vmax.f32 %v4727_v1, 0.0  ;;  %v267_v7 = vld [vmem:[#allocation2 + $0x200] sm:$0x1] }
 0x176   :  { %v3293_v32 = vpack.c.bf16 %v942_v61, %v942_v61  ;;  %v3298_v40 = vpack.c.bf16 %v947_v18, %v947_v18  ;;  %266 = vst [vmem:[#allocation2 + $0x1f8] sm:$0x1] %v265_v42  ;;  %v274_v55 = vsel %vm3663_vm4, 0, %v273_v23  ;;  %v282_v12 = vld [vmem:[#allocation2 + $0x228] sm:$0x1]  ;;  %v2006_v5 = vrot.slane %v4797_v58, 1 }
 0x177   :  { %v1684_v53 = vsel %vm3663_vm4, %v1534_v8, %v1683_v63  ;;  %v1681_v3 = vsel %vm3926_vm7, %v1533_v22, %v1680_v19  ;;  %v1552_v33 = vshrl.u32 %v3295_v34, 16  ;;  %v3296_v11 = vpack.c.bf16 %v945_v16, %v945_v16  ;;  %275 = vst [vmem:[#allocation2 + $0x210] sm:$0x1] %v274_v55  ;;  %v276_v1 = vld [vmem:[#allocation2 + $0x218] sm:$0x1] }
 0x178   :  { %1685 = vst [vmem:[#allocation2 + $0x2c] sm:$0x1] %v1684_v53  ;;  %1682 = vst [vmem:[#allocation2 + $0x28] sm:$0xf] %v1681_v3  ;;  %v1555_v31 = vshll.u32 %v3295_v34, 16  ;;  %v1536_v61 = vshrl.u32 %v3293_v32, 16  ;;  %v798_v23 = vadd.f32 %v4367_v45, %v4265_v27  ;;  %v790_v53 = vadd.f32 %v4367_v45, %v4268_v14 }
 0x179   :  { %v1701_v63 = vld [vmem:[#allocation2 + $0x44] sm:$0x1]  ;;  %1212 = vst.msk [vmem:[#allocation2 + $0x208] sm:$0xf] %vm39_vm5, %v3298_v40  ;;  %v268_v58 = vsel %vm3663_vm4, 0, %v267_v7  ;;  %v1554_v8 = vrot.slane %v1552_v33, 7  ;;  %v811_v40 = vadd.f32 %v4367_v45, %v4293_v4  ;;  %v1884_v14 = vadd.f32 %v4437_v56, %v4792_v26 }
 0x17a   :  { %v1698_v13 = vld [vmem:[#allocation2 + $0x40] sm:$0xf]  ;;  %v1689_v19 = vld [vmem:[#allocation2 + $0x34] sm:$0x1]  ;;  %1210 = vst.msk [vmem:[#allocation2 + $0x1f8] sm:$0xf] %vm39_vm5, %v3296_v11  ;;  %v803_v26 = vadd.f32 %v4367_v45, %v4302_v41  ;;  %v4859_v41 = vadd.f32 %v4419_v62, %v4781_v0 }
 0x17b   :  { %269 = vst [vmem:[#allocation2 + $0x200] sm:$0x1] %v268_v58  ;;  %v283_v34 = vsel %vm3663_vm4, 0, %v282_v12  ;;  %v1768_v22 = vld [vmem:[#allocation2 + $0x38] sm:$0xf]  ;;  %v1538_v27 = vrot.slane %v1536_v61, 7  ;;  %v1557_v7 = vor.u32 %v1555_v31, %v1554_v8 }
 0x17c   :  { %v1539_v18 = vshll.u32 %v3293_v32, 16  ;;  %v948_v42 = vmax.f32 %v798_v23, 0.0  ;;  %284 = vst [vmem:[#allocation2 + $0x228] sm:$0x1] %v283_v34  ;;  %v277_v16 = vsel %vm3663_vm4, 0, %v276_v1  ;;  %v1558_v55 = vrot.slane %v1554_v8, 4 }
 0x17d   :  { %v1686_v3 = vld [vmem:[#allocation2 + $0x30] sm:$0xf]  ;;  %v946_v33 = vmax.f32 %v790_v53, 0.0  ;;  %v951_v11 = vmax.f32 %v811_v40, 0.0  ;;  %278 = vst [vmem:[#allocation2 + $0x218] sm:$0x1] %v277_v16  ;;  %v1699_v32 = vsel %vm3926_vm7, %v1557_v7, %v1698_v13  ;;  %v1784_v23 = vunpack.c.l.bf16 %v1768_v22 }
 0x17e   :  { %v1905_v12 = vld [vmem:[#allocation2 + $0x3c] sm:$0x1]  ;;  %v1541_v58 = vor.u32 %v1539_v18, %v1538_v27  ;;  %v1542_v4 = vrot.slane %v1538_v27, 4  ;;  %v3299_v2 = vpack.c.bf16 %v948_v42, %v948_v42  ;;  %v1702_v61 = vsel %vm3663_vm4, %v1558_v55, %v1701_v63  ;;  %1700 = vst [vmem:[#allocation2 + $0x40] sm:$0xf] %v1699_v32 }
 0x17f   :  { %v3297_v1 = vpack.c.bf16 %v946_v33, %v946_v33  ;;  %v3302_v31 = vpack.c.bf16 %v951_v11, %v951_v11  ;;  %1703 = vst [vmem:[#allocation2 + $0x44] sm:$0x1] %v1702_v61  ;;  %v285_v13 = vld [vmem:[#allocation2 + $0x230] sm:$0x1]  ;;  %v4849_v63 = vadd.f32 %v4244_v49, %v4778_v57  ;;  %v5840_v34 = vrot.slane %v4768_v43, 1 }
 0x180   :  { %v1687_v8 = vsel %vm3926_vm7, %v1541_v58, %v1686_v3  ;;  %v1690_v56 = vsel %vm3663_vm4, %v1542_v4, %v1689_v19  ;;  %1213 = vst.msk [vmem:[#allocation2 + $0x210] sm:$0xf] %vm39_vm5, %v3299_v2  ;;  %v1921_v22 = vunpack.c.l.bf16 %v1905_v12  ;;  %v5841_v49 = vrot.slane %v4759_v24, 1  ;;  %v1903_v57 = vld [vmem:[#allocation2 + $0x2c] sm:$0x1] }
 0x181   :  { %v2007_v40 = vsel %vm1998_vm8, %v5840_v34, %v2006_v5  ;;  %1688 = vst [vmem:[#allocation2 + $0x30] sm:$0xf] %v1687_v8  ;;  %1691 = vst [vmem:[#allocation2 + $0x34] sm:$0x1] %v1690_v56  ;;  %v5842_v45 = vrot.slane %v4756_v51, 1  ;;  %v949_v5 = vmax.f32 %v803_v26, 0.0  ;;  %v5843_v19 = vunpack.c.l.bf16 %v4775_v17 }
 0x182   :  { %1211 = vst.msk [vmem:[#allocation2 + $0x200] sm:$0xf] %vm39_vm5, %v3297_v1  ;;  %1216 = vst.msk [vmem:[#allocation2 + $0x228] sm:$0xf] %vm39_vm5, %v3302_v31  ;;  %v5845_v24 = vunpack.c.l.bf16 %v4786_v6  ;;  %v1766_v0 = vld [vmem:[#allocation2 + $0x28] sm:$0xf]  ;;  %v4886_v7 = vadd.f32 %v2007_v40, %v1884_v14  ;;  %v4889_v55 = vmul.f32 %v3869_v38, %v1784_v23  ;;  %v4892_v17 = vmul.f32 %v3876_v48, %v1784_v23 }
 0x183   :  { %v4866_v2 = vsel %vm1998_vm8, %v5842_v45, %v5841_v49  ;;  %v4872_v27 = vmul.f32 %v5804_v50, %v5843_v19  ;;  %v5844_v18 = vmov %v5843_v19  ;;  %v286_v42 = vsel %vm3663_vm4, 0, %v285_v13  ;;  %v279_v16 = vld [vmem:[#allocation2 + $0x220] sm:$0x1]  ;;  %v60_v6 = vld [vmem:[#allocation2 + $0x124] sm:$0x1]  ;;  %v5848_v26 = vld [vmem:[#allocation56_spill] sm:$0xff] }
 0x184   :  { %v4877_v62 = vmul.f32 %v4468_v9, %v5844_v18  ;;  %v4882_v51 = vmul.f32 %v4468_v9, %v5845_v24  ;;  %v3300_v3 = vpack.c.bf16 %v949_v5, %v949_v5  ;;  %287 = vst [vmem:[#allocation2 + $0x230] sm:$0x1] %v286_v42  ;;  %v243_v33 = vld [vmem:[#allocation2 + $0x1c0] sm:$0x1]  ;;  %v4895_v9 = vmul.f32 %v3876_v48, %v1921_v22  ;;  %v2157_v12 = vld [vmem:[#allocation2 + $0x208] sm:$0xf] }
 0x185   :  { %v1919_v11 = vunpack.c.l.bf16 %v1903_v57  ;;  %v1894_v58 = vadd.f32 %v4326_v44, %v4549_v20  ;;  %v3518_v14 = vld [vmem:[%s5644_s2] ss:$0 sm:$0xff]  ;;  %v1782_v32 = vunpack.c.l.bf16 %v1766_v0  ;;  %v2155_v61 = vld [vmem:[#allocation2 + $0x1f8] sm:$0xf]  ;;  %v5846_v1 = vrot.slane %v4542_v52, 1  ;;  %v5849_v42 = vld [vmem:[#allocation57_spill] sm:$0xff] }
 0x186   :  { %v814_v4 = vadd.f32 %v3518_v14, %v4310_v46  ;;  %1214 = vst.msk [vmem:[#allocation2 + $0x218] sm:$0xf] %vm39_vm5, %v3300_v3  ;;  %v5847_v31 = vrot.slane %v4527_v28, 1  ;;  %v280_v8 = vsel %vm3663_vm4, 0, %v279_v16  ;;  %v806_v44 = vadd.f32 %v3518_v14, %v4316_v10  ;;  %v4912_v20 = vld [vmem:[#allocation2 + $0x2c] sm:$0x1] }
 0x187   :  { %281 = vst [vmem:[#allocation2 + $0x220] sm:$0x1] %v280_v8  ;;  %v244_v46 = vsel %vm3663_vm4, 0, %v243_v33  ;;  %v827_v13 = vadd.f32 %v3518_v14, %v5848_v26  ;;  %v61_v52 = vsel %vm3663_vm4, 0, %v60_v6  ;;  %v4922_v22 = vld [vmem:[#allocation2 + $0x28] sm:$0xf]  ;;  %v2173_v10 = vunpack.c.l.bf16 %v2157_v12 }
 0x188   :  { %v2037_v23 = vsel %vm1998_vm8, %v5847_v31, %v5846_v1  ;;  %v952_v56 = vmax.f32 %v814_v4, 0.0  ;;  %245 = vst [vmem:[#allocation2 + $0x1c0] sm:$0x1] %v244_v46  ;;  %62 = vst [vmem:[#allocation2 + $0x124] sm:$0x1] %v61_v52  ;;  %v4926_v45 = vmul.f32 %v3876_v48, %v1919_v11  ;;  %v2171_v57 = vunpack.c.l.bf16 %v2155_v61  ;;  %v5850_v1 = vld [vmem:[#allocation6_spill] sm:$0xff] }
 0x189   :  { %v68_v19 = vld [vmem:[#allocation2 + $0x1b4] sm:$0x1]  ;;  %v2075_v24 = vadd.f32 %v2037_v23, %v1894_v58  ;;  %v950_v0 = vmax.f32 %v806_v44, 0.0  ;;  %v819_v16 = vadd.f32 %v3518_v14, %v5849_v42  ;;  %v1802_v3 = vmul.f32 %v3869_v38, %v1782_v32  ;;  %v237_v12 = vld [vmem:[#allocation2 + $0x1b0] sm:$0x1]  ;;  %v5851_v8 = vld [vmem:[#allocation59_spill] sm:$0xff] }
 0x18a   :  { %v3303_v5 = vpack.c.bf16 %v952_v56, %v952_v56  ;;  %v4932_v33 = vmul.f32 %v3876_v48, %v1782_v32  ;;  %v955_v11 = vmax.f32 %v827_v13, 0.0  ;;  %v246_v4 = vld [vmem:[#allocation2 + $0x1c8] sm:$0x1]  ;;  %v4936_v61 = vld [vmem:[#allocation2 + $0x30] sm:$0xf]  ;;  %v4939_v31 = vmul.f32 %v5850_v1, %v2173_v10 }
 0x18b   :  { %v3301_v58 = vpack.c.bf16 %v950_v0, %v950_v0  ;;  %v69_v23 = vsel %vm3663_vm4, 0, %v68_v19  ;;  %v830_v44 = vadd.f32 %v3518_v14, %v5851_v8  ;;  %v4946_v56 = vmul.f32 %v5850_v1, %v2171_v57  ;;  %v4948_v46 = vld [vmem:[#allocation2 + $0x210] sm:$0xf]  ;;  %v240_v13 = vld [vmem:[#allocation2 + $0x1b8] sm:$0x1]  ;;  %v5852_v52 = vld [vmem:[#allocation60_spill] sm:$0xff] }
 0x18c   :  { %1217 = vst.msk [vmem:[#allocation2 + $0x230] sm:$0xf] %vm39_vm5, %v3303_v5  ;;  %v3306_v26 = vpack.c.bf16 %v955_v11, %v955_v11  ;;  %70 = vst [vmem:[#allocation2 + $0x1b4] sm:$0x1] %v69_v23  ;;  %v822_v5 = vadd.f32 %v3518_v14, %v5852_v52  ;;  %v4951_v10 = vld [vmem:[#allocation2 + $0x34] sm:$0x1]  ;;  %v4965_v14 = vadd.f32 %v4457_v29, %v1802_v3 }
 0x18d   :  { %v5853_v0 = vld [vmem:[#allocation23_spill] sm:$0xff]  ;;  %1215 = vst.msk [vmem:[#allocation2 + $0x220] sm:$0xf] %vm39_vm5, %v3301_v58  ;;  %v238_v19 = vsel %vm3663_vm4, 0, %v237_v12  ;;  %v953_v8 = vmax.f32 %v819_v16, 0.0  ;;  %v247_v57 = vsel %vm3663_vm4, 0, %v246_v4 }
 0x18e   :  { %v4954_v42 = vadd.f32 %v5853_v0, %v2075_v24  ;;  %v3510_v11 = vld [vmem:[%s5647_s5] sm:$0xff]   ;;  %v1783_v24 = vunpack.c.l.bf16 %v4936_v61  ;;  %v4969_v52 = vld [vmem:[#allocation2 + $0x34] sm:$0x1]  ;;  %v1299_v12 = vshrl.u32 %v3306_v26, 16  ;;  %239 = vst [vmem:[#allocation2 + $0x1b0] sm:$0x1] %v238_v19  ;;  %v1920_v61 = vunpack.c.l.bf16 %v4951_v10 }
 0x18f   :  { %v4971_v58 = vld [vmem:[#allocation2 + $0x200] sm:$0xf]  ;;  %248 = vst [vmem:[#allocation2 + $0x1c8] sm:$0x1] %v247_v57  ;;  %v1302_v4 = vshll.u32 %v3306_v26, 16  ;;  %v3304_v0 = vpack.c.bf16 %v953_v8, %v953_v8  ;;  %v956_v43 = vmax.f32 %v830_v44, 0.0 }
 0x190   :  { %v1301_v28 = vrot.slane %v1299_v12, 7  ;;  %v1445_v34 = vld [vmem:[#allocation2 + $0x1c4] sm:$0x1]  ;;  %v241_v29 = vsel %vm3663_vm4, 0, %v240_v13  ;;  %v954_v3 = vmax.f32 %v822_v5, 0.0  ;;  %v5715_v40 = vmov 0.0  }
 0x191   :  { %v2159_v6 = vld [vmem:[#allocation2 + $0x218] sm:$0xf]  ;;  %v1442_v19 = vld [vmem:[#allocation2 + $0x1c0] sm:$0xf]  ;;  %v1283_v57 = vshrl.u32 %v3304_v0, 16  ;;  %3440 = vmatprep.subr.bf16.mxu1 %v5715_v40  ;;  %v1803_v44 = vmul.f32 %v3869_v38, %v1783_v24  ;;  %v3307_v13 = vpack.c.bf16 %v956_v43, %v956_v43  ;;  %v1286_v49 = vshll.u32 %v3304_v0, 16  ;;  %3442 = vmatprep.mubr.msk.bf16.mxu1 %vm3523_vm9, %v5715_v40 }
 0x192   :  { %242 = vst [vmem:[#allocation2 + $0x1b8] sm:$0x1] %v241_v29  ;;  %v1304_v26 = vor.u32 %v1302_v4, %v1301_v28  ;;  %v1305_v8 = vrot.slane %v1301_v28, 4  ;;  %v1906_v12 = vld [vmem:[#allocation2 + $0x124] sm:$0x1]  ;;  %3441 = vmatpush3.bf16.msra.mxu1 %v3510_v11  ;;  %v3305_v53 = vpack.c.bf16 %v954_v3, %v954_v3  ;;  %v2175_v23 = vunpack.c.l.bf16 %v2159_v6 }
 0x193   :  { %v2161_v5 = vld [vmem:[#allocation2 + $0x228] sm:$0xf]  ;;  %v1285_v10 = vrot.slane %v1283_v57, 7  ;;  %3446 = vmatprep.subr.bf16.mxu1 %v5715_v40  ;;  %v1433_v18 = vld [vmem:[#allocation2 + $0x1b4] sm:$0x1]  ;;  %v1307_v16 = vshrl.u32 %v3307_v13, 16  ;;  %v1922_v4 = vunpack.c.l.bf16 %v1906_v12  ;;  %v1946_v6 = vmul.f32 %v3876_v48, %v1783_v24 }
 0x194   :  { %v1443_v29 = vsel %vm3926_vm7, %v1304_v26, %v1442_v19  ;;  %v1446_v32 = vsel %vm3663_vm4, %v1305_v8, %v1445_v34  ;;  %v1291_v0 = vshrl.u32 %v3305_v53, 16  ;;  %v2177_v3 = vunpack.c.l.bf16 %v2161_v5  ;;  %v1451_v26 = vld [vmem:[#allocation2 + $0x1cc] sm:$0x1]  ;;  %v2160_v34 = vld [vmem:[#allocation2 + $0x220] sm:$0xf] }
 0x195   :  { %1444 = vst [vmem:[#allocation2 + $0x1c0] sm:$0xf] %v1443_v29  ;;  %1447 = vst [vmem:[#allocation2 + $0x1c4] sm:$0x1] %v1446_v32  ;;  %v1288_v43 = vor.u32 %v1286_v49, %v1285_v10  ;;  %v1289_v28 = vrot.slane %v1285_v10, 4  ;;  %v1309_v19 = vrot.slane %v1307_v16, 7  ;;  %v1947_v16 = vmul.f32 %v3876_v48, %v1920_v61 }
 0x196   :  { %v1430_v11 = vld [vmem:[#allocation2 + $0x1b0] sm:$0xf]  ;;  %v1310_v57 = vshll.u32 %v3307_v13, 16  ;;  %v1448_v29 = vld [vmem:[#allocation2 + $0x1c8] sm:$0xf]  ;;  %v1293_v32 = vrot.slane %v1291_v0, 7  ;;  %v2176_v21 = vunpack.c.l.bf16 %v2160_v34 }
 0x197   :  { %v1431_v8 = vsel %vm3926_vm7, %v1288_v43, %v1430_v11  ;;  %v1434_v40 = vsel %vm3663_vm4, %v1289_v28, %v1433_v18  ;;  %v1294_v49 = vshll.u32 %v3305_v53, 16  ;;  %v4996_v12 = vld [vmem:[%s5646_s4] ss:$0 sm:$0xff]  ;;  %v1313_v5 = vrot.slane %v1309_v19, 4  ;;  %v1439_v43 = vld [vmem:[#allocation2 + $0x1bc] sm:$0x1] }
 0x198   :  { %v1819_v24 = vadd.f32 %v4996_v12, %v1803_v44  ;;  %1432 = vst [vmem:[#allocation2 + $0x1b0] sm:$0xf] %v1431_v8  ;;  %1435 = vst [vmem:[#allocation2 + $0x1b4] sm:$0x1] %v1434_v40  ;;  %v1312_v13 = vor.u32 %v1310_v57, %v1309_v19  ;;  %v2195_v18 = vmul.f32 %v5850_v1, %v2175_v23  ;;  %v1297_v11 = vrot.slane %v1293_v32, 4 }
 0x199   :  { %v1436_v10 = vld [vmem:[#allocation2 + $0x1b8] sm:$0xf]  ;;  %v5002_v28 = vmul.f32 %v3876_v48, %v1922_v4  ;;  %v1296_v53 = vor.u32 %v1294_v49, %v1293_v32  ;;  %v5004_v0 = vld [vmem:[#allocation2 + $0x230] sm:$0xf]  ;;  %v1452_v40 = vsel %vm3663_vm4, %v1313_v5, %v1451_v26  ;;  %v1820_v61 = vadd.f32 %v4996_v12, %v4889_v55 }
 0x19a   :  { %v1449_v44 = vsel %vm3926_vm7, %v1312_v13, %v1448_v29  ;;  %v5854_v19 = vunpack.c.l.bf16 %v4948_v46  ;;  %1453 = vst [vmem:[#allocation2 + $0x1cc] sm:$0x1] %v1452_v40  ;;  %v1440_v57 = vsel %vm3663_vm4, %v1297_v11, %v1439_v43  ;;  %v1828_v34 = vadd.f32 %v4996_v12, %v4660_v54  ;;  %v5857_v13 = vld [vmem:[#allocation65_spill] sm:$0xff] }
 0x19b   :  { %1450 = vst [vmem:[#allocation2 + $0x1c8] sm:$0xf] %v1449_v44  ;;  %v1437_v4 = vsel %vm3926_vm7, %v1296_v53, %v1436_v10  ;;  %v2017_v26 = vrot.slane %v1946_v6, 1  ;;  %v2018_v8 = vrot.slane %v1947_v16, 1  ;;  %v5855_v55 = vunpack.c.l.bf16 %v4971_v58  ;;  %1441 = vst [vmem:[#allocation2 + $0x1bc] sm:$0x1] %v1440_v57 }
 0x19c   :  { %v5015_v23 = vmul.f32 %v5850_v1, %v5854_v19  ;;  %v5029_v29 = vmul.f32 %v5850_v1, %v2177_v3  ;;  %v2089_v32 = vld [vmem:[#allocation2 + $0x168] ss:$88 sps:$4 sm:$0xff]   ;;  %1438 = vst [vmem:[#allocation2 + $0x1b8] sm:$0xf] %v1437_v4  ;;  %v5032_v60 = vadd.f32 %v2195_v18, %v4954_v42  ;;  %v2024_v54 = vrot.slane %v5002_v28, 1 }
 0x19d   :  { %v5026_v46 = vmul.f32 %v5850_v1, %v5855_v55  ;;  %v1887_v6 = vadd.f32 %v4564_v39, %v4965_v14  ;;  %v5039_v58 = vmul.f32 %v5850_v1, %v2176_v21  ;;  %v1888_v49 = vadd.f32 %v4589_v59, %v1819_v24  ;;  %v5856_v3 = vld [vmem:[#allocation76_spill] sm:$0xff]  ;;  %v2225_v10 = vld [vmem:[#allocation2 + $0x1c4] sm:$0x1] }
 0x19e   :  { %v1889_v16 = vadd.f32 %v5856_v3, %v1820_v61  ;;  %v1895_v5 = vadd.f32 %v5857_v13, %v4689_v47  ;;  %v1854_v43 = vunpack.c.l.bf16 %v2089_v32  ;;  %v5858_v18 = vld [vmem:[#allocation68_spill] sm:$0xff]  ;;  %v5859_v28 = vld [vmem:[#allocation63_spill] sm:$0xff]  ;;  %v5860_v39 = vrot.slane %v4926_v45, 1 }
 0x19f   :  { %v1769_v42 = vld [vmem:[#allocation2 + $0x120] ss:$144 sps:$4 sm:$0xff]   ;;  %v1896_v53 = vadd.f32 %v5858_v18, %v4730_v37  ;;  %v1897_v11 = vadd.f32 %v5859_v28, %v1828_v34  ;;  %v5861_v21 = vrot.slane %v4932_v33, 1  ;;  %v2019_v24 = vsel %vm1998_vm8, %v2017_v26, %v2018_v8  ;;  %v5869_v26 = vld [vmem:[#allocation82_spill] sm:$0xff]  ;;  %v2223_v13 = vld [vmem:[#allocation2 + $0x1b4] sm:$0x1] }
 0x1a0   :  { %v1785_v59 = vunpack.c.l.bf16 %v1769_v42  ;;  %v5862_v44 = vrot.slane %v4895_v9, 1  ;;  %v5863_v47 = vrot.slane %v4892_v17, 1  ;;  %v5864_v61 = vrot.slane %v4671_v25, 1  ;;  %v5867_v4 = vld [vmem:[#allocation87_spill] sm:$0xff]  ;;  %v5871_v9 = vld [vmem:[#allocation81_spill] sm:$0xff] }
 0x1a1   :  { %v2016_v14 = vsel %vm1998_vm8, %v5861_v21, %v5860_v39  ;;  %v5865_v37 = vrot.slane %v4668_v36, 1  ;;  %v2105_v45 = vunpack.c.h.bf16 %v2089_v32  ;;  %v5866_v33 = vrot.slane %v4721_v15, 1  ;;  %v2226_v18 = vld [vmem:[#allocation2 + $0x1cc] sm:$0x1]  ;;  %v5873_v39 = vld [vmem:[#allocation5_spill] sm:$0xff] }
 0x1a2   :  { %v2022_v40 = vsel %vm1998_vm8, %v5863_v47, %v5862_v44  ;;  %v5868_v57 = vrot.slane %v5867_v4, 1  ;;  %v5870_v8 = vrot.slane %v5869_v26, 1  ;;  %v5872_v55 = vrot.slane %v5871_v9, 1  ;;  %v2090_v15 = vld [vmem:[#allocation2 + $0x1c8] sm:$0xf] }
 0x1a3   :  { %v2040_v19 = vsel %vm1998_vm8, %v5865_v37, %v5864_v61  ;;  %v2067_v25 = vadd.f32 %v4866_v2, %v4859_v41  ;;  %v2241_v3 = vunpack.c.l.bf16 %v2225_v10  ;;  %v1805_v36 = vmul.f32 %v3869_v38, %v1785_v59  ;;  %v2088_v44 = vld [vmem:[#allocation2 + $0x1b8] sm:$0xf]  ;;  %v2224_v47 = vld [vmem:[#allocation2 + $0x1bc] sm:$0x1]  ;;  %v5874_v10 = vld [vmem:[#allocation7_spill] sm:$0xff] }
 0x1a4   :  { %v2043_v34 = vsel %vm1998_vm8, %v5868_v57, %v5866_v33  ;;  %v2046_v17 = vsel %vm1998_vm8, %v5872_v55, %v5870_v8  ;;  %v1950_v32 = vmul.f32 %v3876_v48, %v1785_v59  ;;  %v2068_v28 = vadd.f32 %v2016_v14, %v1887_v6  ;;  %v5875_v8 = vld [vmem:[#allocation8_spill] sm:$0xff] }
 0x1a5   :  { %v1874_v21 = vmul.f32 %v5873_v39, %v1854_v43  ;;  %v2069_v61 = vadd.f32 %v2019_v24, %v1888_v49  ;;  %v2070_v37 = vadd.f32 %v2022_v40, %v1889_v16  ;;  %v2076_v33 = vadd.f32 %v2040_v19, %v1895_v5  ;;  %v5876_v19 = vld [vmem:[#allocation36_spill] sm:$0xff] }
 0x1a6   :  { %v1821_v4 = vadd.f32 %v4996_v12, %v1805_v36  ;;  %v2023_v57 = vrot.slane %v1950_v32, 1  ;;  %v2103_v41 = vunpack.c.h.bf16 %v1769_v42  ;;  %v2104_v2 = vunpack.c.l.bf16 %v2088_v44 }
 0x1a7   :  { %v2125_v38 = vmul.f32 %v5874_v10, %v2105_v45  ;;  %v2239_v26 = vunpack.c.l.bf16 %v2223_v13  ;;  %v2106_v48 = vunpack.c.l.bf16 %v2090_v15  ;;  %v2242_v59 = vunpack.c.l.bf16 %v2226_v18  ;;  %v5879_v18 = vld [vmem:[#allocation73_spill] sm:$0xff] }
 0x1a8   :  { %v5082_v9 = vmul.f32 %v5875_v8, %v2105_v45  ;;  %v5085_v6 = vmul.f32 %v5875_v8, %v2241_v3  ;;  %v1890_v43 = vadd.f32 %v1874_v21, %v1821_v4  ;;  %v2240_v49 = vunpack.c.l.bf16 %v2224_v47  ;;  %v5880_v21 = vld [vmem:[#allocation44_spill] sm:$0xff] }
 0x1a9   :  { %v2025_v16 = vsel %vm1998_vm8, %v2023_v57, %v2024_v54  ;;  %v2124_v12 = vmul.f32 %v5874_v10, %v2104_v2  ;;  %v2077_v5 = vadd.f32 %v2043_v34, %v1896_v53  ;;  %v2078_v42 = vadd.f32 %v2046_v17, %v1897_v11  ;;  %v5878_v11 = vld [vmem:[#allocation85_spill] sm:$0xff]  ;;  %v5882_v4 = vld [vmem:[#allocation16_spill] sm:$0xff] }
 0x1aa   :  { %v5090_v14 = vmul.f32 %v5875_v8, %v2103_v41  ;;  %v2269_v24 = vmul.f32 %v5875_v8, %v2104_v2  ;;  %v2270_v40 = vmul.f32 %v5875_v8, %v2240_v49  ;;  %v5877_v45 = vunpack.c.l.bf16 %v5876_v19 }
 0x1ab   :  { %v5098_v3 = vmul.f32 %v5875_v8, %v2239_v26  ;;  %v2126_v54 = vmul.f32 %v5874_v10, %v2106_v48  ;;  %v5102_v36 = vmul.f32 %v5875_v8, %v2106_v48  ;;  %v5105_v53 = vmul.f32 %v5875_v8, %v2242_v59  ;;  %v5884_v59 = vld [vmem:[#allocation40_spill] sm:$0xff] }
 0x1ac   :  { %v2121_v55 = vmul.f32 %v5874_v10, %v5877_v45  ;;  %v2141_v34 = vadd.f32 %v2125_v38, %v5878_v11  ;;  %v2346_v32 = vrot.slane %v5085_v6, 1  ;;  %v2071_v13 = vadd.f32 %v2025_v16, %v1890_v43  ;;  %v5886_v43 = vld [vmem:[#allocation70_spill] sm:$0xff] }
 0x1ad   :  { %v2123_v15 = vmul.f32 %v5874_v10, %v2103_v41  ;;  %v2140_v39 = vadd.f32 %v2124_v12, %v5879_v18  ;;  %v5881_v44 = vunpack.c.l.bf16 %v5880_v21  ;;  %v5883_v57 = vunpack.c.l.bf16 %v5882_v4  ;;  %v5887_v18 = vld [vmem:[#allocation27_spill] sm:$0xff] }
 0x1ae   :  { %v2339_v26 = vrot.slane %v5090_v14, 1  ;;  %v2342_v38 = vrot.slane %v2269_v24, 1  ;;  %v2343_v48 = vrot.slane %v2270_v40, 1  ;;  %v5885_v49 = vunpack.c.l.bf16 %v5884_v59  ;;  %v5889_v14 = vld [vmem:[#allocation32_spill] sm:$0xff]  ;;  %v5890_v40 = vld [vmem:[#allocation42_spill] sm:$0xff] }
 0x1af   :  { %v2122_v47 = vmul.f32 %v5874_v10, %v5881_v44  ;;  %v2129_v2 = vmul.f32 %v5874_v10, %v5883_v57  ;;  %v2340_v41 = vrot.slane %v5098_v3, 1  ;;  %v2142_v16 = vadd.f32 %v2126_v54, %v5886_v43  ;;  %v5888_v57 = vld [vmem:[#allocation93_spill] sm:$0xff] }
 0x1b0   :  { %v2130_v6 = vmul.f32 %v5874_v10, %v5885_v49  ;;  %v2348_v12 = vrot.slane %v5102_v36, 1  ;;  %v2349_v45 = vrot.slane %v5105_v53, 1  ;;  %v2139_v11 = vadd.f32 %v2123_v15, %v2071_v13  ;;  %v5891_v10 = vld [vmem:[#allocation53_spill] sm:$0xff]  ;;  %v5892_v53 = vld [vmem:[#allocation47_spill] sm:$0xff] }
 0x1b1   :  { %v2133_v44 = vadd.f32 %v5887_v18, %v4886_v7  ;;  %v2134_v24 = vadd.f32 %v5889_v14, %v5888_v57  ;;  %v2135_v17 = vadd.f32 %v5890_v40, %v2067_v25  ;;  %v5132_v30 = vadd.f32 %v5026_v46, %v2140_v39  ;;  %v5893_v7 = vld [vmem:[#allocation14_spill] sm:$0xff]  ;;  %v5897_v14 = vld [vmem:[#allocation12_spill] sm:$0xff] }
 0x1b2   :  { %v2136_v3 = vadd.f32 %v5891_v10, %v2068_v28  ;;  %v2137_v49 = vadd.f32 %v2121_v55, %v2069_v61  ;;  %v2138_v54 = vadd.f32 %v2122_v47, %v2070_v37  ;;  %v5136_v36 = vsel %vm1998_vm8, %v2342_v38, %v2343_v48  ;;  %v5896_v39 = vld [vmem:[#allocation34_spill] sm:$0xff]  ;;  %v5898_v61 = vld [vmem:[#allocation15_spill] sm:$0xff]  ;;  %v5900_v38 = vld [vmem:[#allocation13_spill] sm:$0xff] }
 0x1b3   :  { %v2144_v13 = vadd.f32 %v5892_v53, %v2076_v33  ;;  %v2145_v15 = vadd.f32 %v2129_v2, %v2077_v5  ;;  %v2146_v43 = vadd.f32 %v2130_v6, %v2078_v42  ;;  %v5894_v18 = vunpack.c.l.bf16 %v5893_v7  ;;  %v5899_v55 = vld [vmem:[#allocation11_spill] sm:$0xff]  ;;  %v5903_v6 = vld [vmem:[#allocation22_spill] sm:$0xff]  ;;  %v5906_v7 = vld [vmem:[#allocation45_spill] sm:$0xff] }
 0x1b4   :  { %v5895_v25 = vunpack.c.l.bf16 %v5004_v0  ;;  %v2199_v28 = vadd.f32 %v5897_v14, %v5896_v39  ;;  %v2200_v37 = vadd.f32 %v5898_v61, %v4849_v63  ;;  %v2201_v47 = vadd.f32 %v5899_v55, %v2133_v44  ;;  %v5901_v5 = vld [vmem:[#allocation19_spill] sm:$0xff]  ;;  %v5904_v40 = vld [vmem:[#allocation18_spill] sm:$0xff] }
 0x1b5   :  { %v2190_v57 = vmul.f32 %v5850_v1, %v5894_v18  ;;  %v2202_v33 = vadd.f32 %v5900_v38, %v2134_v24  ;;  %v2203_v42 = vadd.f32 %v5901_v5, %v2135_v17  ;;  %v5902_v2 = vunpack.c.l.bf16 %v5876_v19  ;;  %v5912_v55 = vld [vmem:[#allocation54_spill] sm:$0xff] }
 0x1b6   :  { %v2198_v46 = vmul.f32 %v5850_v1, %v5895_v25  ;;  %v2204_v0 = vadd.f32 %v5903_v6, %v2136_v3  ;;  %v2205_v1 = vadd.f32 %v5904_v40, %v2137_v49  ;;  %v5905_v10 = vunpack.c.l.bf16 %v5880_v21  ;;  %v5910_v3 = vld [vmem:[#allocation43_spill] sm:$0xff]  ;;  %v5913_v5 = vld [vmem:[#allocation30_spill] sm:$0xff]  ;;  %v5915_v6 = vld [vmem:[#allocation29_spill] sm:$0xff] }
 0x1b7   :  { %v2263_v48 = vmul.f32 %v5875_v8, %v5902_v2  ;;  %v5907_v63 = vunpack.c.l.bf16 %v5906_v7  ;;  %v2206_v18 = vadd.f32 %v2190_v57, %v2138_v54  ;;  %v5908_v24 = vunpack.c.l.bf16 %v5882_v4  ;;  %v5924_v7 = vld [vmem:[#allocation33_spill] sm:$0xff] }
 0x1b8   :  { %v2265_v53 = vmul.f32 %v5875_v8, %v5905_v10  ;;  %v5909_v19 = vunpack.c.l.bf16 %v5884_v59  ;;  %v5911_v39 = vunpack.c.l.bf16 %v5910_v3  ;;  %v2207_v21 = vadd.f32 %v4946_v56, %v2139_v11  ;;  %v5917_v11 = vld [vmem:[#allocation48_spill] sm:$0xff] }
 0x1b9   :  { %v2266_v44 = vmul.f32 %v5875_v8, %v5907_v63  ;;  %v2279_v17 = vmul.f32 %v5875_v8, %v5908_v24  ;;  %v2209_v14 = vadd.f32 %v4939_v31, %v2141_v34  ;;  %v2210_v61 = vadd.f32 %v5015_v23, %v2142_v16  ;;  %v5918_v34 = vld [vmem:[#allocation28_spill] sm:$0xff]  ;;  %v5920_v16 = vld [vmem:[#allocation26_spill] sm:$0xff] }
 0x1ba   :  { %v2281_v25 = vmul.f32 %v5875_v8, %v5909_v19  ;;  %v2282_v49 = vmul.f32 %v5875_v8, %v5911_v39  ;;  %v2212_v54 = vadd.f32 %v5039_v58, %v2144_v13  ;;  %v2213_v4 = vadd.f32 %v5029_v29, %v2145_v15  ;;  %v5926_v19 = vld [vmem:[#allocation39_spill] sm:$0xff] }
 0x1bb   :  { %v2214_v57 = vadd.f32 %v2198_v46, %v2146_v43  ;;  %v2330_v38 = vrot.slane %v5912_v55, 1  ;;  %v2333_v59 = vrot.slane %v2263_v48, 1  ;;  %v5914_v2 = vrot.slane %v5913_v5, 1  ;;  %v5922_v46 = vld [vmem:[#allocation35_spill] sm:$0xff] }
 0x1bc   :  { %v5916_v40 = vrot.slane %v5915_v6, 1  ;;  %v2336_v10 = vrot.slane %v2265_v53, 1  ;;  %v2337_v56 = vrot.slane %v2266_v44, 1  ;;  %v2354_v31 = vrot.slane %v5917_v11, 1  ;;  %v5928_v44 = vld [vmem:[#allocation38_spill] sm:$0xff]  ;;  %v5933_v6 = vld [vmem:[#allocation37_spill] sm:$0xff] }
 0x1bd   :  { %v5919_v23 = vrot.slane %v5918_v34, 1  ;;  %v5921_v58 = vrot.slane %v5920_v16, 1  ;;  %v2357_v13 = vrot.slane %v2279_v17, 1  ;;  %v2360_v15 = vrot.slane %v2281_v25, 1  ;;  %v5931_v25 = vld [vmem:[#allocation50_spill] sm:$0xff] }
 0x1be   :  { %v2317_v8 = vsel %vm1998_vm8, %v5916_v40, %v5914_v2  ;;  %v2361_v43 = vrot.slane %v2282_v49, 1  ;;  %v5923_v48 = vrot.slane %v5922_v46, 1  ;;  %v5925_v63 = vrot.slane %v5924_v7, 1 }
 0x1bf   :  { %v2323_v29 = vsel %vm1998_vm8, %v5921_v58, %v5919_v23  ;;  %v5927_v53 = vrot.slane %v5926_v19, 1  ;;  %v5929_v3 = vrot.slane %v5928_v44, 1  ;;  %v2341_v55 = vsel %vm1998_vm8, %v2339_v26, %v2340_v41  ;;  %v5935_v23 = vld [vmem:[#allocation25_spill] sm:$0xff]  ;;  %v5937_v58 = vld [vmem:[#allocation20_spill] sm:$0xff]  ;;  %v5939_v41 = vld [vmem:[#allocation46_spill] sm:$0xff] }
 0x1c0   :  { %v2326_v24 = vsel %vm1998_vm8, %v5925_v63, %v5923_v48  ;;  %v5930_v5 = vrot.slane %v5082_v9, 1  ;;  %v5932_v49 = vrot.slane %v5931_v25, 1  ;;  %v5934_v40 = vrot.slane %v5933_v6, 1  ;;  %v5220_v19 = vld [vmem:[#allocation2 + $0x30] ss:$8 sps:$4 sm:$0xff]  }
 0x1c1   :  { %v2329_v39 = vsel %vm1998_vm8, %v5929_v3, %v5927_v53  ;;  %v2350_v34 = vsel %vm1998_vm8, %v2348_v12, %v2349_v45  ;;  %v5936_v16 = vrot.slane %v5935_v23, 1  ;;  %v5938_v46 = vrot.slane %v5937_v58, 1  ;;  %v5942_v12 = vld [vmem:[#allocation17_spill] sm:$0xff]  ;;  %v5951_v58 = vld [vmem:[#allocation94_spill] sm:$0xff] }
 0x1c2   :  { %v2347_v17 = vsel %vm1998_vm8, %v5930_v5, %v2346_v32  ;;  %v2332_v2 = vsel %vm1998_vm8, %v2330_v38, %v5932_v49  ;;  %v2335_v11 = vsel %vm1998_vm8, %v2333_v59, %v5934_v40  ;;  %v2338_v9 = vsel %vm1998_vm8, %v2336_v10, %v2337_v56  ;;  %v5941_v38 = vld [vmem:[#allocation41_spill] sm:$0xff]  ;;  %v5228_v10 = vld [vmem:[#allocation2 + $0x158] ss:$8 sps:$4 sm:$0xff]  }
 0x1c3   :  { %v2353_v26 = vsel %vm1998_vm8, %v5938_v46, %v5936_v16  ;;  %v5940_v32 = vrot.slane %v5939_v41, 1  ;;  %v2379_v7 = vadd.f32 %v2317_v8, %v2199_v28  ;;  %v2380_v63 = vadd.f32 %v5941_v38, %v2200_v37  ;;  %v5222_v59 = vld [vmem:[#allocation2 + $0x40] ss:$272 sps:$4 sm:$0xff]  }
 0x1c4   :  { %v5943_v45 = vrot.slane %v5942_v12, 1  ;;  %v2362_v44 = vsel %vm1998_vm8, %v2360_v15, %v2361_v43  ;;  %v2381_v3 = vadd.f32 %v2323_v29, %v2201_v47  ;;  %v2382_v5 = vadd.f32 %v2326_v24, %v2202_v33  ;;  %v5944_v43 = vld [vmem:[#allocation92_spill] sm:$0xff] }
 0x1c5   :  { %v2356_v48 = vsel %vm1998_vm8, %v2354_v31, %v5940_v32  ;;  %v2383_v56 = vadd.f32 %v2329_v39, %v2203_v42  ;;  %v2384_v25 = vadd.f32 %v2332_v2, %v2204_v0  ;;  %v2385_v31 = vadd.f32 %v2335_v11, %v2205_v1  ;;  %v2477_v16 = vld [vmem:[#allocation2 + $0x1a0] ss:$8 sps:$4 sm:$0xff]  }
 0x1c6   :  { %v2359_v53 = vsel %vm1998_vm8, %v2357_v13, %v5943_v45  ;;  %v2386_v28 = vadd.f32 %v2338_v9, %v2206_v18  ;;  %v2387_v8 = vadd.f32 %v2341_v55, %v2207_v21  ;;  %v2416_v37 = vunpack.c.l.bf16 %v5220_v19  ;;  %v5952_v9 = vld [vmem:[#allocation89_spill] sm:$0xff] }
 0x1c7   :  { %v2417_v49 = vunpack.c.h.bf16 %v5220_v19  ;;  %v2418_v6 = vunpack.c.l.bf16 %v5222_v59  ;;  %v2388_v13 = vadd.f32 %v5136_v36, %v5132_v30  ;;  %v5719_v15 = vunpack.c.h.bf16 %v5222_v59 }
 0x1c8   :  { %v5717_v47 = vunpack.c.l.bf16 %v5228_v10  ;;  %v5718_v33 = vunpack.c.h.bf16 %v5228_v10  ;;  %v2389_v42 = vadd.f32 %v2347_v17, %v2209_v14  ;;  %v2390_v0 = vadd.f32 %v2350_v34, %v2210_v61  ;;  %v5947_v61 = vld [vmem:[#allocation72_spill] sm:$0xff]  ;;  %v5949_v17 = vld [vmem:[#allocation83_spill] sm:$0xff] }
 0x1c9   :  { %v2391_v1 = vadd.f32 %v2353_v26, %v5032_v60  ;;  %v2392_v18 = vadd.f32 %v2356_v48, %v2212_v54  ;;  %v2393_v21 = vadd.f32 %v2359_v53, %v2213_v4  ;;  %v2394_v29 = vadd.f32 %v2362_v44, %v2214_v57  ;;  %v2469_v57 = vld [vmem:[#allocation2 + $0x80] ss:$8 sps:$4 sm:$0xff]  }
 0x1ca   :  { %v5945_v24 = vunpack.c.l.bf16 %v5944_v43  ;;  %v5946_v55 = vunpack.c.l.bf16 %v4922_v22  ;;  %v2436_v36 = vmul.f32 %v5804_v50, %v2416_v37  ;;  %v2437_v14 = vmul.f32 %v5804_v50, %v2417_v49 }
 0x1cb   :  { %v2438_v60 = vmul.f32 %v5804_v50, %v2418_v6  ;;  %v5948_v54 = vunpack.c.l.bf16 %v5947_v61  ;;  %v5950_v2 = vunpack.c.l.bf16 %v5949_v17  ;;  %v2444_v11 = vmul.f32 %v5804_v50, %v5719_v15 }
 0x1cc   :  { %v2434_v39 = vmul.f32 %v5804_v50, %v5945_v24  ;;  %v2435_v30 = vmul.f32 %v5804_v50, %v5946_v55  ;;  %v2445_v34 = vmul.f32 %v5804_v50, %v5717_v47  ;;  %v2446_v23 = vmul.f32 %v5804_v50, %v5718_v33  ;;  %v5954_v47 = vld [vmem:[#allocation79_spill] sm:$0xff] }
 0x1cd   :  { %v2442_v4 = vmul.f32 %v5804_v50, %v5948_v54  ;;  %v2443_v40 = vmul.f32 %v5804_v50, %v5950_v2  ;;  %v2447_v46 = vadd.f32 %v5951_v58, %v2379_v7  ;;  %v2448_v26 = vadd.f32 %v4872_v27, %v2380_v63  ;;  %v5953_v54 = vld [vmem:[#allocation69_spill] sm:$0xff]  ;;  %v5955_v33 = vld [vmem:[#allocation31_spill] sm:$0xff] }
 0x1ce   :  { %v2449_v41 = vadd.f32 %v5952_v9, %v2381_v3  ;;  %v2450_v32 = vadd.f32 %v2434_v39, %v2382_v5  ;;  %v2451_v48 = vadd.f32 %v2435_v30, %v2383_v56  ;;  %v2452_v38 = vadd.f32 %v2436_v36, %v2384_v25  ;;  %v5956_v5 = vld [vmem:[#allocation75_spill] sm:$0xff]  ;;  %v5958_v25 = vld [vmem:[#allocation9_spill] sm:$0xff] }
 0x1cf   :  { %v2485_v12 = vunpack.c.l.bf16 %v2469_v57  ;;  %v2486_v45 = vunpack.c.h.bf16 %v2469_v57  ;;  %v2453_v53 = vadd.f32 %v2437_v14, %v2385_v31  ;;  %v2454_v44 = vadd.f32 %v2438_v60, %v2386_v28  ;;  %v5959_v30 = vld [vmem:[#allocation77_spill] sm:$0xff]  ;;  %v5965_v14 = vld [vmem:[#allocation62_spill] sm:$0xff] }
 0x1d0   :  { %v2493_v24 = vunpack.c.l.bf16 %v2477_v16  ;;  %v2494_v55 = vunpack.c.h.bf16 %v2477_v16  ;;  %v2455_v2 = vadd.f32 %v5953_v54, %v2387_v8  ;;  %v2456_v50 = vadd.f32 %v5954_v47, %v2388_v13  ;;  %v5961_v13 = vld [vmem:[#allocation61_spill] sm:$0xff]  ;;  %v2538_v16 = vld [vmem:[#allocation2 + $0x44] sm:$0x1] }
 0x1d1   :  { %v2457_v15 = vadd.f32 %v5955_v33, %v2389_v42  ;;  %v2458_v7 = vadd.f32 %v2442_v4, %v2390_v0  ;;  %v2459_v58 = vadd.f32 %v2443_v40, %v2391_v1  ;;  %v2460_v27 = vadd.f32 %v2444_v11, %v2392_v18  ;;  %v5963_v42 = vld [vmem:[#allocation66_spill] sm:$0xff]  ;;  %v5966_v4 = vld [vmem:[#allocation67_spill] sm:$0xff] }
 0x1d2   :  { %v2461_v63 = vadd.f32 %v2445_v34, %v2393_v21  ;;  %v2462_v3 = vadd.f32 %v2446_v23, %v2394_v29  ;;  %v5957_v56 = vunpack.c.l.bf16 %v5956_v5  ;;  %v5960_v31 = vunpack.c.l.bf16 %v5959_v30  ;;  %v2537_v29 = vld [vmem:[#allocation2 + $0x3c] sm:$0x1]  ;;  %v5967_v40 = vld [vmem:[#allocation55_spill] sm:$0xff]  ;;  %v5968_v34 = vld [vmem:[#allocation64_spill] sm:$0xff] }
 0x1d3   :  { %v2505_v36 = vmul.f32 %v5958_v25, %v2485_v12  ;;  %v2506_v8 = vmul.f32 %v5958_v25, %v2486_v45  ;;  %v5962_v47 = vunpack.c.l.bf16 %v5961_v13  ;;  %v5964_v0 = vunpack.c.l.bf16 %v5963_v42 }
 0x1d4   :  { %v2503_v39 = vmul.f32 %v5958_v25, %v5957_v56  ;;  %v2504_v28 = vmul.f32 %v5958_v25, %v5960_v31  ;;  %v2513_v18 = vmul.f32 %v5958_v25, %v2493_v24  ;;  %v2514_v21 = vmul.f32 %v5958_v25, %v2494_v55  ;;  %v5972_v56 = vld [vmem:[#allocation52_spill] sm:$0xff] }
 0x1d5   :  { %v2511_v33 = vmul.f32 %v5958_v25, %v5962_v47  ;;  %v2512_v1 = vmul.f32 %v5958_v25, %v5964_v0  ;;  %v5292_v60 = vadd.f32 %v5965_v14, %v2447_v46  ;;  %v5295_v57 = vadd.f32 %v5966_v4, %v2448_v26  ;;  %v5969_v46 = vld [vmem:[#allocation51_spill] sm:$0xff]  ;;  %v5970_v26 = vld [vmem:[#allocation58_spill] sm:$0xff]  ;;  %v5980_v14 = vld [vmem:[#allocation84_spill] sm:$0xff] }
 0x1d6   :  { %v5298_v11 = vadd.f32 %v5967_v40, %v2449_v41  ;;  %v5301_v23 = vadd.f32 %v5968_v34, %v2450_v32  ;;  %v5303_v9 = vadd.f32 %v2503_v39, %v2451_v48  ;;  %v5305_v12 = vadd.f32 %v2504_v28, %v2452_v38  ;;  %v5971_v41 = vld [vmem:[#allocation49_spill] sm:$0xff]  ;;  %v2545_v38 = vld [vmem:[#allocation2 + $0x15c] sm:$0x1] }
 0x1d7   :  { %v5307_v45 = vadd.f32 %v2505_v36, %v2453_v53  ;;  %v5309_v24 = vadd.f32 %v2506_v8, %v2454_v44  ;;  %v5312_v55 = vadd.f32 %v5969_v46, %v2455_v2  ;;  %v5315_v54 = vadd.f32 %v5970_v26, %v2456_v50  ;;  %v2546_v53 = vld [vmem:[#allocation2 + $0x164] sm:$0x1]  ;;  %v3520_v44 = vld [vmem:[%s5645_s3 + $0x8] ss:$0 sm:$0xff]  ;;  %v5983_v46 = vld [vmem:[#allocation86_spill] sm:$0xff] }
 0x1d8   :  { %v5318_v5 = vadd.f32 %v5971_v41, %v2457_v15  ;;  %v2553_v32 = vunpack.c.l.bf16 %v2537_v29  ;;  %v5321_v25 = vadd.f32 %v5972_v56, %v2458_v7  ;;  %v5323_v48 = vadd.f32 %v2511_v33, %v2459_v58  ;;  %v5978_v29 = vld [vmem:[#allocation90_spill] sm:$0xff] }
 0x1d9   :  { %v2554_v39 = vunpack.c.l.bf16 %v2538_v16  ;;  %v5973_v2 = vunpack.c.l.bf16 %v5944_v43  ;;  %v5974_v30 = vunpack.c.l.bf16 %v4922_v22  ;;  %v5975_v31 = vunpack.c.l.bf16 %v4912_v20 }
 0x1da   :  { %v2577_v7 = vmul.f32 %v3520_v44, %v2416_v37  ;;  %v5976_v58 = vunpack.c.l.bf16 %v4969_v52  ;;  %v5338_v8 = vadd.f32 %v2512_v1, %v2460_v27  ;;  %v5340_v13 = vadd.f32 %v2513_v18, %v2461_v63 }
 0x1db   :  { %v2573_v50 = vmul.f32 %v3520_v44, %v5973_v2  ;;  %v2575_v15 = vmul.f32 %v3520_v44, %v5974_v30  ;;  %v2576_v28 = vmul.f32 %v3520_v44, %v5975_v31  ;;  %v5342_v47 = vadd.f32 %v2514_v21, %v2462_v3  ;;  %v5988_v2 = vld [vmem:[#allocation91_spill] sm:$0xff] }
 0x1dc   :  { %v2578_v36 = vmul.f32 %v3520_v44, %v5976_v58  ;;  %v2579_v43 = vmul.f32 %v3520_v44, %v2417_v49  ;;  %v2561_v22 = vunpack.c.l.bf16 %v2545_v38  ;;  %v2562_v33 = vunpack.c.l.bf16 %v2546_v53 }
 0x1dd   :  { %v2580_v42 = vmul.f32 %v3520_v44, %v2553_v32  ;;  %v2581_v20 = vmul.f32 %v3520_v44, %v2418_v6  ;;  %v2582_v0 = vmul.f32 %v3520_v44, %v2554_v39  ;;  %v5977_v37 = vunpack.c.l.bf16 %v5947_v61 }
 0x1de   :  { %v2637_v27 = vrot.slane %v5978_v29, 1  ;;  %v2640_v1 = vrot.slane %v2573_v50, 1  ;;  %v2643_v63 = vrot.slane %v2575_v15, 1  ;;  %v2644_v18 = vrot.slane %v2576_v28, 1 }
 0x1df   :  { %v2589_v52 = vmul.f32 %v3520_v44, %v5977_v37  ;;  %v2646_v3 = vrot.slane %v2577_v7, 1  ;;  %v2647_v21 = vrot.slane %v2578_v36, 1  ;;  %v5979_v19 = vunpack.c.l.bf16 %v5949_v17  ;;  %v5992_v7 = vld [vmem:[#allocation88_spill] sm:$0xff] }
 0x1e0   :  { %v5981_v4 = vunpack.c.l.bf16 %v5980_v14  ;;  %v5982_v34 = vunpack.c.h.bf16 %v5222_v59  ;;  %v2649_v16 = vrot.slane %v2579_v43, 1  ;;  %v5984_v61 = vunpack.c.l.bf16 %v5983_v46  ;;  %v5999_v14 = vld [vmem:[#allocation24_spill] sm:$0xff] }
 0x1e1   :  { %v2591_v49 = vmul.f32 %v3520_v44, %v5979_v19  ;;  %v5985_v41 = vunpack.c.l.bf16 %v5228_v10  ;;  %v2596_v56 = vmul.f32 %v3520_v44, %v2561_v22  ;;  %v5986_v38 = vunpack.c.h.bf16 %v5228_v10  ;;  %v5994_v10 = vld [vmem:[#allocation95_spill] sm:$0xff] }
 0x1e2   :  { %v2592_v40 = vmul.f32 %v3520_v44, %v5981_v4  ;;  %v2593_v6 = vmul.f32 %v3520_v44, %v5982_v34  ;;  %v2594_v26 = vmul.f32 %v3520_v44, %v5984_v61  ;;  %v2598_v39 = vmul.f32 %v3520_v44, %v2562_v33  ;;  %v5997_v19 = vld [vmem:[#allocation71_spill] sm:$0xff] }
 0x1e3   :  { %v2595_v32 = vmul.f32 %v3520_v44, %v5985_v41  ;;  %v2597_v53 = vmul.f32 %v3520_v44, %v5986_v38  ;;  %v5987_v17 = vrot.slane %v4771_v35, 1  ;;  %v5989_v50 = vrot.slane %v5988_v2, 1 }
 0x1e4   :  { %v5990_v59 = vrot.slane %v4882_v51, 1  ;;  %v5991_v15 = vrot.slane %v4877_v62, 1  ;;  %v2650_v28 = vrot.slane %v2580_v42, 1  ;;  %v5993_v58 = vrot.slane %v5992_v7, 1  ;;  %v5996_v62 = vld [vmem:[#allocation10_spill] sm:$0xff] }
 0x1e5   :  { %v2633_v30 = vsel %vm1998_vm8, %v5989_v50, %v5987_v17  ;;  %v5995_v43 = vrot.slane %v5994_v10, 1  ;;  %v2645_v35 = vsel %vm1998_vm8, %v2643_v63, %v2644_v18  ;;  %v2648_v22 = vsel %vm1998_vm8, %v2646_v3, %v2647_v21  ;;  %v6003_v63 = vld [vmem:[#allocation78_spill] sm:$0xff]  ;;  %v6005_v17 = vld [vmem:[#allocation21_spill] sm:$0xff] }
 0x1e6   :  { %v2636_v31 = vsel %vm1998_vm8, %v5991_v15, %v5990_v59  ;;  %v2639_v36 = vsel %vm1998_vm8, %v2637_v27, %v5993_v58  ;;  %v2651_v33 = vsel %vm1998_vm8, %v2649_v16, %v2650_v28  ;;  %v2652_v51 = vrot.slane %v2581_v20, 1 }
 0x1e7   :  { %v2642_v44 = vsel %vm1998_vm8, %v2640_v1, %v5995_v43  ;;  %v2653_v37 = vrot.slane %v2582_v0, 1  ;;  %v2661_v29 = vrot.slane %v5996_v62, 1  ;;  %v5998_v42 = vrot.slane %v5997_v19, 1  ;;  %v6001_v1 = vld [vmem:[#allocation80_spill] sm:$0xff] }
 0x1e8   :  { %v6000_v4 = vrot.slane %v5999_v14, 1  ;;  %v2664_v34 = vrot.slane %v2589_v52, 1  ;;  %v2667_v46 = vrot.slane %v2591_v49, 1  ;;  %v2668_v61 = vrot.slane %v2592_v40, 1 }
 0x1e9   :  { %v6002_v41 = vrot.slane %v6001_v1, 1  ;;  %v6004_v18 = vrot.slane %v6003_v63, 1  ;;  %v5394_v20 = vadd.f32 %v2633_v30, %v5292_v60  ;;  %v5397_v0 = vadd.f32 %v2636_v31, %v5295_v57  ;;  %v6007_v57 = vld [vmem:[#allocation74_spill] sm:$0xff] }
 0x1ea   :  { %v2657_v27 = vsel %vm1998_vm8, %v6000_v4, %v5998_v42  ;;  %v5400_v21 = vadd.f32 %v2639_v36, %v5298_v11  ;;  %v2670_v16 = vrot.slane %v2593_v6, 1  ;;  %v2671_v38 = vrot.slane %v2594_v26, 1 }
 0x1eb   :  { %v2660_v3 = vsel %vm1998_vm8, %v6004_v18, %v6002_v41  ;;  %v2673_v52 = vrot.slane %v2595_v32, 1  ;;  %v2674_v49 = vrot.slane %v2596_v56, 1  ;;  %v2654_v40 = vsel %vm1998_vm8, %v2652_v51, %v2653_v37 }
 0x1ec   :  { %v6006_v2 = vrot.slane %v6005_v17, 1  ;;  %v5407_v59 = vadd.f32 %v2657_v27, %v5312_v55  ;;  %v5410_v60 = vadd.f32 %v2660_v3, %v5315_v54  ;;  %v6008_v30 = vrot.slane %v6007_v57, 1 }
 0x1ed   :  { %v2669_v6 = vsel %vm1998_vm8, %v2667_v46, %v2668_v61  ;;  %v2676_v26 = vrot.slane %v2597_v53, 1  ;;  %v5417_v32 = vadd.f32 %v2642_v44, %v5301_v23  ;;  %v2711_v15 = vmax.f32 %v5394_v20, 0.0 }
 0x1ee   :  { %v2663_v50 = vsel %vm1998_vm8, %v2661_v29, %v6006_v2  ;;  %v2666_v11 = vsel %vm1998_vm8, %v2664_v34, %v6008_v30  ;;  %v2712_v55 = vmax.f32 %v5397_v0, 0.0  ;;  %v2713_v54 = vmax.f32 %v5400_v21, 0.0 }
 0x1ef   :  { %v5420_v56 = vadd.f32 %v2663_v50, %v5318_v5  ;;  %v2672_v31 = vsel %vm1998_vm8, %v2670_v16, %v2671_v38  ;;  %v2675_v28 = vsel %vm1998_vm8, %v2673_v52, %v2674_v49  ;;  %v2677_v7 = vrot.slane %v2598_v39, 1 }
 0x1f0   :  { %v5428_v58 = vadd.f32 %v2645_v35, %v5303_v9  ;;  %v5431_v23 = vadd.f32 %v2648_v22, %v5305_v12  ;;  %v5434_v5 = vadd.f32 %v2666_v11, %v5321_v25  ;;  %v2719_v53 = vmax.f32 %v5407_v59, 0.0 }
 0x1f1   :  { %v2720_v36 = vmax.f32 %v5410_v60, 0.0  ;;  %v5439_v10 = vadd.f32 %v2651_v33, %v5307_v45  ;;  %v5442_v43 = vadd.f32 %v2669_v6, %v5323_v48  ;;  %v2714_v39 = vmax.f32 %v5417_v32, 0.0 }
 0x1f2   :  { %v2721_v9 = vmax.f32 %v5420_v56, 0.0  ;;  %v2728_v12 = vsel %vm2727_vm10, %v2711_v15, 0.0  ;;  %v2729_v25 = vsel %vm2727_vm10, %v2712_v55, 0.0  ;;  %v2731_v45 = vsel %vm2727_vm10, %v2713_v54, 0.0 }
 0x1f3   :  { %v2678_v48 = vsel %vm1998_vm8, %v2676_v26, %v2677_v7  ;;  %v5457_v44 = vadd.f32 %v2672_v31, %v5338_v8  ;;  %v2715_v35 = vmax.f32 %v5428_v58, 0.0  ;;  %v2730_v22 = vadd.f32 %v2729_v25, %v2728_v12 }
 0x1f4   :  { %v2716_v33 = vmax.f32 %v5431_v23, 0.0  ;;  %v2722_v51 = vmax.f32 %v5434_v5, 0.0  ;;  %v2749_v37 = vsel %vm2727_vm10, %v2719_v53, 0.0  ;;  %v2750_v62 = vsel %vm2727_vm10, %v2720_v36, 0.0 }
 0x1f5   :  { %v5469_v29 = vadd.f32 %v2654_v40, %v5309_v24  ;;  %v5472_v8 = vadd.f32 %v2675_v28, %v5340_v13  ;;  %v2732_v19 = vadd.f32 %v2731_v45, %v2730_v22  ;;  %v2751_v42 = vadd.f32 %v2750_v62, %v2749_v37 }
 0x1f6   :  { %v2717_v14 = vmax.f32 %v5439_v10, 0.0  ;;  %v2723_v4 = vmax.f32 %v5442_v43, 0.0  ;;  %v2733_v27 = vsel %vm2727_vm10, %v2714_v39, 0.0  ;;  %v2752_v34 = vsel %vm2727_vm10, %v2721_v9, 0.0  ;;  %v3254_v43 = vld [vmem:[%s5652_s10] ss:$0 sm:$0xff] }
 0x1f7   :  { %v5483_v24 = vadd.f32 %v2678_v48, %v5342_v47  ;;  %v2734_v46 = vadd.f32 %v2733_v27, %v2732_v19  ;;  %v2753_v13 = vadd.f32 %v2752_v34, %v2751_v42  ;;  %v2724_v61 = vmax.f32 %v5457_v44, 0.0 }
 0x1f8   :  { %v2735_v1 = vsel %vm2727_vm10, %v2715_v35, 0.0  ;;  %v2737_v41 = vsel %vm2727_vm10, %v2716_v33, 0.0  ;;  %v2754_v63 = vsel %vm2727_vm10, %v2722_v51, 0.0  ;;  %v2718_v47 = vmax.f32 %v5469_v29, 0.0 }
 0x1f9   :  { %v2736_v18 = vadd.f32 %v2735_v1, %v2734_v46  ;;  %v2755_v3 = vadd.f32 %v2754_v63, %v2753_v13  ;;  %v2725_v16 = vmax.f32 %v5472_v8, 0.0  ;;  %v2739_v38 = vsel %vm2727_vm10, %v2717_v14, 0.0 }
 0x1fa   :  { %v2756_v52 = vsel %vm2727_vm10, %v2723_v4, 0.0  ;;  %v2726_v17 = vmax.f32 %v5483_v24, 0.0  ;;  %v2758_v2 = vsel %vm2727_vm10, %v2724_v61, 0.0  ;;  %v2741_v30 = vsel %vm2727_vm10, %v2718_v47, 0.0 }
 0x1fb   :  { %v2738_v49 = vadd.f32 %v2737_v41, %v2736_v18  ;;  %v2757_v40 = vadd.f32 %v2756_v52, %v2755_v3  ;;  %v2760_v11 = vsel %vm2727_vm10, %v2725_v16, 0.0  ;;  %v2842_v3 = vld [vmem:[%s5648_s7] sm:$0xf] }
 0x1fc   :  { %v2762_v31 = vsel %vm2727_vm10, %v2726_v17, 0.0 }
 0x1fd   :  { %v2740_v50 = vadd.f32 %v2739_v38, %v2738_v49  ;;  %v2759_v57 = vadd.f32 %v2758_v2, %v2757_v40  ;;  %v2856_v49 = vsel %vm2854_vm12, %v2842_v3, 0  ;;  %v6009_v40 = vmov 0.0   ;;  %v3248_v2 = vld [vmem:[%s5649_s6] ss:$0 sm:$0xff]  ;;  %v6011_v3 = vld [vmem:[#allocation4_spill] sm:$0xff] }
 0x1ff   :  { %v2742_v6 = vadd.f32 %v2741_v30, %v2740_v50  ;;  %v2761_v26 = vadd.f32 %v2760_v11, %v2759_v57 }
 0x201   :  { %v2743_v28 = vrot.slane %v2742_v6, 4  ;;  %v2763_v7 = vadd.f32 %v2762_v31, %v2761_v26 }
 0x203   :  { %v2744_v12 = vadd.f32 %v2743_v28, %v2742_v6  ;;  %v2764_v25 = vrot.slane %v2763_v7, 4  ;;  %v3511_v28 = vld [vmem:[%s5650_s9] sm:$0xff]  }
 0x205   :  { %v2745_v45 = vrot.slane %v2744_v12, 2  ;;  %v2765_v48 = vadd.f32 %v2764_v25, %v2763_v7  ;;  %v3251_v7 = vld [vmem:[%s5651_s8] ss:$0 sm:$0xff] }
 0x207   :  { %v2746_v22 = vadd.f32 %v2745_v45, %v2744_v12  ;;  %v2766_v37 = vrot.slane %v2765_v48, 2 }
 0x209   :  { %v2747_v62 = vrot.slane %v2746_v22, 1  ;;  %v2767_v19 = vadd.f32 %v2766_v37, %v2765_v48 }
 0x20b   :  { %v2748_v42 = vadd.f32 %v2747_v62, %v2746_v22  ;;  %v2768_v27 = vrot.slane %v2767_v19, 1 }
 0x20d   :  { %v2769_v34 = vadd.f32 %v2768_v27, %v2767_v19  ;;  %v2771_v46 = vmul.f32 0.015625, %v2748_v42  ;;  %v3524_v42 = vmov 1966171168  }
 0x20e   :  { %v2906_v27 = vunpack.c.l.s4 %v3524_v42 }
 0x20f   :  { %v2772_v13 = vmul.f32 0.015625, %v2769_v34  ;;  %v2773_v1 = vpack.c.bf16 %v2771_v46, %v2771_v46  ;;  %v6010_v46 = vld [vmem:[#allocation3_spill] sm:$0xff] }
 0x210   :  { %v2907_v34 = vunpack.c.0.s8 %v2906_v27 }
 0x211   :  { %v2774_v41 = vpack.c.bf16 %v2772_v13, %v2772_v13  ;;  %v2786_v63 = vunpack.c.l.b16 %v2773_v1 }
 0x212   :  { %v2910_v13 = vsub.s32 %v2907_v34, %v6010_v46 }
 0x213   :  { %v2787_v18 = vunpack.c.l.b16 %v2774_v41 }
 0x215   :  { %v2789_v38 = vsel %vm2788_vm11, %v2787_v18, %v2786_v63 }
 0x216   :  { %v2790_v52 = vpack.c.b16 %v2789_v38, %v2789_v38 }
 0x218   :  { %3443 = vmatmul.mubr.msk.bf16.vlgmr.msra.gmra.mrb[20].mxu1 %vm2727_vm10, %v2790_v52 }
 0x219   :  { %3447 = vmatpush3.bf16.msra.mxu1 %v2856_v49  ;;  %3448 = vmatprep.mubr.msk.bf16.mxu1 %vm3523_vm9, %v6009_v40 }
 0x21a   :  { %3452 = vmatprep.subr.bf16.mxu1 %v3511_v28 }
 0x2eb   :  { %v2834_v50 = vpop.f32.mrb[20].mxu1 }
 0x2ec   :  { %v2835_v57 = vadd.f32 %v3248_v2, %v2834_v50  ;;  %v3444_v30 = vpop.f32.mrb[21].mxu1 }
 0x2ed   :  { %v2837_v11 = vpop.f32.mrb[22].mxu1 }
 0x2ee   :  { %v2840_v6 = vmax.f32 %v2835_v57, 0.0  ;;  %v3445_v26 = vpop.f32.mrb[23].mxu1 }
 0x2f0   :  { %v2841_v31 = vpack.c.bf16 %v2840_v6, %v2840_v6 }
 0x2f2   :  { %3449 = vmatmul.mubr.msk.bf16.vlgmr.msra.gmra.mrb[24].mxu1 %vm2850_vm13, %v2841_v31 }
 0x2f3   :  { %3453 = vmatpush3.bf16.msra.mxu1 %v3511_v28 }
 0x3c5   :  { %v2892_v12 = vpop.f32.mrb[24].mxu1 }
 0x3c6   :  { %v2893_v25 = vadd.f32 %v3251_v7, %v2892_v12  ;;  %v3450_v45 = vpop.f32.mrb[25].mxu1 }
 0x3c7   :  { %v2895_v48 = vpop.f32.mrb[26].mxu1 }
 0x3c8   :  { %v3253_v22 = vmul.f32 -1.442695, %v2893_v25  ;;  %v3451_v37 = vpop.f32.mrb[27].mxu1 }
 0x3ca   :  { %3512 = vpow2.f32 %v3253_v22 }
 0x3d4   :  { %v3513_v62 = vpop.eup %3512 }
 0x3d5   :  { %v2901_v19 = vadd.f32 1.0, %v3513_v62 }
 0x3d7   :  { %3514 = vrcp.f32 %v2901_v19 }
 0x3e1   :  { %v3515_v1 = vpop.eup %3514 }
 0x3e2   :  { %v2911_v41 = vrot.slane %v3515_v1, %v2910_v13 }
 0x3e4   :  { %v2912_v63 = vcombine.high %v2911_v41, %v2911_v41  ;;  %v2919_v18 = vrot.slane %v2911_v41, %v2910_v13 }
 0x3e6   :  { %v2930_v38 = vrot.slane %v2919_v18, %v6011_v3  ;;  %v2926_v52 = vrot.slane %v2912_v63, %v2910_v13 }
 0x3e8   :  { %v2937_v49 = vmul.f32 %v2930_v38, %v2711_v15  ;;  %v2938_v40 = vmul.f32 %v2930_v38, %v2712_v55  ;;  %v2939_v2 = vmul.f32 %v2930_v38, %v2713_v54  ;;  %v2940_v50 = vmul.f32 %v2930_v38, %v2714_v39 }
 0x3e9   :  { %v2941_v57 = vmul.f32 %v2930_v38, %v2715_v35  ;;  %v2942_v30 = vmul.f32 %v2930_v38, %v2716_v33  ;;  %v2934_v20 = vrot.slane %v2926_v52, %v6011_v3  ;;  %v2943_v21 = vmul.f32 %v2930_v38, %v2717_v14 }
 0x3ea   :  { %v2953_v11 = vpack.c.bf16 %v2938_v40, %v2937_v49  ;;  %v2954_v6 = vpack.c.bf16 %v2940_v50, %v2939_v2  ;;  %v2944_v32 = vmul.f32 %v2930_v38, %v2718_v47 }
 0x3eb   :  { %v2955_v0 = vpack.c.bf16 %v2942_v30, %v2941_v57  ;;  %v2945_v15 = vmul.f32 %v2934_v20, %v2719_v53  ;;  %v2946_v55 = vmul.f32 %v2934_v20, %v2720_v36  ;;  %v2947_v23 = vmul.f32 %v2934_v20, %v2721_v9 }
 0x3ec   :  { %3454 = vmatprep.mubr.msk.bf16.mxu1 %vm2727_vm10, %v2953_v11  ;;  %v2956_v54 = vpack.c.bf16 %v2944_v32, %v2943_v21  ;;  %v2948_v10 = vmul.f32 %v2934_v20, %v2722_v51  ;;  %v2949_v39 = vmul.f32 %v2934_v20, %v2723_v4  ;;  %v2950_v59 = vmul.f32 %v2934_v20, %v2724_v61 }
 0x3ed   :  { %3455 = vmatmul.mubr.msk.bf16.vlgmr.msra.gmra.mrb[28].mxu1 %vm2727_vm10, %v2954_v6  ;;  %v2957_v58 = vpack.c.bf16 %v2946_v55, %v2945_v15  ;;  %v2951_v36 = vmul.f32 %v2934_v20, %v2725_v16  ;;  %v2952_v56 = vmul.f32 %v2934_v20, %v2726_v17 }
 0x3ee   :  { %3458 = vmatprep.mubr.msk.bf16.mxu1 %vm2727_vm10, %v2955_v0  ;;  %v2958_v60 = vpack.c.bf16 %v2948_v10, %v2947_v23  ;;  %v2959_v53 = vpack.c.bf16 %v2950_v59, %v2949_v39 }
 0x3ef   :  { %v2960_v5 = vpack.c.bf16 %v2952_v56, %v2951_v36 }
 0x3f5   :  { %3459 = vmatmul.mubr.msk.bf16.gmra.mrb[32].mxu1 %vm2727_vm10, %v2956_v54 }
 0x3f6   :  { %3462 = vmatprep.mubr.msk.bf16.mxu1 %vm2727_vm10, %v2957_v58 }
 0x3fd   :  { %3463 = vmatmul.mubr.msk.bf16.gmra.mrb[36].mxu1 %vm2727_vm10, %v2958_v60 }
 0x3fe   :  { %3466 = vmatprep.mubr.msk.bf16.mxu1 %vm2727_vm10, %v2959_v53 }
 0x405   :  { %3467 = vmatmul.mubr.msk.bf16.gmra.mrb[40].mxu1 %vm2727_vm10, %v2960_v5 }
 0x4c0   :  { %v3456_v9 = vpop.f32.mrb[28].mxu1 }
 0x4c1   :  { %v3043_v44 = vadd.f32 %v3456_v9, %v3254_v43  ;;  %v3034_v35 = vpop.f32.mrb[29].mxu1 }
 0x4c2   :  { %v3035_v33 = vadd.f32 %v3254_v43, %v3034_v35  ;;  %v3457_v51 = vpop.f32.mrb[30].mxu1 }
 0x4c3   :  { %3099 = vst.msk [vmem:[%s5653_s11 + $0x10] sm:$0xff] %vm2850_vm13, %v3043_v44  ;;  %v3046_v29 = vadd.f32 %v3457_v51, %v3254_v43  ;;  %v3037_v8 = vpop.f32.mrb[31].mxu1 }
 0x4c4   :  { %3097 = vst.msk [vmem:[%s5653_s11] sm:$0xff] %vm2850_vm13, %v3035_v33  ;;  %v3038_v14 = vadd.f32 %v3254_v43, %v3037_v8 }
 0x4c5   :  { %3100 = vst.msk [vmem:[%s5653_s11 + $0x18] sm:$0xff] %vm2850_vm13, %v3046_v29 }
 0x4c6   :  { %3098 = vst.msk [vmem:[%s5653_s11 + $0x8] sm:$0xff] %vm2850_vm13, %v3038_v14 }
 0x4c8   :  { %v3460_v4 = vpop.f32.mrb[32].mxu1 }
 0x4c9   :  { %v3059_v24 = vadd.f32 %v3460_v4, %v3254_v43  ;;  %v3050_v61 = vpop.f32.mrb[33].mxu1 }
 0x4ca   :  { %v3051_v47 = vadd.f32 %v3254_v43, %v3050_v61  ;;  %v3461_v16 = vpop.f32.mrb[34].mxu1 }
 0x4cb   :  { %3103 = vst.msk [vmem:[%s5653_s11 + $0x30] sm:$0xff] %vm2850_vm13, %v3059_v24  ;;  %v3062_v17 = vadd.f32 %v3461_v16, %v3254_v43  ;;  %v3053_v26 = vpop.f32.mrb[35].mxu1 }
 0x4cc   :  { %3101 = vst.msk [vmem:[%s5653_s11 + $0x20] sm:$0xff] %vm2850_vm13, %v3051_v47  ;;  %v3054_v31 = vadd.f32 %v3254_v43, %v3053_v26 }
 0x4cd   :  { %3104 = vst.msk [vmem:[%s5653_s11 + $0x38] sm:$0xff] %vm2850_vm13, %v3062_v17 }
 0x4ce   :  { %3102 = vst.msk [vmem:[%s5653_s11 + $0x28] sm:$0xff] %vm2850_vm13, %v3054_v31 }
 0x4d0   :  { %v3464_v28 = vpop.f32.mrb[36].mxu1 }
 0x4d1   :  { %v3075_v7 = vadd.f32 %v3464_v28, %v3254_v43  ;;  %v3066_v12 = vpop.f32.mrb[37].mxu1 }
 0x4d2   :  { %v3067_v25 = vadd.f32 %v3254_v43, %v3066_v12  ;;  %v3465_v45 = vpop.f32.mrb[38].mxu1 }
 0x4d3   :  { %3107 = vst.msk [vmem:[%s5653_s11 + $0x50] sm:$0xff] %vm2850_vm13, %v3075_v7  ;;  %v3078_v48 = vadd.f32 %v3465_v45, %v3254_v43  ;;  %v3069_v22 = vpop.f32.mrb[39].mxu1 }
 0x4d4   :  { %3105 = vst.msk [vmem:[%s5653_s11 + $0x40] sm:$0xff] %vm2850_vm13, %v3067_v25  ;;  %v3070_v37 = vadd.f32 %v3254_v43, %v3069_v22 }
 0x4d5   :  { %3108 = vst.msk [vmem:[%s5653_s11 + $0x58] sm:$0xff] %vm2850_vm13, %v3078_v48 }
 0x4d6   :  { %3106 = vst.msk [vmem:[%s5653_s11 + $0x48] sm:$0xff] %vm2850_vm13, %v3070_v37 }
 0x4d8   :  { %v3468_v62 = vpop.f32.mrb[40].mxu1 }
 0x4d9   :  { %v3091_v19 = vadd.f32 %v3468_v62, %v3254_v43  ;;  %v3082_v42 = vpop.f32.mrb[41].mxu1 }
 0x4da   :  { %v3083_v27 = vadd.f32 %v3254_v43, %v3082_v42  ;;  %v3469_v34 = vpop.f32.mrb[42].mxu1 }
 0x4db   :  { %3111 = vst.msk [vmem:[%s5653_s11 + $0x70] sm:$0xff] %vm2850_vm13, %v3091_v19  ;;  %v3094_v46 = vadd.f32 %v3469_v34, %v3254_v43  ;;  %v3085_v13 = vpop.f32.mrb[43].mxu1 }
 0x4dc   :  { %3109 = vst.msk [vmem:[%s5653_s11 + $0x60] sm:$0xff] %vm2850_vm13, %v3083_v27  ;;  %v3086_v1 = vadd.f32 %v3254_v43, %v3085_v13 }
 0x4dd   :  { %3112 = vst.msk [vmem:[%s5653_s11 + $0x78] sm:$0xff] %vm2850_vm13, %v3094_v46 }
 0x4de   :  { %3110 = vst.msk [vmem:[%s5653_s11 + $0x68] sm:$0xff] %vm2850_vm13, %v3086_v1 }

</bundles_post_ra>
